<compile_context>
chip_gen: v5e
topology: v5e:2x2
jax: 0.10.0
libtpu: 0.0.40
codegen_flags: <defaults>
</compile_context>

<pallas_src>
import jax
import jax.numpy as jnp
from jax import lax
from jax.experimental import pallas as pl
from jax.experimental.pallas import tpu as pltpu


# ----------------------------- shared gate math --------------------------------

def _lstm_gates(gates, c, H):
    """PyTorch gate order (i, f, g, o); gates:(B,4H) f32, c:(B,H) f32."""
    i_g = jax.nn.sigmoid(gates[:, 0 * H:1 * H])
    f_g = jax.nn.sigmoid(gates[:, 1 * H:2 * H])
    g_g = jnp.tanh(gates[:, 2 * H:3 * H])
    o_g = jax.nn.sigmoid(gates[:, 3 * H:4 * H])
    c_new = f_g * c + i_g * g_g
    h_new = o_g * jnp.tanh(c_new)
    return h_new, c_new


# ------------------------------- fused kernel ----------------------------------

def _seq2seq_kernel(mask_ref,        # SMEM (T,) int32   teacher-forcing mask (scalar prefetch)
                    enc_gx_ref,      # (S, B, 4H) f32    precomputed  src_emb @ W_ih + b_enc
                    enc_whh_ref,     # (H, 4H)    f32    encoder recurrent weights
                    tgt_gx_ref,      # (T, B, 4H) f32    W_in_folded[target]  (no bias)
                    dec_whh_ref,     # (H, 4H)    f32    decoder recurrent weights
                    dec_b_ref,       # (1, 4H)    f32    decoder bias
                    w_in_ref,        # (V, 4H)    f32    dec_emb @ dec_W_ih  (folded)
                    fc_w_ref,        # (H, V)     f32    hidden -> vocab
                    fc_b_ref,        # (1, V)     f32
                    out_ref,         # (T, B, V)  f32    logits (row 0 left zero)
                    h_sc, c_sc, xg_sc):
    S = enc_gx_ref.shape[0]
    T = out_ref.shape[0]
    B, H = h_sc.shape
    V = out_ref.shape[2]

    # outputs[0] stays zero, matching the torch.zeros initialization.
    out_ref[0] = jnp.zeros((B, V), jnp.float32)

    # Loop-invariant loads / constants (hoisted out of the time loops).
    enc_whh = enc_whh_ref[...]
    dec_whh = dec_whh_ref[...]
    dec_b = dec_b_ref[...]
    w_in = w_in_ref[...]
    fc_w = fc_w_ref[...]
    fc_b = fc_b_ref[...]
    col = lax.broadcasted_iota(jnp.int32, (B, V), 1)

    # --------------------------- encoder recurrence ---------------------------
    h_sc[...] = jnp.zeros_like(h_sc)
    c_sc[...] = jnp.zeros_like(c_sc)

    def enc_step(t, carry):
        h = h_sc[...]
        c = c_sc[...]
        gates = enc_gx_ref[t] + jnp.dot(h, enc_whh,
                                        preferred_element_type=jnp.float32)
        h_new, c_new = _lstm_gates(gates, c, H)
        h_sc[...] = h_new
        c_sc[...] = c_new
        return carry

    lax.fori_loop(0, S, enc_step, 0, unroll=True)

    # --------------------------- decoder recurrence ---------------------------
    # Step 0 always consumes target[0] (teacher-forced by construction).
    xg_sc[...] = tgt_gx_ref[0]

    def dec_step(g, carry):
        h = h_sc[...]
        c = c_sc[...]
        gates = (xg_sc[...] + dec_b
                 + jnp.dot(h, dec_whh, preferred_element_type=jnp.float32))
        h_new, c_new = _lstm_gates(gates, c, H)
        h_sc[...] = h_new
        c_sc[...] = c_new

        logits = jnp.dot(h_new, fc_w, preferred_element_type=jnp.float32) + fc_b
        out_ref[g + 1] = logits

        # Prepare the input-gate pre-activations for the next decoded step.
        # (At g == T-2 the result is never consumed; indices stay in bounds.)
        teacher = mask_ref[g + 1] > 0

        @pl.when(teacher)
        def _():
            xg_sc[...] = tgt_gx_ref[g + 1]

        @pl.when(jnp.logical_not(teacher))
        def _():
            # Greedy argmax (first max index) as a one-hot, folded straight
            # through the (V, 4H) embedding+input weights.
            mx = jnp.max(logits, axis=1, keepdims=True)
            best = jnp.min(jnp.where(logits == mx, col, V), axis=1, keepdims=True)
            prev_oh = (col == best).astype(jnp.float32)
            xg_sc[...] = jnp.dot(prev_oh, w_in,
                                 preferred_element_type=jnp.float32)

        return carry

    lax.fori_loop(0, T - 1, dec_step, 0, unroll=True)


# ------------------------------ Model (glue) -----------------------------------

class Seq2SeqPallas:
    """JAX/Pallas port of the PyTorch Seq2Seq(encoder, decoder) forward pass."""

    def __init__(self, key, src_vocab, tgt_vocab, emb_dim, hidden_dim):
        ks = jax.random.split(key, 10)
        s = 0.1
        hp = jax.lax.Precision.HIGHEST
        self.hidden_dim = hidden_dim
        self.emb_dim = emb_dim
        self.tgt_vocab = tgt_vocab

        # Encoder: Embedding(src_vocab, E) + LSTM(E -> H).  All f32.
        self.enc_emb = s * jax.random.normal(ks[0], (src_vocab, emb_dim), jnp.float32)
        self.enc_wih = s * jax.random.normal(ks[1], (emb_dim, 4 * hidden_dim), jnp.float32)
        self.enc_whh = s * jax.random.normal(ks[2], (hidden_dim, 4 * hidden_dim), jnp.float32)
        self.enc_b = s * jax.random.normal(ks[3], (1, 4 * hidden_dim), jnp.float32)

        # Decoder: Embedding(tgt_vocab, E) + LSTM(E -> H) + Linear(H, tgt_vocab).
        self.dec_emb = s * jax.random.normal(ks[4], (tgt_vocab, emb_dim), jnp.float32)
        self.dec_wih = s * jax.random.normal(ks[5], (emb_dim, 4 * hidden_dim), jnp.float32)
        self.dec_whh = s * jax.random.normal(ks[6], (hidden_dim, 4 * hidden_dim), jnp.float32)
        self.dec_b = s * jax.random.normal(ks[7], (1, 4 * hidden_dim), jnp.float32)
        self.fc_w = s * jax.random.normal(ks[8], (hidden_dim, tgt_vocab), jnp.float32)
        self.fc_b = s * jax.random.normal(ks[9], (1, tgt_vocab), jnp.float32)

        # Fold the decoder embedding into the input-gate weights: (V, 4H).
        self.w_in_folded = jnp.dot(self.dec_emb, self.dec_wih, precision=hp)

        self._fwd_jit = jax.jit(self._forward_impl)

    # ---- full forward: one fused pallas_call ----
    def _forward_impl(self, source, target, tf_key, ratio):
        S, B = source.shape
        T = target.shape[0]
        V = self.tgt_vocab
        H = self.hidden_dim
        hp = jax.lax.Precision.HIGHEST

        # Hoist the encoder input projection out of the recurrence (one matmul).
        src_emb = jnp.take(self.enc_emb, source, axis=0)                    # (S,B,E)
        enc_gx = jnp.einsum('sbe,eg->sbg', src_emb, self.enc_wih,
                            precision=hp) + self.enc_b                      # (S,B,4H)

        # Pre-gather teacher-forced decoder input gates (folded emb+W_ih rows).
        tgt_gx = jnp.take(self.w_in_folded, target, axis=0)                 # (T,B,4H)

        # Teacher-forcing mask: one draw per timestep (like random.random()).
        # mask[t] gates the input of decoder iteration t+1; mask[0] is unused.
        draws = jax.random.uniform(tf_key, (T,))
        tf_mask = (draws < ratio).astype(jnp.int32)

        grid_spec = pltpu.PrefetchScalarGridSpec(
            num_scalar_prefetch=1,                                          # tf_mask -> SMEM
            grid=(1,),
            in_specs=[
                pl.BlockSpec((S, B, 4 * H), lambda i, m: (0, 0, 0)),        # enc_gx
                pl.BlockSpec((H, 4 * H), lambda i, m: (0, 0)),              # enc_whh
                pl.BlockSpec((T, B, 4 * H), lambda i, m: (0, 0, 0)),        # tgt_gx
                pl.BlockSpec((H, 4 * H), lambda i, m: (0, 0)),              # dec_whh
                pl.BlockSpec((1, 4 * H), lambda i, m: (0, 0)),              # dec_b
                pl.BlockSpec((V, 4 * H), lambda i, m: (0, 0)),              # w_in_folded
                pl.BlockSpec((H, V), lambda i, m: (0, 0)),                  # fc_w
                pl.BlockSpec((1, V), lambda i, m: (0, 0)),                  # fc_b
            ],
            out_specs=pl.BlockSpec((T, B, V), lambda i, m: (0, 0, 0)),
            scratch_shapes=[pltpu.VMEM((B, H), jnp.float32),                # h carry
                            pltpu.VMEM((B, H), jnp.float32),                # c carry
                            pltpu.VMEM((B, 4 * H), jnp.float32)],           # input gates carry
        )

        flops = (2 * S * B * H * 4 * H                  # encoder h @ W_hh
                 + 2 * (T - 1) * B * H * 4 * H          # decoder h @ W_hh
                 + 2 * (T - 1) * B * H * V              # logits
                 + 2 * (T - 1) * B * V * 4 * H)         # greedy one-hot fold (upper bound)
        transcendentals = (S + T - 1) * B * 5 * H
        bytes_accessed = 4 * (S * B * 4 * H + T * B * 4 * H + 2 * H * 4 * H
                              + V * 4 * H + H * V + T * B * V)

        return pl.pallas_call(
            _seq2seq_kernel,
            grid_spec=grid_spec,
            out_shape=jax.ShapeDtypeStruct((T, B, V), jnp.float32),
            compiler_params=pltpu.CompilerParams(
                dimension_semantics=("arbitrary",)),
            cost_estimate=pl.CostEstimate(
                flops=flops, transcendentals=transcendentals,
                bytes_accessed=bytes_accessed),
        )(tf_mask, enc_gx, self.enc_whh, tgt_gx, self.dec_whh, self.dec_b,
          self.w_in_folded, self.fc_w, self.fc_b)

    def forward(self, source, target, teacher_force_ratio=0.5, tf_key=None):
        if tf_key is None:
            tf_key = jax.random.PRNGKey(42)
        return self._fwd_jit(source, target, tf_key,
                             jnp.float32(teacher_force_ratio))


# ------------------------- pure-JAX reference (for checking) -------------------

def _reference_forward(model, source, target, tf_mask):
    """Direct transcription of the PyTorch loop; tf_mask[t] gates input of step t+1."""
    S, B = source.shape
    T = target.shape[0]
    V = model.tgt_vocab
    H = model.hidden_dim
    hp = jax.lax.Precision.HIGHEST

    h = jnp.zeros((B, H), jnp.float32)
    c = jnp.zeros((B, H), jnp.float32)
    for t in range(S):
        x = model.enc_emb[source[t]]
        gates = (jnp.dot(x, model.enc_wih, precision=hp) + model.enc_b
                 + jnp.dot(h, model.enc_whh, precision=hp))
        h, c = _lstm_gates(gates, c, H)

    outputs = [jnp.zeros((B, V), jnp.float32)]
    x_tok = target[0]
    for t in range(1, T):
        x = model.dec_emb[x_tok]
        gates = (jnp.dot(x, model.dec_wih, precision=hp) + model.dec_b
                 + jnp.dot(h, model.dec_whh, precision=hp))
        h, c = _lstm_gates(gates, c, H)
        logits = jnp.dot(h, model.fc_w, precision=hp) + model.fc_b
        outputs.append(logits)
        best = jnp.argmax(logits, axis=1).astype(target.dtype)
        x_tok = jnp.where(tf_mask[t] > 0, target[t], best)
    return jnp.stack(outputs, axis=0)


# --------------------------------- Driver --------------------------------------

if __name__ == "__main__":
    key = jax.random.PRNGKey(0)
    k_model, k_src, k_tgt, k_tf = jax.random.split(key, 4)

    SRC_VOCAB = 48
    TGT_VOCAB = 128     # "len(english.vocab)" stand-in (lane-dense)
    EMB = 32
    HIDDEN = 32
    BATCH = 8
    SRC_LEN = 8
    TGT_LEN = 8

    model = Seq2SeqPallas(k_model, SRC_VOCAB, TGT_VOCAB, EMB, HIDDEN)

    source = jax.random.randint(k_src, (SRC_LEN, BATCH), 0, SRC_VOCAB, dtype=jnp.int32)
    target = jax.random.randint(k_tgt, (TGT_LEN, BATCH), 0, TGT_VOCAB, dtype=jnp.int32)

    # Main run (stochastic teacher forcing, like the PyTorch forward).
    outputs = model.forward(source, target, teacher_force_ratio=0.5, tf_key=k_tf)
    outputs = jax.block_until_ready(outputs)
    assert outputs.shape == (TGT_LEN, BATCH, TGT_VOCAB)
    assert bool(jnp.all(outputs[0] == 0.0))
    assert bool(jnp.all(jnp.isfinite(outputs)))

    # Deterministic correctness check: ratio=1.0 (fully teacher-forced) vs. a
    # pure-JAX transcription of the PyTorch loop.
    out_tf = jax.block_until_ready(
        model.forward(source, target, teacher_force_ratio=1.0, tf_key=k_tf))
    ref_tf = _reference_forward(model, source, target,
                                jnp.ones((TGT_LEN,), jnp.int32))
    assert bool(jnp.allclose(out_tf, ref_tf, rtol=2e-3, atol=2e-3)), \
        float(jnp.max(jnp.abs(out_tf - ref_tf)))

    # Structural check of the greedy path: ratio=0.0 (never teacher-forced).
    out_greedy = jax.block_until_ready(
        model.forward(source, target, teacher_force_ratio=0.0, tf_key=k_tf))
    assert bool(jnp.all(jnp.isfinite(out_greedy)))

    print("KERNEL_OK")
</pallas_src>

<mosaic_0001>
module attributes {stable_mosaic.version = 11 : i64} {
  func.func @_seq2seq_kernel(%arg0: i32, %arg1: memref<8xi32, #tpu.memory_space<smem>>, %arg2: memref<8x8x128xf32, #tpu.memory_space<vmem>>, %arg3: memref<32x128xf32, #tpu.memory_space<vmem>>, %arg4: memref<8x8x128xf32, #tpu.memory_space<vmem>>, %arg5: memref<32x128xf32, #tpu.memory_space<vmem>>, %arg6: memref<1x128xf32, #tpu.memory_space<vmem>>, %arg7: memref<128x128xf32, #tpu.memory_space<vmem>>, %arg8: memref<32x128xf32, #tpu.memory_space<vmem>>, %arg9: memref<1x128xf32, #tpu.memory_space<vmem>>, %arg10: memref<8x8x128xf32, #tpu.memory_space<vmem>>, %arg11: memref<8x32xf32, #tpu.memory_space<vmem>>, %arg12: memref<8x32xf32, #tpu.memory_space<vmem>>, %arg13: memref<8x128xf32, #tpu.memory_space<vmem>>) attributes {dimension_semantics = [#tpu.dimension_semantics<arbitrary>], iteration_bounds = array<i64: 1>, scalar_prefetch = 1 : i64, scratch_operands = 3 : i64, tpu.core_type = #tpu.core_type<tc>, window_params = [{pipeline_mode = #tpu.pipeline_mode<synchronous>, transform_indices = @transform_0, window_bounds = array<i64: 8, 8, 128>}, {pipeline_mode = #tpu.pipeline_mode<synchronous>, transform_indices = @transform_1, window_bounds = array<i64: 32, 128>}, {pipeline_mode = #tpu.pipeline_mode<synchronous>, transform_indices = @transform_2, window_bounds = array<i64: 8, 8, 128>}, {pipeline_mode = #tpu.pipeline_mode<synchronous>, transform_indices = @transform_3, window_bounds = array<i64: 32, 128>}, {pipeline_mode = #tpu.pipeline_mode<synchronous>, transform_indices = @transform_4, window_bounds = array<i64: 1, 128>}, {pipeline_mode = #tpu.pipeline_mode<synchronous>, transform_indices = @transform_5, window_bounds = array<i64: 128, 128>}, {pipeline_mode = #tpu.pipeline_mode<synchronous>, transform_indices = @transform_6, window_bounds = array<i64: 32, 128>}, {pipeline_mode = #tpu.pipeline_mode<synchronous>, transform_indices = @transform_7, window_bounds = array<i64: 1, 128>}, {pipeline_mode = #tpu.pipeline_mode<synchronous>, transform_indices = @transform_8, window_bounds = array<i64: 8, 8, 128>}]} {
    %cst = arith.constant 0.000000e+00 : f32
    %0 = vector.broadcast %cst : f32 to vector<8x128xf32>
    %c0 = arith.constant 0 : index
    %c0_0 = arith.constant 0 : index
    %c0_1 = arith.constant 0 : index
    %1 = vector.load %arg10[%c0, %c0_0, %c0_1] : memref<8x8x128xf32, #tpu.memory_space<vmem>>, vector<1x8x128xf32>
    %2 = vector.shape_cast %1 : vector<1x8x128xf32> to vector<8x128xf32>
    %3 = vector.shape_cast %0 : vector<8x128xf32> to vector<1x8x128xf32>
    tpu.vector_store %arg10[%c0, %c0_0, %c0_1], %3 {strides = array<i32>} : memref<8x8x128xf32, #tpu.memory_space<vmem>>, vector<1x8x128xf32>,
    %c0_2 = arith.constant 0 : index
    %c0_3 = arith.constant 0 : index
    %4 = vector.load %arg3[%c0_2, %c0_3] : memref<32x128xf32, #tpu.memory_space<vmem>>, vector<32x128xf32>
    %c0_4 = arith.constant 0 : index
    %c0_5 = arith.constant 0 : index
    %5 = vector.load %arg5[%c0_4, %c0_5] : memref<32x128xf32, #tpu.memory_space<vmem>>, vector<32x128xf32>
    %c0_6 = arith.constant 0 : index
    %c0_7 = arith.constant 0 : index
    %6 = vector.load %arg6[%c0_6, %c0_7] : memref<1x128xf32, #tpu.memory_space<vmem>>, vector<1x128xf32>
    %c0_8 = arith.constant 0 : index
    %c0_9 = arith.constant 0 : index
    %7 = vector.load %arg7[%c0_8, %c0_9] : memref<128x128xf32, #tpu.memory_space<vmem>>, vector<128x128xf32>
    %c0_10 = arith.constant 0 : index
    %c0_11 = arith.constant 0 : index
    %8 = vector.load %arg8[%c0_10, %c0_11] : memref<32x128xf32, #tpu.memory_space<vmem>>, vector<32x128xf32>
    %c0_12 = arith.constant 0 : index
    %c0_13 = arith.constant 0 : index
    %9 = vector.load %arg9[%c0_12, %c0_13] : memref<1x128xf32, #tpu.memory_space<vmem>>, vector<1x128xf32>
    %10 = tpu.iota {dimensions = array<i32: 1>} : vector<8x128xi32>
    %cst_14 = arith.constant 0.000000e+00 : f32
    %11 = vector.broadcast %cst_14 : f32 to vector<8x32xf32>
    %c0_15 = arith.constant 0 : index
    %c0_16 = arith.constant 0 : index
    %12 = vector.load %arg11[%c0_15, %c0_16] : memref<8x32xf32, #tpu.memory_space<vmem>>, vector<8x32xf32>
    tpu.vector_store %arg11[%c0_15, %c0_16], %11 {strides = array<i32>} : memref<8x32xf32, #tpu.memory_space<vmem>>, vector<8x32xf32>,
    %cst_17 = arith.constant 0.000000e+00 : f32
    %13 = vector.broadcast %cst_17 : f32 to vector<8x32xf32>
    %c0_18 = arith.constant 0 : index
    %c0_19 = arith.constant 0 : index
    %14 = vector.load %arg12[%c0_18, %c0_19] : memref<8x32xf32, #tpu.memory_space<vmem>>, vector<8x32xf32>
    tpu.vector_store %arg12[%c0_18, %c0_19], %13 {strides = array<i32>} : memref<8x32xf32, #tpu.memory_space<vmem>>, vector<8x32xf32>,
    %c0_i32 = arith.constant 0 : i32
    %c0_20 = arith.constant 0 : index
    %c0_21 = arith.constant 0 : index
    %15 = vector.load %arg11[%c0_20, %c0_21] : memref<8x32xf32, #tpu.memory_space<vmem>>, vector<8x32xf32>
    %c0_22 = arith.constant 0 : index
    %c0_23 = arith.constant 0 : index
    %16 = vector.load %arg12[%c0_22, %c0_23] : memref<8x32xf32, #tpu.memory_space<vmem>>, vector<8x32xf32>
    %17 = arith.index_cast %c0_i32 : i32 to index
    %c0_24 = arith.constant 0 : index
    %c0_25 = arith.constant 0 : index
    %18 = vector.load %arg2[%17, %c0_24, %c0_25] : memref<8x8x128xf32, #tpu.memory_space<vmem>>, vector<1x8x128xf32>
    %19 = vector.shape_cast %18 : vector<1x8x128xf32> to vector<8x128xf32>
    %cst_26 = arith.constant dense<0.000000e+00> : vector<8x128xf32>
    %20 = tpu.matmul %15, %4, %cst_26 {dimension_numbers = #tpu.dot_dimension_numbers<[1], [0], [0], [1], [0, 0, 1, 1], [], []>} : vector<8x32xf32>, vector<32x128xf32>, vector<8x128xf32> -> vector<8x128xf32>
    %21 = arith.addf %19, %20 : vector<8x128xf32>
    %22 = vector.extract_strided_slice %21 {offsets = [0, 0], sizes = [8, 32], strides = [1, 1]} : vector<8x128xf32> to vector<8x32xf32>
    %23 = arith.negf %22 : vector<8x32xf32>
    %24 = math.exp %23 : vector<8x32xf32>
    %cst_27 = arith.constant 1.000000e+00 : f32
    %25 = vector.broadcast %cst_27 : f32 to vector<8x32xf32>
    %26 = arith.addf %25, %24 : vector<8x32xf32>
    %27 = arith.divf %25, %26 : vector<8x32xf32>
    %28 = vector.extract_strided_slice %21 {offsets = [0, 32], sizes = [8, 32], strides = [1, 1]} : vector<8x128xf32> to vector<8x32xf32>
    %29 = arith.negf %28 : vector<8x32xf32>
    %30 = math.exp %29 : vector<8x32xf32>
    %cst_28 = arith.constant 1.000000e+00 : f32
    %31 = vector.broadcast %cst_28 : f32 to vector<8x32xf32>
    %32 = arith.addf %31, %30 : vector<8x32xf32>
    %33 = arith.divf %31, %32 : vector<8x32xf32>
    %34 = vector.extract_strided_slice %21 {offsets = [0, 64], sizes = [8, 32], strides = [1, 1]} : vector<8x128xf32> to vector<8x32xf32>
    %35 = math.tanh %34 : vector<8x32xf32>
    %36 = vector.extract_strided_slice %21 {offsets = [0, 96], sizes = [8, 32], strides = [1, 1]} : vector<8x128xf32> to vector<8x32xf32>
    %37 = arith.negf %36 : vector<8x32xf32>
    %38 = math.exp %37 : vector<8x32xf32>
    %cst_29 = arith.constant 1.000000e+00 : f32
    %39 = vector.broadcast %cst_29 : f32 to vector<8x32xf32>
    %40 = arith.addf %39, %38 : vector<8x32xf32>
    %41 = arith.divf %39, %40 : vector<8x32xf32>
    %42 = arith.mulf %33, %16 : vector<8x32xf32>
    %43 = arith.mulf %27, %35 : vector<8x32xf32>
    %44 = arith.addf %42, %43 : vector<8x32xf32>
    %45 = math.tanh %44 : vector<8x32xf32>
    %46 = arith.mulf %41, %45 : vector<8x32xf32>
    %c0_30 = arith.constant 0 : index
    %c0_31 = arith.constant 0 : index
    %47 = vector.load %arg11[%c0_30, %c0_31] : memref<8x32xf32, #tpu.memory_space<vmem>>, vector<8x32xf32>
    tpu.vector_store %arg11[%c0_30, %c0_31], %46 {strides = array<i32>} : memref<8x32xf32, #tpu.memory_space<vmem>>, vector<8x32xf32>,
    %c0_32 = arith.constant 0 : index
    %c0_33 = arith.constant 0 : index
    %48 = vector.load %arg12[%c0_32, %c0_33] : memref<8x32xf32, #tpu.memory_space<vmem>>, vector<8x32xf32>
    tpu.vector_store %arg12[%c0_32, %c0_33], %44 {strides = array<i32>} : memref<8x32xf32, #tpu.memory_space<vmem>>, vector<8x32xf32>,
    %c1_i32 = arith.constant 1 : i32
    %c0_34 = arith.constant 0 : index
    %c0_35 = arith.constant 0 : index
    %49 = vector.load %arg11[%c0_34, %c0_35] : memref<8x32xf32, #tpu.memory_space<vmem>>, vector<8x32xf32>
    %c0_36 = arith.constant 0 : index
    %c0_37 = arith.constant 0 : index
    %50 = vector.load %arg12[%c0_36, %c0_37] : memref<8x32xf32, #tpu.memory_space<vmem>>, vector<8x32xf32>
    %51 = arith.index_cast %c1_i32 : i32 to index
    %c0_38 = arith.constant 0 : index
    %c0_39 = arith.constant 0 : index
    %52 = vector.load %arg2[%51, %c0_38, %c0_39] : memref<8x8x128xf32, #tpu.memory_space<vmem>>, vector<1x8x128xf32>
    %53 = vector.shape_cast %52 : vector<1x8x128xf32> to vector<8x128xf32>
    %cst_40 = arith.constant dense<0.000000e+00> : vector<8x128xf32>
    %54 = tpu.matmul %49, %4, %cst_40 {dimension_numbers = #tpu.dot_dimension_numbers<[1], [0], [0], [1], [0, 0, 1, 1], [], []>} : vector<8x32xf32>, vector<32x128xf32>, vector<8x128xf32> -> vector<8x128xf32>
    %55 = arith.addf %53, %54 : vector<8x128xf32>
    %56 = vector.extract_strided_slice %55 {offsets = [0, 0], sizes = [8, 32], strides = [1, 1]} : vector<8x128xf32> to vector<8x32xf32>
    %57 = arith.negf %56 : vector<8x32xf32>
    %58 = math.exp %57 : vector<8x32xf32>
    %cst_41 = arith.constant 1.000000e+00 : f32
    %59 = vector.broadcast %cst_41 : f32 to vector<8x32xf32>
    %60 = arith.addf %59, %58 : vector<8x32xf32>
    %61 = arith.divf %59, %60 : vector<8x32xf32>
    %62 = vector.extract_strided_slice %55 {offsets = [0, 32], sizes = [8, 32], strides = [1, 1]} : vector<8x128xf32> to vector<8x32xf32>
    %63 = arith.negf %62 : vector<8x32xf32>
    %64 = math.exp %63 : vector<8x32xf32>
    %cst_42 = arith.constant 1.000000e+00 : f32
    %65 = vector.broadcast %cst_42 : f32 to vector<8x32xf32>
    %66 = arith.addf %65, %64 : vector<8x32xf32>
    %67 = arith.divf %65, %66 : vector<8x32xf32>
    %68 = vector.extract_strided_slice %55 {offsets = [0, 64], sizes = [8, 32], strides = [1, 1]} : vector<8x128xf32> to vector<8x32xf32>
    %69 = math.tanh %68 : vector<8x32xf32>
    %70 = vector.extract_strided_slice %55 {offsets = [0, 96], sizes = [8, 32], strides = [1, 1]} : vector<8x128xf32> to vector<8x32xf32>
    %71 = arith.negf %70 : vector<8x32xf32>
    %72 = math.exp %71 : vector<8x32xf32>
    %cst_43 = arith.constant 1.000000e+00 : f32
    %73 = vector.broadcast %cst_43 : f32 to vector<8x32xf32>
    %74 = arith.addf %73, %72 : vector<8x32xf32>
    %75 = arith.divf %73, %74 : vector<8x32xf32>
    %76 = arith.mulf %67, %50 : vector<8x32xf32>
    %77 = arith.mulf %61, %69 : vector<8x32xf32>
    %78 = arith.addf %76, %77 : vector<8x32xf32>
    %79 = math.tanh %78 : vector<8x32xf32>
    %80 = arith.mulf %75, %79 : vector<8x32xf32>
    %c0_44 = arith.constant 0 : index
    %c0_45 = arith.constant 0 : index
    %81 = vector.load %arg11[%c0_44, %c0_45] : memref<8x32xf32, #tpu.memory_space<vmem>>, vector<8x32xf32>
    tpu.vector_store %arg11[%c0_44, %c0_45], %80 {strides = array<i32>} : memref<8x32xf32, #tpu.memory_space<vmem>>, vector<8x32xf32>,
    %c0_46 = arith.constant 0 : index
    %c0_47 = arith.constant 0 : index
    %82 = vector.load %arg12[%c0_46, %c0_47] : memref<8x32xf32, #tpu.memory_space<vmem>>, vector<8x32xf32>
    tpu.vector_store %arg12[%c0_46, %c0_47], %78 {strides = array<i32>} : memref<8x32xf32, #tpu.memory_space<vmem>>, vector<8x32xf32>,
    %c2_i32 = arith.constant 2 : i32
    %c0_48 = arith.constant 0 : index
    %c0_49 = arith.constant 0 : index
    %83 = vector.load %arg11[%c0_48, %c0_49] : memref<8x32xf32, #tpu.memory_space<vmem>>, vector<8x32xf32>
    %c0_50 = arith.constant 0 : index
    %c0_51 = arith.constant 0 : index
    %84 = vector.load %arg12[%c0_50, %c0_51] : memref<8x32xf32, #tpu.memory_space<vmem>>, vector<8x32xf32>
    %85 = arith.index_cast %c2_i32 : i32 to index
    %c0_52 = arith.constant 0 : index
    %c0_53 = arith.constant 0 : index
    %86 = vector.load %arg2[%85, %c0_52, %c0_53] : memref<8x8x128xf32, #tpu.memory_space<vmem>>, vector<1x8x128xf32>
    %87 = vector.shape_cast %86 : vector<1x8x128xf32> to vector<8x128xf32>
    %cst_54 = arith.constant dense<0.000000e+00> : vector<8x128xf32>
    %88 = tpu.matmul %83, %4, %cst_54 {dimension_numbers = #tpu.dot_dimension_numbers<[1], [0], [0], [1], [0, 0, 1, 1], [], []>} : vector<8x32xf32>, vector<32x128xf32>, vector<8x128xf32> -> vector<8x128xf32>
    %89 = arith.addf %87, %88 : vector<8x128xf32>
    %90 = vector.extract_strided_slice %89 {offsets = [0, 0], sizes = [8, 32], strides = [1, 1]} : vector<8x128xf32> to vector<8x32xf32>
    %91 = arith.negf %90 : vector<8x32xf32>
    %92 = math.exp %91 : vector<8x32xf32>
    %cst_55 = arith.constant 1.000000e+00 : f32
    %93 = vector.broadcast %cst_55 : f32 to vector<8x32xf32>
    %94 = arith.addf %93, %92 : vector<8x32xf32>
    %95 = arith.divf %93, %94 : vector<8x32xf32>
    %96 = vector.extract_strided_slice %89 {offsets = [0, 32], sizes = [8, 32], strides = [1, 1]} : vector<8x128xf32> to vector<8x32xf32>
    %97 = arith.negf %96 : vector<8x32xf32>
    %98 = math.exp %97 : vector<8x32xf32>
    %cst_56 = arith.constant 1.000000e+00 : f32
    %99 = vector.broadcast %cst_56 : f32 to vector<8x32xf32>
    %100 = arith.addf %99, %98 : vector<8x32xf32>
    %101 = arith.divf %99, %100 : vector<8x32xf32>
    %102 = vector.extract_strided_slice %89 {offsets = [0, 64], sizes = [8, 32], strides = [1, 1]} : vector<8x128xf32> to vector<8x32xf32>
    %103 = math.tanh %102 : vector<8x32xf32>
    %104 = vector.extract_strided_slice %89 {offsets = [0, 96], sizes = [8, 32], strides = [1, 1]} : vector<8x128xf32> to vector<8x32xf32>
    %105 = arith.negf %104 : vector<8x32xf32>
    %106 = math.exp %105 : vector<8x32xf32>
    %cst_57 = arith.constant 1.000000e+00 : f32
    %107 = vector.broadcast %cst_57 : f32 to vector<8x32xf32>
    %108 = arith.addf %107, %106 : vector<8x32xf32>
    %109 = arith.divf %107, %108 : vector<8x32xf32>
    %110 = arith.mulf %101, %84 : vector<8x32xf32>
    %111 = arith.mulf %95, %103 : vector<8x32xf32>
    %112 = arith.addf %110, %111 : vector<8x32xf32>
    %113 = math.tanh %112 : vector<8x32xf32>
    %114 = arith.mulf %109, %113 : vector<8x32xf32>
    %c0_58 = arith.constant 0 : index
    %c0_59 = arith.constant 0 : index
    %115 = vector.load %arg11[%c0_58, %c0_59] : memref<8x32xf32, #tpu.memory_space<vmem>>, vector<8x32xf32>
    tpu.vector_store %arg11[%c0_58, %c0_59], %114 {strides = array<i32>} : memref<8x32xf32, #tpu.memory_space<vmem>>, vector<8x32xf32>,
    %c0_60 = arith.constant 0 : index
    %c0_61 = arith.constant 0 : index
    %116 = vector.load %arg12[%c0_60, %c0_61] : memref<8x32xf32, #tpu.memory_space<vmem>>, vector<8x32xf32>
    tpu.vector_store %arg12[%c0_60, %c0_61], %112 {strides = array<i32>} : memref<8x32xf32, #tpu.memory_space<vmem>>, vector<8x32xf32>,
    %c3_i32 = arith.constant 3 : i32
    %c0_62 = arith.constant 0 : index
    %c0_63 = arith.constant 0 : index
    %117 = vector.load %arg11[%c0_62, %c0_63] : memref<8x32xf32, #tpu.memory_space<vmem>>, vector<8x32xf32>
    %c0_64 = arith.constant 0 : index
    %c0_65 = arith.constant 0 : index
    %118 = vector.load %arg12[%c0_64, %c0_65] : memref<8x32xf32, #tpu.memory_space<vmem>>, vector<8x32xf32>
    %119 = arith.index_cast %c3_i32 : i32 to index
    %c0_66 = arith.constant 0 : index
    %c0_67 = arith.constant 0 : index
    %120 = vector.load %arg2[%119, %c0_66, %c0_67] : memref<8x8x128xf32, #tpu.memory_space<vmem>>, vector<1x8x128xf32>
    %121 = vector.shape_cast %120 : vector<1x8x128xf32> to vector<8x128xf32>
    %cst_68 = arith.constant dense<0.000000e+00> : vector<8x128xf32>
    %122 = tpu.matmul %117, %4, %cst_68 {dimension_numbers = #tpu.dot_dimension_numbers<[1], [0], [0], [1], [0, 0, 1, 1], [], []>} : vector<8x32xf32>, vector<32x128xf32>, vector<8x128xf32> -> vector<8x128xf32>
    %123 = arith.addf %121, %122 : vector<8x128xf32>
    %124 = vector.extract_strided_slice %123 {offsets = [0, 0], sizes = [8, 32], strides = [1, 1]} : vector<8x128xf32> to vector<8x32xf32>
    %125 = arith.negf %124 : vector<8x32xf32>
    %126 = math.exp %125 : vector<8x32xf32>
    %cst_69 = arith.constant 1.000000e+00 : f32
    %127 = vector.broadcast %cst_69 : f32 to vector<8x32xf32>
    %128 = arith.addf %127, %126 : vector<8x32xf32>
    %129 = arith.divf %127, %128 : vector<8x32xf32>
    %130 = vector.extract_strided_slice %123 {offsets = [0, 32], sizes = [8, 32], strides = [1, 1]} : vector<8x128xf32> to vector<8x32xf32>
    %131 = arith.negf %130 : vector<8x32xf32>
    %132 = math.exp %131 : vector<8x32xf32>
    %cst_70 = arith.constant 1.000000e+00 : f32
    %133 = vector.broadcast %cst_70 : f32 to vector<8x32xf32>
    %134 = arith.addf %133, %132 : vector<8x32xf32>
    %135 = arith.divf %133, %134 : vector<8x32xf32>
    %136 = vector.extract_strided_slice %123 {offsets = [0, 64], sizes = [8, 32], strides = [1, 1]} : vector<8x128xf32> to vector<8x32xf32>
    %137 = math.tanh %136 : vector<8x32xf32>
    %138 = vector.extract_strided_slice %123 {offsets = [0, 96], sizes = [8, 32], strides = [1, 1]} : vector<8x128xf32> to vector<8x32xf32>
    %139 = arith.negf %138 : vector<8x32xf32>
    %140 = math.exp %139 : vector<8x32xf32>
    %cst_71 = arith.constant 1.000000e+00 : f32
    %141 = vector.broadcast %cst_71 : f32 to vector<8x32xf32>
    %142 = arith.addf %141, %140 : vector<8x32xf32>
    %143 = arith.divf %141, %142 : vector<8x32xf32>
    %144 = arith.mulf %135, %118 : vector<8x32xf32>
    %145 = arith.mulf %129, %137 : vector<8x32xf32>
    %146 = arith.addf %144, %145 : vector<8x32xf32>
    %147 = math.tanh %146 : vector<8x32xf32>
    %148 = arith.mulf %143, %147 : vector<8x32xf32>
    %c0_72 = arith.constant 0 : index
    %c0_73 = arith.constant 0 : index
    %149 = vector.load %arg11[%c0_72, %c0_73] : memref<8x32xf32, #tpu.memory_space<vmem>>, vector<8x32xf32>
    tpu.vector_store %arg11[%c0_72, %c0_73], %148 {strides = array<i32>} : memref<8x32xf32, #tpu.memory_space<vmem>>, vector<8x32xf32>,
    %c0_74 = arith.constant 0 : index
    %c0_75 = arith.constant 0 : index
    %150 = vector.load %arg12[%c0_74, %c0_75] : memref<8x32xf32, #tpu.memory_space<vmem>>, vector<8x32xf32>
    tpu.vector_store %arg12[%c0_74, %c0_75], %146 {strides = array<i32>} : memref<8x32xf32, #tpu.memory_space<vmem>>, vector<8x32xf32>,
    %c4_i32 = arith.constant 4 : i32
    %c0_76 = arith.constant 0 : index
    %c0_77 = arith.constant 0 : index
    %151 = vector.load %arg11[%c0_76, %c0_77] : memref<8x32xf32, #tpu.memory_space<vmem>>, vector<8x32xf32>
    %c0_78 = arith.constant 0 : index
    %c0_79 = arith.constant 0 : index
    %152 = vector.load %arg12[%c0_78, %c0_79] : memref<8x32xf32, #tpu.memory_space<vmem>>, vector<8x32xf32>
    %153 = arith.index_cast %c4_i32 : i32 to index
    %c0_80 = arith.constant 0 : index
    %c0_81 = arith.constant 0 : index
    %154 = vector.load %arg2[%153, %c0_80, %c0_81] : memref<8x8x128xf32, #tpu.memory_space<vmem>>, vector<1x8x128xf32>
    %155 = vector.shape_cast %154 : vector<1x8x128xf32> to vector<8x128xf32>
    %cst_82 = arith.constant dense<0.000000e+00> : vector<8x128xf32>
    %156 = tpu.matmul %151, %4, %cst_82 {dimension_numbers = #tpu.dot_dimension_numbers<[1], [0], [0], [1], [0, 0, 1, 1], [], []>} : vector<8x32xf32>, vector<32x128xf32>, vector<8x128xf32> -> vector<8x128xf32>
    %157 = arith.addf %155, %156 : vector<8x128xf32>
    %158 = vector.extract_strided_slice %157 {offsets = [0, 0], sizes = [8, 32], strides = [1, 1]} : vector<8x128xf32> to vector<8x32xf32>
    %159 = arith.negf %158 : vector<8x32xf32>
    %160 = math.exp %159 : vector<8x32xf32>
    %cst_83 = arith.constant 1.000000e+00 : f32
    %161 = vector.broadcast %cst_83 : f32 to vector<8x32xf32>
    %162 = arith.addf %161, %160 : vector<8x32xf32>
    %163 = arith.divf %161, %162 : vector<8x32xf32>
    %164 = vector.extract_strided_slice %157 {offsets = [0, 32], sizes = [8, 32], strides = [1, 1]} : vector<8x128xf32> to vector<8x32xf32>
    %165 = arith.negf %164 : vector<8x32xf32>
    %166 = math.exp %165 : vector<8x32xf32>
    %cst_84 = arith.constant 1.000000e+00 : f32
    %167 = vector.broadcast %cst_84 : f32 to vector<8x32xf32>
    %168 = arith.addf %167, %166 : vector<8x32xf32>
    %169 = arith.divf %167, %168 : vector<8x32xf32>
    %170 = vector.extract_strided_slice %157 {offsets = [0, 64], sizes = [8, 32], strides = [1, 1]} : vector<8x128xf32> to vector<8x32xf32>
    %171 = math.tanh %170 : vector<8x32xf32>
    %172 = vector.extract_strided_slice %157 {offsets = [0, 96], sizes = [8, 32], strides = [1, 1]} : vector<8x128xf32> to vector<8x32xf32>
    %173 = arith.negf %172 : vector<8x32xf32>
    %174 = math.exp %173 : vector<8x32xf32>
    %cst_85 = arith.constant 1.000000e+00 : f32
    %175 = vector.broadcast %cst_85 : f32 to vector<8x32xf32>
    %176 = arith.addf %175, %174 : vector<8x32xf32>
    %177 = arith.divf %175, %176 : vector<8x32xf32>
    %178 = arith.mulf %169, %152 : vector<8x32xf32>
    %179 = arith.mulf %163, %171 : vector<8x32xf32>
    %180 = arith.addf %178, %179 : vector<8x32xf32>
    %181 = math.tanh %180 : vector<8x32xf32>
    %182 = arith.mulf %177, %181 : vector<8x32xf32>
    %c0_86 = arith.constant 0 : index
    %c0_87 = arith.constant 0 : index
    %183 = vector.load %arg11[%c0_86, %c0_87] : memref<8x32xf32, #tpu.memory_space<vmem>>, vector<8x32xf32>
    tpu.vector_store %arg11[%c0_86, %c0_87], %182 {strides = array<i32>} : memref<8x32xf32, #tpu.memory_space<vmem>>, vector<8x32xf32>,
    %c0_88 = arith.constant 0 : index
    %c0_89 = arith.constant 0 : index
    %184 = vector.load %arg12[%c0_88, %c0_89] : memref<8x32xf32, #tpu.memory_space<vmem>>, vector<8x32xf32>
    tpu.vector_store %arg12[%c0_88, %c0_89], %180 {strides = array<i32>} : memref<8x32xf32, #tpu.memory_space<vmem>>, vector<8x32xf32>,
    %c5_i32 = arith.constant 5 : i32
    %c0_90 = arith.constant 0 : index
    %c0_91 = arith.constant 0 : index
    %185 = vector.load %arg11[%c0_90, %c0_91] : memref<8x32xf32, #tpu.memory_space<vmem>>, vector<8x32xf32>
    %c0_92 = arith.constant 0 : index
    %c0_93 = arith.constant 0 : index
    %186 = vector.load %arg12[%c0_92, %c0_93] : memref<8x32xf32, #tpu.memory_space<vmem>>, vector<8x32xf32>
    %187 = arith.index_cast %c5_i32 : i32 to index
    %c0_94 = arith.constant 0 : index
    %c0_95 = arith.constant 0 : index
    %188 = vector.load %arg2[%187, %c0_94, %c0_95] : memref<8x8x128xf32, #tpu.memory_space<vmem>>, vector<1x8x128xf32>
    %189 = vector.shape_cast %188 : vector<1x8x128xf32> to vector<8x128xf32>
    %cst_96 = arith.constant dense<0.000000e+00> : vector<8x128xf32>
    %190 = tpu.matmul %185, %4, %cst_96 {dimension_numbers = #tpu.dot_dimension_numbers<[1], [0], [0], [1], [0, 0, 1, 1], [], []>} : vector<8x32xf32>, vector<32x128xf32>, vector<8x128xf32> -> vector<8x128xf32>
    %191 = arith.addf %189, %190 : vector<8x128xf32>
    %192 = vector.extract_strided_slice %191 {offsets = [0, 0], sizes = [8, 32], strides = [1, 1]} : vector<8x128xf32> to vector<8x32xf32>
    %193 = arith.negf %192 : vector<8x32xf32>
    %194 = math.exp %193 : vector<8x32xf32>
    %cst_97 = arith.constant 1.000000e+00 : f32
    %195 = vector.broadcast %cst_97 : f32 to vector<8x32xf32>
    %196 = arith.addf %195, %194 : vector<8x32xf32>
    %197 = arith.divf %195, %196 : vector<8x32xf32>
    %198 = vector.extract_strided_slice %191 {offsets = [0, 32], sizes = [8, 32], strides = [1, 1]} : vector<8x128xf32> to vector<8x32xf32>
    %199 = arith.negf %198 : vector<8x32xf32>
    %200 = math.exp %199 : vector<8x32xf32>
    %cst_98 = arith.constant 1.000000e+00 : f32
    %201 = vector.broadcast %cst_98 : f32 to vector<8x32xf32>
    %202 = arith.addf %201, %200 : vector<8x32xf32>
    %203 = arith.divf %201, %202 : vector<8x32xf32>
    %204 = vector.extract_strided_slice %191 {offsets = [0, 64], sizes = [8, 32], strides = [1, 1]} : vector<8x128xf32> to vector<8x32xf32>
    %205 = math.tanh %204 : vector<8x32xf32>
    %206 = vector.extract_strided_slice %191 {offsets = [0, 96], sizes = [8, 32], strides = [1, 1]} : vector<8x128xf32> to vector<8x32xf32>
    %207 = arith.negf %206 : vector<8x32xf32>
    %208 = math.exp %207 : vector<8x32xf32>
    %cst_99 = arith.constant 1.000000e+00 : f32
    %209 = vector.broadcast %cst_99 : f32 to vector<8x32xf32>
    %210 = arith.addf %209, %208 : vector<8x32xf32>
    %211 = arith.divf %209, %210 : vector<8x32xf32>
    %212 = arith.mulf %203, %186 : vector<8x32xf32>
    %213 = arith.mulf %197, %205 : vector<8x32xf32>
    %214 = arith.addf %212, %213 : vector<8x32xf32>
    %215 = math.tanh %214 : vector<8x32xf32>
    %216 = arith.mulf %211, %215 : vector<8x32xf32>
    %c0_100 = arith.constant 0 : index
    %c0_101 = arith.constant 0 : index
    %217 = vector.load %arg11[%c0_100, %c0_101] : memref<8x32xf32, #tpu.memory_space<vmem>>, vector<8x32xf32>
    tpu.vector_store %arg11[%c0_100, %c0_101], %216 {strides = array<i32>} : memref<8x32xf32, #tpu.memory_space<vmem>>, vector<8x32xf32>,
    %c0_102 = arith.constant 0 : index
    %c0_103 = arith.constant 0 : index
    %218 = vector.load %arg12[%c0_102, %c0_103] : memref<8x32xf32, #tpu.memory_space<vmem>>, vector<8x32xf32>
    tpu.vector_store %arg12[%c0_102, %c0_103], %214 {strides = array<i32>} : memref<8x32xf32, #tpu.memory_space<vmem>>, vector<8x32xf32>,
    %c6_i32 = arith.constant 6 : i32
    %c0_104 = arith.constant 0 : index
    %c0_105 = arith.constant 0 : index
    %219 = vector.load %arg11[%c0_104, %c0_105] : memref<8x32xf32, #tpu.memory_space<vmem>>, vector<8x32xf32>
    %c0_106 = arith.constant 0 : index
    %c0_107 = arith.constant 0 : index
    %220 = vector.load %arg12[%c0_106, %c0_107] : memref<8x32xf32, #tpu.memory_space<vmem>>, vector<8x32xf32>
    %221 = arith.index_cast %c6_i32 : i32 to index
    %c0_108 = arith.constant 0 : index
    %c0_109 = arith.constant 0 : index
    %222 = vector.load %arg2[%221, %c0_108, %c0_109] : memref<8x8x128xf32, #tpu.memory_space<vmem>>, vector<1x8x128xf32>
    %223 = vector.shape_cast %222 : vector<1x8x128xf32> to vector<8x128xf32>
    %cst_110 = arith.constant dense<0.000000e+00> : vector<8x128xf32>
    %224 = tpu.matmul %219, %4, %cst_110 {dimension_numbers = #tpu.dot_dimension_numbers<[1], [0], [0], [1], [0, 0, 1, 1], [], []>} : vector<8x32xf32>, vector<32x128xf32>, vector<8x128xf32> -> vector<8x128xf32>
    %225 = arith.addf %223, %224 : vector<8x128xf32>
    %226 = vector.extract_strided_slice %225 {offsets = [0, 0], sizes = [8, 32], strides = [1, 1]} : vector<8x128xf32> to vector<8x32xf32>
    %227 = arith.negf %226 : vector<8x32xf32>
    %228 = math.exp %227 : vector<8x32xf32>
    %cst_111 = arith.constant 1.000000e+00 : f32
    %229 = vector.broadcast %cst_111 : f32 to vector<8x32xf32>
    %230 = arith.addf %229, %228 : vector<8x32xf32>
    %231 = arith.divf %229, %230 : vector<8x32xf32>
    %232 = vector.extract_strided_slice %225 {offsets = [0, 32], sizes = [8, 32], strides = [1, 1]} : vector<8x128xf32> to vector<8x32xf32>
    %233 = arith.negf %232 : vector<8x32xf32>
    %234 = math.exp %233 : vector<8x32xf32>
    %cst_112 = arith.constant 1.000000e+00 : f32
    %235 = vector.broadcast %cst_112 : f32 to vector<8x32xf32>
    %236 = arith.addf %235, %234 : vector<8x32xf32>
    %237 = arith.divf %235, %236 : vector<8x32xf32>
    %238 = vector.extract_strided_slice %225 {offsets = [0, 64], sizes = [8, 32], strides = [1, 1]} : vector<8x128xf32> to vector<8x32xf32>
    %239 = math.tanh %238 : vector<8x32xf32>
    %240 = vector.extract_strided_slice %225 {offsets = [0, 96], sizes = [8, 32], strides = [1, 1]} : vector<8x128xf32> to vector<8x32xf32>
    %241 = arith.negf %240 : vector<8x32xf32>
    %242 = math.exp %241 : vector<8x32xf32>
    %cst_113 = arith.constant 1.000000e+00 : f32
    %243 = vector.broadcast %cst_113 : f32 to vector<8x32xf32>
    %244 = arith.addf %243, %242 : vector<8x32xf32>
    %245 = arith.divf %243, %244 : vector<8x32xf32>
    %246 = arith.mulf %237, %220 : vector<8x32xf32>
    %247 = arith.mulf %231, %239 : vector<8x32xf32>
    %248 = arith.addf %246, %247 : vector<8x32xf32>
    %249 = math.tanh %248 : vector<8x32xf32>
    %250 = arith.mulf %245, %249 : vector<8x32xf32>
    %c0_114 = arith.constant 0 : index
    %c0_115 = arith.constant 0 : index
    %251 = vector.load %arg11[%c0_114, %c0_115] : memref<8x32xf32, #tpu.memory_space<vmem>>, vector<8x32xf32>
    tpu.vector_store %arg11[%c0_114, %c0_115], %250 {strides = array<i32>} : memref<8x32xf32, #tpu.memory_space<vmem>>, vector<8x32xf32>,
    %c0_116 = arith.constant 0 : index
    %c0_117 = arith.constant 0 : index
    %252 = vector.load %arg12[%c0_116, %c0_117] : memref<8x32xf32, #tpu.memory_space<vmem>>, vector<8x32xf32>
    tpu.vector_store %arg12[%c0_116, %c0_117], %248 {strides = array<i32>} : memref<8x32xf32, #tpu.memory_space<vmem>>, vector<8x32xf32>,
    %c7_i32 = arith.constant 7 : i32
    %c0_118 = arith.constant 0 : index
    %c0_119 = arith.constant 0 : index
    %253 = vector.load %arg11[%c0_118, %c0_119] : memref<8x32xf32, #tpu.memory_space<vmem>>, vector<8x32xf32>
    %c0_120 = arith.constant 0 : index
    %c0_121 = arith.constant 0 : index
    %254 = vector.load %arg12[%c0_120, %c0_121] : memref<8x32xf32, #tpu.memory_space<vmem>>, vector<8x32xf32>
    %255 = arith.index_cast %c7_i32 : i32 to index
    %c0_122 = arith.constant 0 : index
    %c0_123 = arith.constant 0 : index
    %256 = vector.load %arg2[%255, %c0_122, %c0_123] : memref<8x8x128xf32, #tpu.memory_space<vmem>>, vector<1x8x128xf32>
    %257 = vector.shape_cast %256 : vector<1x8x128xf32> to vector<8x128xf32>
    %cst_124 = arith.constant dense<0.000000e+00> : vector<8x128xf32>
    %258 = tpu.matmul %253, %4, %cst_124 {dimension_numbers = #tpu.dot_dimension_numbers<[1], [0], [0], [1], [0, 0, 1, 1], [], []>} : vector<8x32xf32>, vector<32x128xf32>, vector<8x128xf32> -> vector<8x128xf32>
    %259 = arith.addf %257, %258 : vector<8x128xf32>
    %260 = vector.extract_strided_slice %259 {offsets = [0, 0], sizes = [8, 32], strides = [1, 1]} : vector<8x128xf32> to vector<8x32xf32>
    %261 = arith.negf %260 : vector<8x32xf32>
    %262 = math.exp %261 : vector<8x32xf32>
    %cst_125 = arith.constant 1.000000e+00 : f32
    %263 = vector.broadcast %cst_125 : f32 to vector<8x32xf32>
    %264 = arith.addf %263, %262 : vector<8x32xf32>
    %265 = arith.divf %263, %264 : vector<8x32xf32>
    %266 = vector.extract_strided_slice %259 {offsets = [0, 32], sizes = [8, 32], strides = [1, 1]} : vector<8x128xf32> to vector<8x32xf32>
    %267 = arith.negf %266 : vector<8x32xf32>
    %268 = math.exp %267 : vector<8x32xf32>
    %cst_126 = arith.constant 1.000000e+00 : f32
    %269 = vector.broadcast %cst_126 : f32 to vector<8x32xf32>
    %270 = arith.addf %269, %268 : vector<8x32xf32>
    %271 = arith.divf %269, %270 : vector<8x32xf32>
    %272 = vector.extract_strided_slice %259 {offsets = [0, 64], sizes = [8, 32], strides = [1, 1]} : vector<8x128xf32> to vector<8x32xf32>
    %273 = math.tanh %272 : vector<8x32xf32>
    %274 = vector.extract_strided_slice %259 {offsets = [0, 96], sizes = [8, 32], strides = [1, 1]} : vector<8x128xf32> to vector<8x32xf32>
    %275 = arith.negf %274 : vector<8x32xf32>
    %276 = math.exp %275 : vector<8x32xf32>
    %cst_127 = arith.constant 1.000000e+00 : f32
    %277 = vector.broadcast %cst_127 : f32 to vector<8x32xf32>
    %278 = arith.addf %277, %276 : vector<8x32xf32>
    %279 = arith.divf %277, %278 : vector<8x32xf32>
    %280 = arith.mulf %271, %254 : vector<8x32xf32>
    %281 = arith.mulf %265, %273 : vector<8x32xf32>
    %282 = arith.addf %280, %281 : vector<8x32xf32>
    %283 = math.tanh %282 : vector<8x32xf32>
    %284 = arith.mulf %279, %283 : vector<8x32xf32>
    %c0_128 = arith.constant 0 : index
    %c0_129 = arith.constant 0 : index
    %285 = vector.load %arg11[%c0_128, %c0_129] : memref<8x32xf32, #tpu.memory_space<vmem>>, vector<8x32xf32>
    tpu.vector_store %arg11[%c0_128, %c0_129], %284 {strides = array<i32>} : memref<8x32xf32, #tpu.memory_space<vmem>>, vector<8x32xf32>,
    %c0_130 = arith.constant 0 : index
    %c0_131 = arith.constant 0 : index
    %286 = vector.load %arg12[%c0_130, %c0_131] : memref<8x32xf32, #tpu.memory_space<vmem>>, vector<8x32xf32>
    tpu.vector_store %arg12[%c0_130, %c0_131], %282 {strides = array<i32>} : memref<8x32xf32, #tpu.memory_space<vmem>>, vector<8x32xf32>,
    %c8_i32 = arith.constant 8 : i32
    %c0_132 = arith.constant 0 : index
    %c0_133 = arith.constant 0 : index
    %c0_134 = arith.constant 0 : index
    %287 = vector.load %arg4[%c0_132, %c0_133, %c0_134] : memref<8x8x128xf32, #tpu.memory_space<vmem>>, vector<1x8x128xf32>
    %288 = vector.shape_cast %287 : vector<1x8x128xf32> to vector<8x128xf32>
    %c0_135 = arith.constant 0 : index
    %c0_136 = arith.constant 0 : index
    %289 = vector.load %arg13[%c0_135, %c0_136] : memref<8x128xf32, #tpu.memory_space<vmem>>, vector<8x128xf32>
    tpu.vector_store %arg13[%c0_135, %c0_136], %288 {strides = array<i32>} : memref<8x128xf32, #tpu.memory_space<vmem>>, vector<8x128xf32>,
    %c0_i32_137 = arith.constant 0 : i32
    %c0_138 = arith.constant 0 : index
    %c0_139 = arith.constant 0 : index
    %290 = vector.load %arg11[%c0_138, %c0_139] : memref<8x32xf32, #tpu.memory_space<vmem>>, vector<8x32xf32>
    %c0_140 = arith.constant 0 : index
    %c0_141 = arith.constant 0 : index
    %291 = vector.load %arg12[%c0_140, %c0_141] : memref<8x32xf32, #tpu.memory_space<vmem>>, vector<8x32xf32>
    %c0_142 = arith.constant 0 : index
    %c0_143 = arith.constant 0 : index
    %292 = vector.load %arg13[%c0_142, %c0_143] : memref<8x128xf32, #tpu.memory_space<vmem>>, vector<8x128xf32>
    %293 = vector.broadcast %6 : vector<1x128xf32> to vector<8x128xf32>
    %294 = arith.addf %292, %293 : vector<8x128xf32>
    %cst_144 = arith.constant dense<0.000000e+00> : vector<8x128xf32>
    %295 = tpu.matmul %290, %5, %cst_144 {dimension_numbers = #tpu.dot_dimension_numbers<[1], [0], [0], [1], [0, 0, 1, 1], [], []>} : vector<8x32xf32>, vector<32x128xf32>, vector<8x128xf32> -> vector<8x128xf32>
    %296 = arith.addf %294, %295 : vector<8x128xf32>
    %297 = vector.extract_strided_slice %296 {offsets = [0, 0], sizes = [8, 32], strides = [1, 1]} : vector<8x128xf32> to vector<8x32xf32>
    %298 = arith.negf %297 : vector<8x32xf32>
    %299 = math.exp %298 : vector<8x32xf32>
    %cst_145 = arith.constant 1.000000e+00 : f32
    %300 = vector.broadcast %cst_145 : f32 to vector<8x32xf32>
    %301 = arith.addf %300, %299 : vector<8x32xf32>
    %302 = arith.divf %300, %301 : vector<8x32xf32>
    %303 = vector.extract_strided_slice %296 {offsets = [0, 32], sizes = [8, 32], strides = [1, 1]} : vector<8x128xf32> to vector<8x32xf32>
    %304 = arith.negf %303 : vector<8x32xf32>
    %305 = math.exp %304 : vector<8x32xf32>
    %cst_146 = arith.constant 1.000000e+00 : f32
    %306 = vector.broadcast %cst_146 : f32 to vector<8x32xf32>
    %307 = arith.addf %306, %305 : vector<8x32xf32>
    %308 = arith.divf %306, %307 : vector<8x32xf32>
    %309 = vector.extract_strided_slice %296 {offsets = [0, 64], sizes = [8, 32], strides = [1, 1]} : vector<8x128xf32> to vector<8x32xf32>
    %310 = math.tanh %309 : vector<8x32xf32>
    %311 = vector.extract_strided_slice %296 {offsets = [0, 96], sizes = [8, 32], strides = [1, 1]} : vector<8x128xf32> to vector<8x32xf32>
    %312 = arith.negf %311 : vector<8x32xf32>
    %313 = math.exp %312 : vector<8x32xf32>
    %cst_147 = arith.constant 1.000000e+00 : f32
    %314 = vector.broadcast %cst_147 : f32 to vector<8x32xf32>
    %315 = arith.addf %314, %313 : vector<8x32xf32>
    %316 = arith.divf %314, %315 : vector<8x32xf32>
    %317 = arith.mulf %308, %291 : vector<8x32xf32>
    %318 = arith.mulf %302, %310 : vector<8x32xf32>
    %319 = arith.addf %317, %318 : vector<8x32xf32>
    %320 = math.tanh %319 : vector<8x32xf32>
    %321 = arith.mulf %316, %320 : vector<8x32xf32>
    %c0_148 = arith.constant 0 : index
    %c0_149 = arith.constant 0 : index
    %322 = vector.load %arg11[%c0_148, %c0_149] : memref<8x32xf32, #tpu.memory_space<vmem>>, vector<8x32xf32>
    tpu.vector_store %arg11[%c0_148, %c0_149], %321 {strides = array<i32>} : memref<8x32xf32, #tpu.memory_space<vmem>>, vector<8x32xf32>,
    %c0_150 = arith.constant 0 : index
    %c0_151 = arith.constant 0 : index
    %323 = vector.load %arg12[%c0_150, %c0_151] : memref<8x32xf32, #tpu.memory_space<vmem>>, vector<8x32xf32>
    tpu.vector_store %arg12[%c0_150, %c0_151], %319 {strides = array<i32>} : memref<8x32xf32, #tpu.memory_space<vmem>>, vector<8x32xf32>,
    %cst_152 = arith.constant dense<0.000000e+00> : vector<8x128xf32>
    %324 = tpu.matmul %321, %8, %cst_152 {dimension_numbers = #tpu.dot_dimension_numbers<[1], [0], [0], [1], [0, 0, 1, 1], [], []>} : vector<8x32xf32>, vector<32x128xf32>, vector<8x128xf32> -> vector<8x128xf32>
    %325 = vector.broadcast %9 : vector<1x128xf32> to vector<8x128xf32>
    %326 = arith.addf %324, %325 : vector<8x128xf32>
    %c1_i32_153 = arith.constant 1 : i32
    %327 = arith.addi %c0_i32_137, %c1_i32_153 : i32
    %328 = arith.index_cast %327 : i32 to index
    %c0_154 = arith.constant 0 : index
    %c0_155 = arith.constant 0 : index
    %329 = vector.load %arg10[%328, %c0_154, %c0_155] : memref<8x8x128xf32, #tpu.memory_space<vmem>>, vector<1x8x128xf32>
    %330 = vector.shape_cast %329 : vector<1x8x128xf32> to vector<8x128xf32>
    %331 = vector.shape_cast %326 : vector<8x128xf32> to vector<1x8x128xf32>
    tpu.vector_store %arg10[%328, %c0_154, %c0_155], %331 {strides = array<i32>} : memref<8x8x128xf32, #tpu.memory_space<vmem>>, vector<1x8x128xf32>,
    %c1_i32_156 = arith.constant 1 : i32
    %332 = arith.addi %c0_i32_137, %c1_i32_156 : i32
    %333 = arith.index_cast %332 : i32 to index
    %334 = memref.load %arg1[%333] : memref<8xi32, #tpu.memory_space<smem>>
    %c0_i32_157 = arith.constant 0 : i32
    %335 = arith.cmpi sgt, %334, %c0_i32_157 : i32
    %336 = arith.extui %335 : i1 to i32
    %c0_i32_158 = arith.constant 0 : i32
    %337 = arith.cmpi ne, %336, %c0_i32_158 : i32
    scf.if %337 {
      %c1_i32_305 = arith.constant 1 : i32
      %647 = arith.addi %c0_i32_137, %c1_i32_305 : i32
      %648 = arith.index_cast %647 : i32 to index
      %c0_306 = arith.constant 0 : index
      %c0_307 = arith.constant 0 : index
      %649 = vector.load %arg4[%648, %c0_306, %c0_307] : memref<8x8x128xf32, #tpu.memory_space<vmem>>, vector<1x8x128xf32>
      %650 = vector.shape_cast %649 : vector<1x8x128xf32> to vector<8x128xf32>
      %c0_308 = arith.constant 0 : index
      %c0_309 = arith.constant 0 : index
      %651 = vector.load %arg13[%c0_308, %c0_309] : memref<8x128xf32, #tpu.memory_space<vmem>>, vector<8x128xf32>
      tpu.vector_store %arg13[%c0_308, %c0_309], %650 {strides = array<i32>} : memref<8x128xf32, #tpu.memory_space<vmem>>, vector<8x128xf32>,
    } else {
    }
    %true = arith.constant true
    %338 = arith.xori %335, %true : i1
    %339 = arith.extui %338 : i1 to i32
    %c0_i32_159 = arith.constant 0 : i32
    %340 = arith.cmpi ne, %339, %c0_i32_159 : i32
    scf.if %340 {
      %cst_305 = arith.constant dense<0xFF800000> : vector<8xf32>
      %647 = vector.multi_reduction <maximumf>, %326, %cst_305 [1] : vector<8x128xf32> to vector<8xf32>
      %648 = vector.shape_cast %647 : vector<8xf32> to vector<8x1xf32>
      %649 = vector.broadcast %648 : vector<8x1xf32> to vector<8x128xf32>
      %650 = arith.cmpf oeq, %326, %649 : vector<8x128xf32>
      %c128_i32 = arith.constant 128 : i32
      %651 = vector.broadcast %c128_i32 : i32 to vector<8x128xi32>
      %652 = arith.select %650, %10, %651 : vector<8x128xi1>, vector<8x128xi32>
      %cst_306 = arith.constant dense<2147483647> : vector<8xi32>
      %653 = vector.multi_reduction <minsi>, %652, %cst_306 [1] : vector<8x128xi32> to vector<8xi32>
      %654 = vector.shape_cast %653 : vector<8xi32> to vector<8x1xi32>
      %655 = vector.broadcast %654 : vector<8x1xi32> to vector<8x128xi32>
      %656 = arith.cmpi eq, %10, %655 : vector<8x128xi32>
      %657 = arith.extui %656 : vector<8x128xi1> to vector<8x128xi32>
      %658 = arith.sitofp %657 : vector<8x128xi32> to vector<8x128xf32>
      %cst_307 = arith.constant dense<0.000000e+00> : vector<8x128xf32>
      %659 = tpu.matmul %658, %7, %cst_307 {dimension_numbers = #tpu.dot_dimension_numbers<[1], [0], [0], [1], [0, 0, 1, 1], [], []>} : vector<8x128xf32>, vector<128x128xf32>, vector<8x128xf32> -> vector<8x128xf32>
      %c0_308 = arith.constant 0 : index
      %c0_309 = arith.constant 0 : index
      %660 = vector.load %arg13[%c0_308, %c0_309] : memref<8x128xf32, #tpu.memory_space<vmem>>, vector<8x128xf32>
      tpu.vector_store %arg13[%c0_308, %c0_309], %659 {strides = array<i32>} : memref<8x128xf32, #tpu.memory_space<vmem>>, vector<8x128xf32>,
    } else {
    }
    %c1_i32_160 = arith.constant 1 : i32
    %c0_161 = arith.constant 0 : index
    %c0_162 = arith.constant 0 : index
    %341 = vector.load %arg11[%c0_161, %c0_162] : memref<8x32xf32, #tpu.memory_space<vmem>>, vector<8x32xf32>
    %c0_163 = arith.constant 0 : index
    %c0_164 = arith.constant 0 : index
    %342 = vector.load %arg12[%c0_163, %c0_164] : memref<8x32xf32, #tpu.memory_space<vmem>>, vector<8x32xf32>
    %c0_165 = arith.constant 0 : index
    %c0_166 = arith.constant 0 : index
    %343 = vector.load %arg13[%c0_165, %c0_166] : memref<8x128xf32, #tpu.memory_space<vmem>>, vector<8x128xf32>
    %344 = vector.broadcast %6 : vector<1x128xf32> to vector<8x128xf32>
    %345 = arith.addf %343, %344 : vector<8x128xf32>
    %cst_167 = arith.constant dense<0.000000e+00> : vector<8x128xf32>
    %346 = tpu.matmul %341, %5, %cst_167 {dimension_numbers = #tpu.dot_dimension_numbers<[1], [0], [0], [1], [0, 0, 1, 1], [], []>} : vector<8x32xf32>, vector<32x128xf32>, vector<8x128xf32> -> vector<8x128xf32>
    %347 = arith.addf %345, %346 : vector<8x128xf32>
    %348 = vector.extract_strided_slice %347 {offsets = [0, 0], sizes = [8, 32], strides = [1, 1]} : vector<8x128xf32> to vector<8x32xf32>
    %349 = arith.negf %348 : vector<8x32xf32>
    %350 = math.exp %349 : vector<8x32xf32>
    %cst_168 = arith.constant 1.000000e+00 : f32
    %351 = vector.broadcast %cst_168 : f32 to vector<8x32xf32>
    %352 = arith.addf %351, %350 : vector<8x32xf32>
    %353 = arith.divf %351, %352 : vector<8x32xf32>
    %354 = vector.extract_strided_slice %347 {offsets = [0, 32], sizes = [8, 32], strides = [1, 1]} : vector<8x128xf32> to vector<8x32xf32>
    %355 = arith.negf %354 : vector<8x32xf32>
    %356 = math.exp %355 : vector<8x32xf32>
    %cst_169 = arith.constant 1.000000e+00 : f32
    %357 = vector.broadcast %cst_169 : f32 to vector<8x32xf32>
    %358 = arith.addf %357, %356 : vector<8x32xf32>
    %359 = arith.divf %357, %358 : vector<8x32xf32>
    %360 = vector.extract_strided_slice %347 {offsets = [0, 64], sizes = [8, 32], strides = [1, 1]} : vector<8x128xf32> to vector<8x32xf32>
    %361 = math.tanh %360 : vector<8x32xf32>
    %362 = vector.extract_strided_slice %347 {offsets = [0, 96], sizes = [8, 32], strides = [1, 1]} : vector<8x128xf32> to vector<8x32xf32>
    %363 = arith.negf %362 : vector<8x32xf32>
    %364 = math.exp %363 : vector<8x32xf32>
    %cst_170 = arith.constant 1.000000e+00 : f32
    %365 = vector.broadcast %cst_170 : f32 to vector<8x32xf32>
    %366 = arith.addf %365, %364 : vector<8x32xf32>
    %367 = arith.divf %365, %366 : vector<8x32xf32>
    %368 = arith.mulf %359, %342 : vector<8x32xf32>
    %369 = arith.mulf %353, %361 : vector<8x32xf32>
    %370 = arith.addf %368, %369 : vector<8x32xf32>
    %371 = math.tanh %370 : vector<8x32xf32>
    %372 = arith.mulf %367, %371 : vector<8x32xf32>
    %c0_171 = arith.constant 0 : index
    %c0_172 = arith.constant 0 : index
    %373 = vector.load %arg11[%c0_171, %c0_172] : memref<8x32xf32, #tpu.memory_space<vmem>>, vector<8x32xf32>
    tpu.vector_store %arg11[%c0_171, %c0_172], %372 {strides = array<i32>} : memref<8x32xf32, #tpu.memory_space<vmem>>, vector<8x32xf32>,
    %c0_173 = arith.constant 0 : index
    %c0_174 = arith.constant 0 : index
    %374 = vector.load %arg12[%c0_173, %c0_174] : memref<8x32xf32, #tpu.memory_space<vmem>>, vector<8x32xf32>
    tpu.vector_store %arg12[%c0_173, %c0_174], %370 {strides = array<i32>} : memref<8x32xf32, #tpu.memory_space<vmem>>, vector<8x32xf32>,
    %cst_175 = arith.constant dense<0.000000e+00> : vector<8x128xf32>
    %375 = tpu.matmul %372, %8, %cst_175 {dimension_numbers = #tpu.dot_dimension_numbers<[1], [0], [0], [1], [0, 0, 1, 1], [], []>} : vector<8x32xf32>, vector<32x128xf32>, vector<8x128xf32> -> vector<8x128xf32>
    %376 = vector.broadcast %9 : vector<1x128xf32> to vector<8x128xf32>
    %377 = arith.addf %375, %376 : vector<8x128xf32>
    %c1_i32_176 = arith.constant 1 : i32
    %378 = arith.addi %c1_i32_160, %c1_i32_176 : i32
    %379 = arith.index_cast %378 : i32 to index
    %c0_177 = arith.constant 0 : index
    %c0_178 = arith.constant 0 : index
    %380 = vector.load %arg10[%379, %c0_177, %c0_178] : memref<8x8x128xf32, #tpu.memory_space<vmem>>, vector<1x8x128xf32>
    %381 = vector.shape_cast %380 : vector<1x8x128xf32> to vector<8x128xf32>
    %382 = vector.shape_cast %377 : vector<8x128xf32> to vector<1x8x128xf32>
    tpu.vector_store %arg10[%379, %c0_177, %c0_178], %382 {strides = array<i32>} : memref<8x8x128xf32, #tpu.memory_space<vmem>>, vector<1x8x128xf32>,
    %c1_i32_179 = arith.constant 1 : i32
    %383 = arith.addi %c1_i32_160, %c1_i32_179 : i32
    %384 = arith.index_cast %383 : i32 to index
    %385 = memref.load %arg1[%384] : memref<8xi32, #tpu.memory_space<smem>>
    %c0_i32_180 = arith.constant 0 : i32
    %386 = arith.cmpi sgt, %385, %c0_i32_180 : i32
    %387 = arith.extui %386 : i1 to i32
    %c0_i32_181 = arith.constant 0 : i32
    %388 = arith.cmpi ne, %387, %c0_i32_181 : i32
    scf.if %388 {
      %c1_i32_305 = arith.constant 1 : i32
      %647 = arith.addi %c1_i32_160, %c1_i32_305 : i32
      %648 = arith.index_cast %647 : i32 to index
      %c0_306 = arith.constant 0 : index
      %c0_307 = arith.constant 0 : index
      %649 = vector.load %arg4[%648, %c0_306, %c0_307] : memref<8x8x128xf32, #tpu.memory_space<vmem>>, vector<1x8x128xf32>
      %650 = vector.shape_cast %649 : vector<1x8x128xf32> to vector<8x128xf32>
      %c0_308 = arith.constant 0 : index
      %c0_309 = arith.constant 0 : index
      %651 = vector.load %arg13[%c0_308, %c0_309] : memref<8x128xf32, #tpu.memory_space<vmem>>, vector<8x128xf32>
      tpu.vector_store %arg13[%c0_308, %c0_309], %650 {strides = array<i32>} : memref<8x128xf32, #tpu.memory_space<vmem>>, vector<8x128xf32>,
    } else {
    }
    %true_182 = arith.constant true
    %389 = arith.xori %386, %true_182 : i1
    %390 = arith.extui %389 : i1 to i32
    %c0_i32_183 = arith.constant 0 : i32
    %391 = arith.cmpi ne, %390, %c0_i32_183 : i32
    scf.if %391 {
      %cst_305 = arith.constant dense<0xFF800000> : vector<8xf32>
      %647 = vector.multi_reduction <maximumf>, %377, %cst_305 [1] : vector<8x128xf32> to vector<8xf32>
      %648 = vector.shape_cast %647 : vector<8xf32> to vector<8x1xf32>
      %649 = vector.broadcast %648 : vector<8x1xf32> to vector<8x128xf32>
      %650 = arith.cmpf oeq, %377, %649 : vector<8x128xf32>
      %c128_i32 = arith.constant 128 : i32
      %651 = vector.broadcast %c128_i32 : i32 to vector<8x128xi32>
      %652 = arith.select %650, %10, %651 : vector<8x128xi1>, vector<8x128xi32>
      %cst_306 = arith.constant dense<2147483647> : vector<8xi32>
      %653 = vector.multi_reduction <minsi>, %652, %cst_306 [1] : vector<8x128xi32> to vector<8xi32>
      %654 = vector.shape_cast %653 : vector<8xi32> to vector<8x1xi32>
      %655 = vector.broadcast %654 : vector<8x1xi32> to vector<8x128xi32>
      %656 = arith.cmpi eq, %10, %655 : vector<8x128xi32>
      %657 = arith.extui %656 : vector<8x128xi1> to vector<8x128xi32>
      %658 = arith.sitofp %657 : vector<8x128xi32> to vector<8x128xf32>
      %cst_307 = arith.constant dense<0.000000e+00> : vector<8x128xf32>
      %659 = tpu.matmul %658, %7, %cst_307 {dimension_numbers = #tpu.dot_dimension_numbers<[1], [0], [0], [1], [0, 0, 1, 1], [], []>} : vector<8x128xf32>, vector<128x128xf32>, vector<8x128xf32> -> vector<8x128xf32>
      %c0_308 = arith.constant 0 : index
      %c0_309 = arith.constant 0 : index
      %660 = vector.load %arg13[%c0_308, %c0_309] : memref<8x128xf32, #tpu.memory_space<vmem>>, vector<8x128xf32>
      tpu.vector_store %arg13[%c0_308, %c0_309], %659 {strides = array<i32>} : memref<8x128xf32, #tpu.memory_space<vmem>>, vector<8x128xf32>,
    } else {
    }
    %c2_i32_184 = arith.constant 2 : i32
    %c0_185 = arith.constant 0 : index
    %c0_186 = arith.constant 0 : index
    %392 = vector.load %arg11[%c0_185, %c0_186] : memref<8x32xf32, #tpu.memory_space<vmem>>, vector<8x32xf32>
    %c0_187 = arith.constant 0 : index
    %c0_188 = arith.constant 0 : index
    %393 = vector.load %arg12[%c0_187, %c0_188] : memref<8x32xf32, #tpu.memory_space<vmem>>, vector<8x32xf32>
    %c0_189 = arith.constant 0 : index
    %c0_190 = arith.constant 0 : index
    %394 = vector.load %arg13[%c0_189, %c0_190] : memref<8x128xf32, #tpu.memory_space<vmem>>, vector<8x128xf32>
    %395 = vector.broadcast %6 : vector<1x128xf32> to vector<8x128xf32>
    %396 = arith.addf %394, %395 : vector<8x128xf32>
    %cst_191 = arith.constant dense<0.000000e+00> : vector<8x128xf32>
    %397 = tpu.matmul %392, %5, %cst_191 {dimension_numbers = #tpu.dot_dimension_numbers<[1], [0], [0], [1], [0, 0, 1, 1], [], []>} : vector<8x32xf32>, vector<32x128xf32>, vector<8x128xf32> -> vector<8x128xf32>
    %398 = arith.addf %396, %397 : vector<8x128xf32>
    %399 = vector.extract_strided_slice %398 {offsets = [0, 0], sizes = [8, 32], strides = [1, 1]} : vector<8x128xf32> to vector<8x32xf32>
    %400 = arith.negf %399 : vector<8x32xf32>
    %401 = math.exp %400 : vector<8x32xf32>
    %cst_192 = arith.constant 1.000000e+00 : f32
    %402 = vector.broadcast %cst_192 : f32 to vector<8x32xf32>
    %403 = arith.addf %402, %401 : vector<8x32xf32>
    %404 = arith.divf %402, %403 : vector<8x32xf32>
    %405 = vector.extract_strided_slice %398 {offsets = [0, 32], sizes = [8, 32], strides = [1, 1]} : vector<8x128xf32> to vector<8x32xf32>
    %406 = arith.negf %405 : vector<8x32xf32>
    %407 = math.exp %406 : vector<8x32xf32>
    %cst_193 = arith.constant 1.000000e+00 : f32
    %408 = vector.broadcast %cst_193 : f32 to vector<8x32xf32>
    %409 = arith.addf %408, %407 : vector<8x32xf32>
    %410 = arith.divf %408, %409 : vector<8x32xf32>
    %411 = vector.extract_strided_slice %398 {offsets = [0, 64], sizes = [8, 32], strides = [1, 1]} : vector<8x128xf32> to vector<8x32xf32>
    %412 = math.tanh %411 : vector<8x32xf32>
    %413 = vector.extract_strided_slice %398 {offsets = [0, 96], sizes = [8, 32], strides = [1, 1]} : vector<8x128xf32> to vector<8x32xf32>
    %414 = arith.negf %413 : vector<8x32xf32>
    %415 = math.exp %414 : vector<8x32xf32>
    %cst_194 = arith.constant 1.000000e+00 : f32
    %416 = vector.broadcast %cst_194 : f32 to vector<8x32xf32>
    %417 = arith.addf %416, %415 : vector<8x32xf32>
    %418 = arith.divf %416, %417 : vector<8x32xf32>
    %419 = arith.mulf %410, %393 : vector<8x32xf32>
    %420 = arith.mulf %404, %412 : vector<8x32xf32>
    %421 = arith.addf %419, %420 : vector<8x32xf32>
    %422 = math.tanh %421 : vector<8x32xf32>
    %423 = arith.mulf %418, %422 : vector<8x32xf32>
    %c0_195 = arith.constant 0 : index
    %c0_196 = arith.constant 0 : index
    %424 = vector.load %arg11[%c0_195, %c0_196] : memref<8x32xf32, #tpu.memory_space<vmem>>, vector<8x32xf32>
    tpu.vector_store %arg11[%c0_195, %c0_196], %423 {strides = array<i32>} : memref<8x32xf32, #tpu.memory_space<vmem>>, vector<8x32xf32>,
    %c0_197 = arith.constant 0 : index
    %c0_198 = arith.constant 0 : index
    %425 = vector.load %arg12[%c0_197, %c0_198] : memref<8x32xf32, #tpu.memory_space<vmem>>, vector<8x32xf32>
    tpu.vector_store %arg12[%c0_197, %c0_198], %421 {strides = array<i32>} : memref<8x32xf32, #tpu.memory_space<vmem>>, vector<8x32xf32>,
    %cst_199 = arith.constant dense<0.000000e+00> : vector<8x128xf32>
    %426 = tpu.matmul %423, %8, %cst_199 {dimension_numbers = #tpu.dot_dimension_numbers<[1], [0], [0], [1], [0, 0, 1, 1], [], []>} : vector<8x32xf32>, vector<32x128xf32>, vector<8x128xf32> -> vector<8x128xf32>
    %427 = vector.broadcast %9 : vector<1x128xf32> to vector<8x128xf32>
    %428 = arith.addf %426, %427 : vector<8x128xf32>
    %c1_i32_200 = arith.constant 1 : i32
    %429 = arith.addi %c2_i32_184, %c1_i32_200 : i32
    %430 = arith.index_cast %429 : i32 to index
    %c0_201 = arith.constant 0 : index
    %c0_202 = arith.constant 0 : index
    %431 = vector.load %arg10[%430, %c0_201, %c0_202] : memref<8x8x128xf32, #tpu.memory_space<vmem>>, vector<1x8x128xf32>
    %432 = vector.shape_cast %431 : vector<1x8x128xf32> to vector<8x128xf32>
    %433 = vector.shape_cast %428 : vector<8x128xf32> to vector<1x8x128xf32>
    tpu.vector_store %arg10[%430, %c0_201, %c0_202], %433 {strides = array<i32>} : memref<8x8x128xf32, #tpu.memory_space<vmem>>, vector<1x8x128xf32>,
    %c1_i32_203 = arith.constant 1 : i32
    %434 = arith.addi %c2_i32_184, %c1_i32_203 : i32
    %435 = arith.index_cast %434 : i32 to index
    %436 = memref.load %arg1[%435] : memref<8xi32, #tpu.memory_space<smem>>
    %c0_i32_204 = arith.constant 0 : i32
    %437 = arith.cmpi sgt, %436, %c0_i32_204 : i32
    %438 = arith.extui %437 : i1 to i32
    %c0_i32_205 = arith.constant 0 : i32
    %439 = arith.cmpi ne, %438, %c0_i32_205 : i32
    scf.if %439 {
      %c1_i32_305 = arith.constant 1 : i32
      %647 = arith.addi %c2_i32_184, %c1_i32_305 : i32
      %648 = arith.index_cast %647 : i32 to index
      %c0_306 = arith.constant 0 : index
      %c0_307 = arith.constant 0 : index
      %649 = vector.load %arg4[%648, %c0_306, %c0_307] : memref<8x8x128xf32, #tpu.memory_space<vmem>>, vector<1x8x128xf32>
      %650 = vector.shape_cast %649 : vector<1x8x128xf32> to vector<8x128xf32>
      %c0_308 = arith.constant 0 : index
      %c0_309 = arith.constant 0 : index
      %651 = vector.load %arg13[%c0_308, %c0_309] : memref<8x128xf32, #tpu.memory_space<vmem>>, vector<8x128xf32>
      tpu.vector_store %arg13[%c0_308, %c0_309], %650 {strides = array<i32>} : memref<8x128xf32, #tpu.memory_space<vmem>>, vector<8x128xf32>,
    } else {
    }
    %true_206 = arith.constant true
    %440 = arith.xori %437, %true_206 : i1
    %441 = arith.extui %440 : i1 to i32
    %c0_i32_207 = arith.constant 0 : i32
    %442 = arith.cmpi ne, %441, %c0_i32_207 : i32
    scf.if %442 {
      %cst_305 = arith.constant dense<0xFF800000> : vector<8xf32>
      %647 = vector.multi_reduction <maximumf>, %428, %cst_305 [1] : vector<8x128xf32> to vector<8xf32>
      %648 = vector.shape_cast %647 : vector<8xf32> to vector<8x1xf32>
      %649 = vector.broadcast %648 : vector<8x1xf32> to vector<8x128xf32>
      %650 = arith.cmpf oeq, %428, %649 : vector<8x128xf32>
      %c128_i32 = arith.constant 128 : i32
      %651 = vector.broadcast %c128_i32 : i32 to vector<8x128xi32>
      %652 = arith.select %650, %10, %651 : vector<8x128xi1>, vector<8x128xi32>
      %cst_306 = arith.constant dense<2147483647> : vector<8xi32>
      %653 = vector.multi_reduction <minsi>, %652, %cst_306 [1] : vector<8x128xi32> to vector<8xi32>
      %654 = vector.shape_cast %653 : vector<8xi32> to vector<8x1xi32>
      %655 = vector.broadcast %654 : vector<8x1xi32> to vector<8x128xi32>
      %656 = arith.cmpi eq, %10, %655 : vector<8x128xi32>
      %657 = arith.extui %656 : vector<8x128xi1> to vector<8x128xi32>
      %658 = arith.sitofp %657 : vector<8x128xi32> to vector<8x128xf32>
      %cst_307 = arith.constant dense<0.000000e+00> : vector<8x128xf32>
      %659 = tpu.matmul %658, %7, %cst_307 {dimension_numbers = #tpu.dot_dimension_numbers<[1], [0], [0], [1], [0, 0, 1, 1], [], []>} : vector<8x128xf32>, vector<128x128xf32>, vector<8x128xf32> -> vector<8x128xf32>
      %c0_308 = arith.constant 0 : index
      %c0_309 = arith.constant 0 : index
      %660 = vector.load %arg13[%c0_308, %c0_309] : memref<8x128xf32, #tpu.memory_space<vmem>>, vector<8x128xf32>
      tpu.vector_store %arg13[%c0_308, %c0_309], %659 {strides = array<i32>} : memref<8x128xf32, #tpu.memory_space<vmem>>, vector<8x128xf32>,
    } else {
    }
    %c3_i32_208 = arith.constant 3 : i32
    %c0_209 = arith.constant 0 : index
    %c0_210 = arith.constant 0 : index
    %443 = vector.load %arg11[%c0_209, %c0_210] : memref<8x32xf32, #tpu.memory_space<vmem>>, vector<8x32xf32>
    %c0_211 = arith.constant 0 : index
    %c0_212 = arith.constant 0 : index
    %444 = vector.load %arg12[%c0_211, %c0_212] : memref<8x32xf32, #tpu.memory_space<vmem>>, vector<8x32xf32>
    %c0_213 = arith.constant 0 : index
    %c0_214 = arith.constant 0 : index
    %445 = vector.load %arg13[%c0_213, %c0_214] : memref<8x128xf32, #tpu.memory_space<vmem>>, vector<8x128xf32>
    %446 = vector.broadcast %6 : vector<1x128xf32> to vector<8x128xf32>
    %447 = arith.addf %445, %446 : vector<8x128xf32>
    %cst_215 = arith.constant dense<0.000000e+00> : vector<8x128xf32>
    %448 = tpu.matmul %443, %5, %cst_215 {dimension_numbers = #tpu.dot_dimension_numbers<[1], [0], [0], [1], [0, 0, 1, 1], [], []>} : vector<8x32xf32>, vector<32x128xf32>, vector<8x128xf32> -> vector<8x128xf32>
    %449 = arith.addf %447, %448 : vector<8x128xf32>
    %450 = vector.extract_strided_slice %449 {offsets = [0, 0], sizes = [8, 32], strides = [1, 1]} : vector<8x128xf32> to vector<8x32xf32>
    %451 = arith.negf %450 : vector<8x32xf32>
    %452 = math.exp %451 : vector<8x32xf32>
    %cst_216 = arith.constant 1.000000e+00 : f32
    %453 = vector.broadcast %cst_216 : f32 to vector<8x32xf32>
    %454 = arith.addf %453, %452 : vector<8x32xf32>
    %455 = arith.divf %453, %454 : vector<8x32xf32>
    %456 = vector.extract_strided_slice %449 {offsets = [0, 32], sizes = [8, 32], strides = [1, 1]} : vector<8x128xf32> to vector<8x32xf32>
    %457 = arith.negf %456 : vector<8x32xf32>
    %458 = math.exp %457 : vector<8x32xf32>
    %cst_217 = arith.constant 1.000000e+00 : f32
    %459 = vector.broadcast %cst_217 : f32 to vector<8x32xf32>
    %460 = arith.addf %459, %458 : vector<8x32xf32>
    %461 = arith.divf %459, %460 : vector<8x32xf32>
    %462 = vector.extract_strided_slice %449 {offsets = [0, 64], sizes = [8, 32], strides = [1, 1]} : vector<8x128xf32> to vector<8x32xf32>
    %463 = math.tanh %462 : vector<8x32xf32>
    %464 = vector.extract_strided_slice %449 {offsets = [0, 96], sizes = [8, 32], strides = [1, 1]} : vector<8x128xf32> to vector<8x32xf32>
    %465 = arith.negf %464 : vector<8x32xf32>
    %466 = math.exp %465 : vector<8x32xf32>
    %cst_218 = arith.constant 1.000000e+00 : f32
    %467 = vector.broadcast %cst_218 : f32 to vector<8x32xf32>
    %468 = arith.addf %467, %466 : vector<8x32xf32>
    %469 = arith.divf %467, %468 : vector<8x32xf32>
    %470 = arith.mulf %461, %444 : vector<8x32xf32>
    %471 = arith.mulf %455, %463 : vector<8x32xf32>
    %472 = arith.addf %470, %471 : vector<8x32xf32>
    %473 = math.tanh %472 : vector<8x32xf32>
    %474 = arith.mulf %469, %473 : vector<8x32xf32>
    %c0_219 = arith.constant 0 : index
    %c0_220 = arith.constant 0 : index
    %475 = vector.load %arg11[%c0_219, %c0_220] : memref<8x32xf32, #tpu.memory_space<vmem>>, vector<8x32xf32>
    tpu.vector_store %arg11[%c0_219, %c0_220], %474 {strides = array<i32>} : memref<8x32xf32, #tpu.memory_space<vmem>>, vector<8x32xf32>,
    %c0_221 = arith.constant 0 : index
    %c0_222 = arith.constant 0 : index
    %476 = vector.load %arg12[%c0_221, %c0_222] : memref<8x32xf32, #tpu.memory_space<vmem>>, vector<8x32xf32>
    tpu.vector_store %arg12[%c0_221, %c0_222], %472 {strides = array<i32>} : memref<8x32xf32, #tpu.memory_space<vmem>>, vector<8x32xf32>,
    %cst_223 = arith.constant dense<0.000000e+00> : vector<8x128xf32>
    %477 = tpu.matmul %474, %8, %cst_223 {dimension_numbers = #tpu.dot_dimension_numbers<[1], [0], [0], [1], [0, 0, 1, 1], [], []>} : vector<8x32xf32>, vector<32x128xf32>, vector<8x128xf32> -> vector<8x128xf32>
    %478 = vector.broadcast %9 : vector<1x128xf32> to vector<8x128xf32>
    %479 = arith.addf %477, %478 : vector<8x128xf32>
    %c1_i32_224 = arith.constant 1 : i32
    %480 = arith.addi %c3_i32_208, %c1_i32_224 : i32
    %481 = arith.index_cast %480 : i32 to index
    %c0_225 = arith.constant 0 : index
    %c0_226 = arith.constant 0 : index
    %482 = vector.load %arg10[%481, %c0_225, %c0_226] : memref<8x8x128xf32, #tpu.memory_space<vmem>>, vector<1x8x128xf32>
    %483 = vector.shape_cast %482 : vector<1x8x128xf32> to vector<8x128xf32>
    %484 = vector.shape_cast %479 : vector<8x128xf32> to vector<1x8x128xf32>
    tpu.vector_store %arg10[%481, %c0_225, %c0_226], %484 {strides = array<i32>} : memref<8x8x128xf32, #tpu.memory_space<vmem>>, vector<1x8x128xf32>,
    %c1_i32_227 = arith.constant 1 : i32
    %485 = arith.addi %c3_i32_208, %c1_i32_227 : i32
    %486 = arith.index_cast %485 : i32 to index
    %487 = memref.load %arg1[%486] : memref<8xi32, #tpu.memory_space<smem>>
    %c0_i32_228 = arith.constant 0 : i32
    %488 = arith.cmpi sgt, %487, %c0_i32_228 : i32
    %489 = arith.extui %488 : i1 to i32
    %c0_i32_229 = arith.constant 0 : i32
    %490 = arith.cmpi ne, %489, %c0_i32_229 : i32
    scf.if %490 {
      %c1_i32_305 = arith.constant 1 : i32
      %647 = arith.addi %c3_i32_208, %c1_i32_305 : i32
      %648 = arith.index_cast %647 : i32 to index
      %c0_306 = arith.constant 0 : index
      %c0_307 = arith.constant 0 : index
      %649 = vector.load %arg4[%648, %c0_306, %c0_307] : memref<8x8x128xf32, #tpu.memory_space<vmem>>, vector<1x8x128xf32>
      %650 = vector.shape_cast %649 : vector<1x8x128xf32> to vector<8x128xf32>
      %c0_308 = arith.constant 0 : index
      %c0_309 = arith.constant 0 : index
      %651 = vector.load %arg13[%c0_308, %c0_309] : memref<8x128xf32, #tpu.memory_space<vmem>>, vector<8x128xf32>
      tpu.vector_store %arg13[%c0_308, %c0_309], %650 {strides = array<i32>} : memref<8x128xf32, #tpu.memory_space<vmem>>, vector<8x128xf32>,
    } else {
    }
    %true_230 = arith.constant true
    %491 = arith.xori %488, %true_230 : i1
    %492 = arith.extui %491 : i1 to i32
    %c0_i32_231 = arith.constant 0 : i32
    %493 = arith.cmpi ne, %492, %c0_i32_231 : i32
    scf.if %493 {
      %cst_305 = arith.constant dense<0xFF800000> : vector<8xf32>
      %647 = vector.multi_reduction <maximumf>, %479, %cst_305 [1] : vector<8x128xf32> to vector<8xf32>
      %648 = vector.shape_cast %647 : vector<8xf32> to vector<8x1xf32>
      %649 = vector.broadcast %648 : vector<8x1xf32> to vector<8x128xf32>
      %650 = arith.cmpf oeq, %479, %649 : vector<8x128xf32>
      %c128_i32 = arith.constant 128 : i32
      %651 = vector.broadcast %c128_i32 : i32 to vector<8x128xi32>
      %652 = arith.select %650, %10, %651 : vector<8x128xi1>, vector<8x128xi32>
      %cst_306 = arith.constant dense<2147483647> : vector<8xi32>
      %653 = vector.multi_reduction <minsi>, %652, %cst_306 [1] : vector<8x128xi32> to vector<8xi32>
      %654 = vector.shape_cast %653 : vector<8xi32> to vector<8x1xi32>
      %655 = vector.broadcast %654 : vector<8x1xi32> to vector<8x128xi32>
      %656 = arith.cmpi eq, %10, %655 : vector<8x128xi32>
      %657 = arith.extui %656 : vector<8x128xi1> to vector<8x128xi32>
      %658 = arith.sitofp %657 : vector<8x128xi32> to vector<8x128xf32>
      %cst_307 = arith.constant dense<0.000000e+00> : vector<8x128xf32>
      %659 = tpu.matmul %658, %7, %cst_307 {dimension_numbers = #tpu.dot_dimension_numbers<[1], [0], [0], [1], [0, 0, 1, 1], [], []>} : vector<8x128xf32>, vector<128x128xf32>, vector<8x128xf32> -> vector<8x128xf32>
      %c0_308 = arith.constant 0 : index
      %c0_309 = arith.constant 0 : index
      %660 = vector.load %arg13[%c0_308, %c0_309] : memref<8x128xf32, #tpu.memory_space<vmem>>, vector<8x128xf32>
      tpu.vector_store %arg13[%c0_308, %c0_309], %659 {strides = array<i32>} : memref<8x128xf32, #tpu.memory_space<vmem>>, vector<8x128xf32>,
    } else {
    }
    %c4_i32_232 = arith.constant 4 : i32
    %c0_233 = arith.constant 0 : index
    %c0_234 = arith.constant 0 : index
    %494 = vector.load %arg11[%c0_233, %c0_234] : memref<8x32xf32, #tpu.memory_space<vmem>>, vector<8x32xf32>
    %c0_235 = arith.constant 0 : index
    %c0_236 = arith.constant 0 : index
    %495 = vector.load %arg12[%c0_235, %c0_236] : memref<8x32xf32, #tpu.memory_space<vmem>>, vector<8x32xf32>
    %c0_237 = arith.constant 0 : index
    %c0_238 = arith.constant 0 : index
    %496 = vector.load %arg13[%c0_237, %c0_238] : memref<8x128xf32, #tpu.memory_space<vmem>>, vector<8x128xf32>
    %497 = vector.broadcast %6 : vector<1x128xf32> to vector<8x128xf32>
    %498 = arith.addf %496, %497 : vector<8x128xf32>
    %cst_239 = arith.constant dense<0.000000e+00> : vector<8x128xf32>
    %499 = tpu.matmul %494, %5, %cst_239 {dimension_numbers = #tpu.dot_dimension_numbers<[1], [0], [0], [1], [0, 0, 1, 1], [], []>} : vector<8x32xf32>, vector<32x128xf32>, vector<8x128xf32> -> vector<8x128xf32>
    %500 = arith.addf %498, %499 : vector<8x128xf32>
    %501 = vector.extract_strided_slice %500 {offsets = [0, 0], sizes = [8, 32], strides = [1, 1]} : vector<8x128xf32> to vector<8x32xf32>
    %502 = arith.negf %501 : vector<8x32xf32>
    %503 = math.exp %502 : vector<8x32xf32>
    %cst_240 = arith.constant 1.000000e+00 : f32
    %504 = vector.broadcast %cst_240 : f32 to vector<8x32xf32>
    %505 = arith.addf %504, %503 : vector<8x32xf32>
    %506 = arith.divf %504, %505 : vector<8x32xf32>
    %507 = vector.extract_strided_slice %500 {offsets = [0, 32], sizes = [8, 32], strides = [1, 1]} : vector<8x128xf32> to vector<8x32xf32>
    %508 = arith.negf %507 : vector<8x32xf32>
    %509 = math.exp %508 : vector<8x32xf32>
    %cst_241 = arith.constant 1.000000e+00 : f32
    %510 = vector.broadcast %cst_241 : f32 to vector<8x32xf32>
    %511 = arith.addf %510, %509 : vector<8x32xf32>
    %512 = arith.divf %510, %511 : vector<8x32xf32>
    %513 = vector.extract_strided_slice %500 {offsets = [0, 64], sizes = [8, 32], strides = [1, 1]} : vector<8x128xf32> to vector<8x32xf32>
    %514 = math.tanh %513 : vector<8x32xf32>
    %515 = vector.extract_strided_slice %500 {offsets = [0, 96], sizes = [8, 32], strides = [1, 1]} : vector<8x128xf32> to vector<8x32xf32>
    %516 = arith.negf %515 : vector<8x32xf32>
    %517 = math.exp %516 : vector<8x32xf32>
    %cst_242 = arith.constant 1.000000e+00 : f32
    %518 = vector.broadcast %cst_242 : f32 to vector<8x32xf32>
    %519 = arith.addf %518, %517 : vector<8x32xf32>
    %520 = arith.divf %518, %519 : vector<8x32xf32>
    %521 = arith.mulf %512, %495 : vector<8x32xf32>
    %522 = arith.mulf %506, %514 : vector<8x32xf32>
    %523 = arith.addf %521, %522 : vector<8x32xf32>
    %524 = math.tanh %523 : vector<8x32xf32>
    %525 = arith.mulf %520, %524 : vector<8x32xf32>
    %c0_243 = arith.constant 0 : index
    %c0_244 = arith.constant 0 : index
    %526 = vector.load %arg11[%c0_243, %c0_244] : memref<8x32xf32, #tpu.memory_space<vmem>>, vector<8x32xf32>
    tpu.vector_store %arg11[%c0_243, %c0_244], %525 {strides = array<i32>} : memref<8x32xf32, #tpu.memory_space<vmem>>, vector<8x32xf32>,
    %c0_245 = arith.constant 0 : index
    %c0_246 = arith.constant 0 : index
    %527 = vector.load %arg12[%c0_245, %c0_246] : memref<8x32xf32, #tpu.memory_space<vmem>>, vector<8x32xf32>
    tpu.vector_store %arg12[%c0_245, %c0_246], %523 {strides = array<i32>} : memref<8x32xf32, #tpu.memory_space<vmem>>, vector<8x32xf32>,
    %cst_247 = arith.constant dense<0.000000e+00> : vector<8x128xf32>
    %528 = tpu.matmul %525, %8, %cst_247 {dimension_numbers = #tpu.dot_dimension_numbers<[1], [0], [0], [1], [0, 0, 1, 1], [], []>} : vector<8x32xf32>, vector<32x128xf32>, vector<8x128xf32> -> vector<8x128xf32>
    %529 = vector.broadcast %9 : vector<1x128xf32> to vector<8x128xf32>
    %530 = arith.addf %528, %529 : vector<8x128xf32>
    %c1_i32_248 = arith.constant 1 : i32
    %531 = arith.addi %c4_i32_232, %c1_i32_248 : i32
    %532 = arith.index_cast %531 : i32 to index
    %c0_249 = arith.constant 0 : index
    %c0_250 = arith.constant 0 : index
    %533 = vector.load %arg10[%532, %c0_249, %c0_250] : memref<8x8x128xf32, #tpu.memory_space<vmem>>, vector<1x8x128xf32>
    %534 = vector.shape_cast %533 : vector<1x8x128xf32> to vector<8x128xf32>
    %535 = vector.shape_cast %530 : vector<8x128xf32> to vector<1x8x128xf32>
    tpu.vector_store %arg10[%532, %c0_249, %c0_250], %535 {strides = array<i32>} : memref<8x8x128xf32, #tpu.memory_space<vmem>>, vector<1x8x128xf32>,
    %c1_i32_251 = arith.constant 1 : i32
    %536 = arith.addi %c4_i32_232, %c1_i32_251 : i32
    %537 = arith.index_cast %536 : i32 to index
    %538 = memref.load %arg1[%537] : memref<8xi32, #tpu.memory_space<smem>>
    %c0_i32_252 = arith.constant 0 : i32
    %539 = arith.cmpi sgt, %538, %c0_i32_252 : i32
    %540 = arith.extui %539 : i1 to i32
    %c0_i32_253 = arith.constant 0 : i32
    %541 = arith.cmpi ne, %540, %c0_i32_253 : i32
    scf.if %541 {
      %c1_i32_305 = arith.constant 1 : i32
      %647 = arith.addi %c4_i32_232, %c1_i32_305 : i32
      %648 = arith.index_cast %647 : i32 to index
      %c0_306 = arith.constant 0 : index
      %c0_307 = arith.constant 0 : index
      %649 = vector.load %arg4[%648, %c0_306, %c0_307] : memref<8x8x128xf32, #tpu.memory_space<vmem>>, vector<1x8x128xf32>
      %650 = vector.shape_cast %649 : vector<1x8x128xf32> to vector<8x128xf32>
      %c0_308 = arith.constant 0 : index
      %c0_309 = arith.constant 0 : index
      %651 = vector.load %arg13[%c0_308, %c0_309] : memref<8x128xf32, #tpu.memory_space<vmem>>, vector<8x128xf32>
      tpu.vector_store %arg13[%c0_308, %c0_309], %650 {strides = array<i32>} : memref<8x128xf32, #tpu.memory_space<vmem>>, vector<8x128xf32>,
    } else {
    }
    %true_254 = arith.constant true
    %542 = arith.xori %539, %true_254 : i1
    %543 = arith.extui %542 : i1 to i32
    %c0_i32_255 = arith.constant 0 : i32
    %544 = arith.cmpi ne, %543, %c0_i32_255 : i32
    scf.if %544 {
      %cst_305 = arith.constant dense<0xFF800000> : vector<8xf32>
      %647 = vector.multi_reduction <maximumf>, %530, %cst_305 [1] : vector<8x128xf32> to vector<8xf32>
      %648 = vector.shape_cast %647 : vector<8xf32> to vector<8x1xf32>
      %649 = vector.broadcast %648 : vector<8x1xf32> to vector<8x128xf32>
      %650 = arith.cmpf oeq, %530, %649 : vector<8x128xf32>
      %c128_i32 = arith.constant 128 : i32
      %651 = vector.broadcast %c128_i32 : i32 to vector<8x128xi32>
      %652 = arith.select %650, %10, %651 : vector<8x128xi1>, vector<8x128xi32>
      %cst_306 = arith.constant dense<2147483647> : vector<8xi32>
      %653 = vector.multi_reduction <minsi>, %652, %cst_306 [1] : vector<8x128xi32> to vector<8xi32>
      %654 = vector.shape_cast %653 : vector<8xi32> to vector<8x1xi32>
      %655 = vector.broadcast %654 : vector<8x1xi32> to vector<8x128xi32>
      %656 = arith.cmpi eq, %10, %655 : vector<8x128xi32>
      %657 = arith.extui %656 : vector<8x128xi1> to vector<8x128xi32>
      %658 = arith.sitofp %657 : vector<8x128xi32> to vector<8x128xf32>
      %cst_307 = arith.constant dense<0.000000e+00> : vector<8x128xf32>
      %659 = tpu.matmul %658, %7, %cst_307 {dimension_numbers = #tpu.dot_dimension_numbers<[1], [0], [0], [1], [0, 0, 1, 1], [], []>} : vector<8x128xf32>, vector<128x128xf32>, vector<8x128xf32> -> vector<8x128xf32>
      %c0_308 = arith.constant 0 : index
      %c0_309 = arith.constant 0 : index
      %660 = vector.load %arg13[%c0_308, %c0_309] : memref<8x128xf32, #tpu.memory_space<vmem>>, vector<8x128xf32>
      tpu.vector_store %arg13[%c0_308, %c0_309], %659 {strides = array<i32>} : memref<8x128xf32, #tpu.memory_space<vmem>>, vector<8x128xf32>,
    } else {
    }
    %c5_i32_256 = arith.constant 5 : i32
    %c0_257 = arith.constant 0 : index
    %c0_258 = arith.constant 0 : index
    %545 = vector.load %arg11[%c0_257, %c0_258] : memref<8x32xf32, #tpu.memory_space<vmem>>, vector<8x32xf32>
    %c0_259 = arith.constant 0 : index
    %c0_260 = arith.constant 0 : index
    %546 = vector.load %arg12[%c0_259, %c0_260] : memref<8x32xf32, #tpu.memory_space<vmem>>, vector<8x32xf32>
    %c0_261 = arith.constant 0 : index
    %c0_262 = arith.constant 0 : index
    %547 = vector.load %arg13[%c0_261, %c0_262] : memref<8x128xf32, #tpu.memory_space<vmem>>, vector<8x128xf32>
    %548 = vector.broadcast %6 : vector<1x128xf32> to vector<8x128xf32>
    %549 = arith.addf %547, %548 : vector<8x128xf32>
    %cst_263 = arith.constant dense<0.000000e+00> : vector<8x128xf32>
    %550 = tpu.matmul %545, %5, %cst_263 {dimension_numbers = #tpu.dot_dimension_numbers<[1], [0], [0], [1], [0, 0, 1, 1], [], []>} : vector<8x32xf32>, vector<32x128xf32>, vector<8x128xf32> -> vector<8x128xf32>
    %551 = arith.addf %549, %550 : vector<8x128xf32>
    %552 = vector.extract_strided_slice %551 {offsets = [0, 0], sizes = [8, 32], strides = [1, 1]} : vector<8x128xf32> to vector<8x32xf32>
    %553 = arith.negf %552 : vector<8x32xf32>
    %554 = math.exp %553 : vector<8x32xf32>
    %cst_264 = arith.constant 1.000000e+00 : f32
    %555 = vector.broadcast %cst_264 : f32 to vector<8x32xf32>
    %556 = arith.addf %555, %554 : vector<8x32xf32>
    %557 = arith.divf %555, %556 : vector<8x32xf32>
    %558 = vector.extract_strided_slice %551 {offsets = [0, 32], sizes = [8, 32], strides = [1, 1]} : vector<8x128xf32> to vector<8x32xf32>
    %559 = arith.negf %558 : vector<8x32xf32>
    %560 = math.exp %559 : vector<8x32xf32>
    %cst_265 = arith.constant 1.000000e+00 : f32
    %561 = vector.broadcast %cst_265 : f32 to vector<8x32xf32>
    %562 = arith.addf %561, %560 : vector<8x32xf32>
    %563 = arith.divf %561, %562 : vector<8x32xf32>
    %564 = vector.extract_strided_slice %551 {offsets = [0, 64], sizes = [8, 32], strides = [1, 1]} : vector<8x128xf32> to vector<8x32xf32>
    %565 = math.tanh %564 : vector<8x32xf32>
    %566 = vector.extract_strided_slice %551 {offsets = [0, 96], sizes = [8, 32], strides = [1, 1]} : vector<8x128xf32> to vector<8x32xf32>
    %567 = arith.negf %566 : vector<8x32xf32>
    %568 = math.exp %567 : vector<8x32xf32>
    %cst_266 = arith.constant 1.000000e+00 : f32
    %569 = vector.broadcast %cst_266 : f32 to vector<8x32xf32>
    %570 = arith.addf %569, %568 : vector<8x32xf32>
    %571 = arith.divf %569, %570 : vector<8x32xf32>
    %572 = arith.mulf %563, %546 : vector<8x32xf32>
    %573 = arith.mulf %557, %565 : vector<8x32xf32>
    %574 = arith.addf %572, %573 : vector<8x32xf32>
    %575 = math.tanh %574 : vector<8x32xf32>
    %576 = arith.mulf %571, %575 : vector<8x32xf32>
    %c0_267 = arith.constant 0 : index
    %c0_268 = arith.constant 0 : index
    %577 = vector.load %arg11[%c0_267, %c0_268] : memref<8x32xf32, #tpu.memory_space<vmem>>, vector<8x32xf32>
    tpu.vector_store %arg11[%c0_267, %c0_268], %576 {strides = array<i32>} : memref<8x32xf32, #tpu.memory_space<vmem>>, vector<8x32xf32>,
    %c0_269 = arith.constant 0 : index
    %c0_270 = arith.constant 0 : index
    %578 = vector.load %arg12[%c0_269, %c0_270] : memref<8x32xf32, #tpu.memory_space<vmem>>, vector<8x32xf32>
    tpu.vector_store %arg12[%c0_269, %c0_270], %574 {strides = array<i32>} : memref<8x32xf32, #tpu.memory_space<vmem>>, vector<8x32xf32>,
    %cst_271 = arith.constant dense<0.000000e+00> : vector<8x128xf32>
    %579 = tpu.matmul %576, %8, %cst_271 {dimension_numbers = #tpu.dot_dimension_numbers<[1], [0], [0], [1], [0, 0, 1, 1], [], []>} : vector<8x32xf32>, vector<32x128xf32>, vector<8x128xf32> -> vector<8x128xf32>
    %580 = vector.broadcast %9 : vector<1x128xf32> to vector<8x128xf32>
    %581 = arith.addf %579, %580 : vector<8x128xf32>
    %c1_i32_272 = arith.constant 1 : i32
    %582 = arith.addi %c5_i32_256, %c1_i32_272 : i32
    %583 = arith.index_cast %582 : i32 to index
    %c0_273 = arith.constant 0 : index
    %c0_274 = arith.constant 0 : index
    %584 = vector.load %arg10[%583, %c0_273, %c0_274] : memref<8x8x128xf32, #tpu.memory_space<vmem>>, vector<1x8x128xf32>
    %585 = vector.shape_cast %584 : vector<1x8x128xf32> to vector<8x128xf32>
    %586 = vector.shape_cast %581 : vector<8x128xf32> to vector<1x8x128xf32>
    tpu.vector_store %arg10[%583, %c0_273, %c0_274], %586 {strides = array<i32>} : memref<8x8x128xf32, #tpu.memory_space<vmem>>, vector<1x8x128xf32>,
    %c1_i32_275 = arith.constant 1 : i32
    %587 = arith.addi %c5_i32_256, %c1_i32_275 : i32
    %588 = arith.index_cast %587 : i32 to index
    %589 = memref.load %arg1[%588] : memref<8xi32, #tpu.memory_space<smem>>
    %c0_i32_276 = arith.constant 0 : i32
    %590 = arith.cmpi sgt, %589, %c0_i32_276 : i32
    %591 = arith.extui %590 : i1 to i32
    %c0_i32_277 = arith.constant 0 : i32
    %592 = arith.cmpi ne, %591, %c0_i32_277 : i32
    scf.if %592 {
      %c1_i32_305 = arith.constant 1 : i32
      %647 = arith.addi %c5_i32_256, %c1_i32_305 : i32
      %648 = arith.index_cast %647 : i32 to index
      %c0_306 = arith.constant 0 : index
      %c0_307 = arith.constant 0 : index
      %649 = vector.load %arg4[%648, %c0_306, %c0_307] : memref<8x8x128xf32, #tpu.memory_space<vmem>>, vector<1x8x128xf32>
      %650 = vector.shape_cast %649 : vector<1x8x128xf32> to vector<8x128xf32>
      %c0_308 = arith.constant 0 : index
      %c0_309 = arith.constant 0 : index
      %651 = vector.load %arg13[%c0_308, %c0_309] : memref<8x128xf32, #tpu.memory_space<vmem>>, vector<8x128xf32>
      tpu.vector_store %arg13[%c0_308, %c0_309], %650 {strides = array<i32>} : memref<8x128xf32, #tpu.memory_space<vmem>>, vector<8x128xf32>,
    } else {
    }
    %true_278 = arith.constant true
    %593 = arith.xori %590, %true_278 : i1
    %594 = arith.extui %593 : i1 to i32
    %c0_i32_279 = arith.constant 0 : i32
    %595 = arith.cmpi ne, %594, %c0_i32_279 : i32
    scf.if %595 {
      %cst_305 = arith.constant dense<0xFF800000> : vector<8xf32>
      %647 = vector.multi_reduction <maximumf>, %581, %cst_305 [1] : vector<8x128xf32> to vector<8xf32>
      %648 = vector.shape_cast %647 : vector<8xf32> to vector<8x1xf32>
      %649 = vector.broadcast %648 : vector<8x1xf32> to vector<8x128xf32>
      %650 = arith.cmpf oeq, %581, %649 : vector<8x128xf32>
      %c128_i32 = arith.constant 128 : i32
      %651 = vector.broadcast %c128_i32 : i32 to vector<8x128xi32>
      %652 = arith.select %650, %10, %651 : vector<8x128xi1>, vector<8x128xi32>
      %cst_306 = arith.constant dense<2147483647> : vector<8xi32>
      %653 = vector.multi_reduction <minsi>, %652, %cst_306 [1] : vector<8x128xi32> to vector<8xi32>
      %654 = vector.shape_cast %653 : vector<8xi32> to vector<8x1xi32>
      %655 = vector.broadcast %654 : vector<8x1xi32> to vector<8x128xi32>
      %656 = arith.cmpi eq, %10, %655 : vector<8x128xi32>
      %657 = arith.extui %656 : vector<8x128xi1> to vector<8x128xi32>
      %658 = arith.sitofp %657 : vector<8x128xi32> to vector<8x128xf32>
      %cst_307 = arith.constant dense<0.000000e+00> : vector<8x128xf32>
      %659 = tpu.matmul %658, %7, %cst_307 {dimension_numbers = #tpu.dot_dimension_numbers<[1], [0], [0], [1], [0, 0, 1, 1], [], []>} : vector<8x128xf32>, vector<128x128xf32>, vector<8x128xf32> -> vector<8x128xf32>
      %c0_308 = arith.constant 0 : index
      %c0_309 = arith.constant 0 : index
      %660 = vector.load %arg13[%c0_308, %c0_309] : memref<8x128xf32, #tpu.memory_space<vmem>>, vector<8x128xf32>
      tpu.vector_store %arg13[%c0_308, %c0_309], %659 {strides = array<i32>} : memref<8x128xf32, #tpu.memory_space<vmem>>, vector<8x128xf32>,
    } else {
    }
    %c6_i32_280 = arith.constant 6 : i32
    %c0_281 = arith.constant 0 : index
    %c0_282 = arith.constant 0 : index
    %596 = vector.load %arg11[%c0_281, %c0_282] : memref<8x32xf32, #tpu.memory_space<vmem>>, vector<8x32xf32>
    %c0_283 = arith.constant 0 : index
    %c0_284 = arith.constant 0 : index
    %597 = vector.load %arg12[%c0_283, %c0_284] : memref<8x32xf32, #tpu.memory_space<vmem>>, vector<8x32xf32>
    %c0_285 = arith.constant 0 : index
    %c0_286 = arith.constant 0 : index
    %598 = vector.load %arg13[%c0_285, %c0_286] : memref<8x128xf32, #tpu.memory_space<vmem>>, vector<8x128xf32>
    %599 = vector.broadcast %6 : vector<1x128xf32> to vector<8x128xf32>
    %600 = arith.addf %598, %599 : vector<8x128xf32>
    %cst_287 = arith.constant dense<0.000000e+00> : vector<8x128xf32>
    %601 = tpu.matmul %596, %5, %cst_287 {dimension_numbers = #tpu.dot_dimension_numbers<[1], [0], [0], [1], [0, 0, 1, 1], [], []>} : vector<8x32xf32>, vector<32x128xf32>, vector<8x128xf32> -> vector<8x128xf32>
    %602 = arith.addf %600, %601 : vector<8x128xf32>
    %603 = vector.extract_strided_slice %602 {offsets = [0, 0], sizes = [8, 32], strides = [1, 1]} : vector<8x128xf32> to vector<8x32xf32>
    %604 = arith.negf %603 : vector<8x32xf32>
    %605 = math.exp %604 : vector<8x32xf32>
    %cst_288 = arith.constant 1.000000e+00 : f32
    %606 = vector.broadcast %cst_288 : f32 to vector<8x32xf32>
    %607 = arith.addf %606, %605 : vector<8x32xf32>
    %608 = arith.divf %606, %607 : vector<8x32xf32>
    %609 = vector.extract_strided_slice %602 {offsets = [0, 32], sizes = [8, 32], strides = [1, 1]} : vector<8x128xf32> to vector<8x32xf32>
    %610 = arith.negf %609 : vector<8x32xf32>
    %611 = math.exp %610 : vector<8x32xf32>
    %cst_289 = arith.constant 1.000000e+00 : f32
    %612 = vector.broadcast %cst_289 : f32 to vector<8x32xf32>
    %613 = arith.addf %612, %611 : vector<8x32xf32>
    %614 = arith.divf %612, %613 : vector<8x32xf32>
    %615 = vector.extract_strided_slice %602 {offsets = [0, 64], sizes = [8, 32], strides = [1, 1]} : vector<8x128xf32> to vector<8x32xf32>
    %616 = math.tanh %615 : vector<8x32xf32>
    %617 = vector.extract_strided_slice %602 {offsets = [0, 96], sizes = [8, 32], strides = [1, 1]} : vector<8x128xf32> to vector<8x32xf32>
    %618 = arith.negf %617 : vector<8x32xf32>
    %619 = math.exp %618 : vector<8x32xf32>
    %cst_290 = arith.constant 1.000000e+00 : f32
    %620 = vector.broadcast %cst_290 : f32 to vector<8x32xf32>
    %621 = arith.addf %620, %619 : vector<8x32xf32>
    %622 = arith.divf %620, %621 : vector<8x32xf32>
    %623 = arith.mulf %614, %597 : vector<8x32xf32>
    %624 = arith.mulf %608, %616 : vector<8x32xf32>
    %625 = arith.addf %623, %624 : vector<8x32xf32>
    %626 = math.tanh %625 : vector<8x32xf32>
    %627 = arith.mulf %622, %626 : vector<8x32xf32>
    %c0_291 = arith.constant 0 : index
    %c0_292 = arith.constant 0 : index
    %628 = vector.load %arg11[%c0_291, %c0_292] : memref<8x32xf32, #tpu.memory_space<vmem>>, vector<8x32xf32>
    tpu.vector_store %arg11[%c0_291, %c0_292], %627 {strides = array<i32>} : memref<8x32xf32, #tpu.memory_space<vmem>>, vector<8x32xf32>,
    %c0_293 = arith.constant 0 : index
    %c0_294 = arith.constant 0 : index
    %629 = vector.load %arg12[%c0_293, %c0_294] : memref<8x32xf32, #tpu.memory_space<vmem>>, vector<8x32xf32>
    tpu.vector_store %arg12[%c0_293, %c0_294], %625 {strides = array<i32>} : memref<8x32xf32, #tpu.memory_space<vmem>>, vector<8x32xf32>,
    %cst_295 = arith.constant dense<0.000000e+00> : vector<8x128xf32>
    %630 = tpu.matmul %627, %8, %cst_295 {dimension_numbers = #tpu.dot_dimension_numbers<[1], [0], [0], [1], [0, 0, 1, 1], [], []>} : vector<8x32xf32>, vector<32x128xf32>, vector<8x128xf32> -> vector<8x128xf32>
    %631 = vector.broadcast %9 : vector<1x128xf32> to vector<8x128xf32>
    %632 = arith.addf %630, %631 : vector<8x128xf32>
    %c1_i32_296 = arith.constant 1 : i32
    %633 = arith.addi %c6_i32_280, %c1_i32_296 : i32
    %634 = arith.index_cast %633 : i32 to index
    %c0_297 = arith.constant 0 : index
    %c0_298 = arith.constant 0 : index
    %635 = vector.load %arg10[%634, %c0_297, %c0_298] : memref<8x8x128xf32, #tpu.memory_space<vmem>>, vector<1x8x128xf32>
    %636 = vector.shape_cast %635 : vector<1x8x128xf32> to vector<8x128xf32>
    %637 = vector.shape_cast %632 : vector<8x128xf32> to vector<1x8x128xf32>
    tpu.vector_store %arg10[%634, %c0_297, %c0_298], %637 {strides = array<i32>} : memref<8x8x128xf32, #tpu.memory_space<vmem>>, vector<1x8x128xf32>,
    %c1_i32_299 = arith.constant 1 : i32
    %638 = arith.addi %c6_i32_280, %c1_i32_299 : i32
    %639 = arith.index_cast %638 : i32 to index
    %640 = memref.load %arg1[%639] : memref<8xi32, #tpu.memory_space<smem>>
    %c0_i32_300 = arith.constant 0 : i32
    %641 = arith.cmpi sgt, %640, %c0_i32_300 : i32
    %642 = arith.extui %641 : i1 to i32
    %c0_i32_301 = arith.constant 0 : i32
    %643 = arith.cmpi ne, %642, %c0_i32_301 : i32
    scf.if %643 {
      %c1_i32_305 = arith.constant 1 : i32
      %647 = arith.addi %c6_i32_280, %c1_i32_305 : i32
      %648 = arith.index_cast %647 : i32 to index
      %c0_306 = arith.constant 0 : index
      %c0_307 = arith.constant 0 : index
      %649 = vector.load %arg4[%648, %c0_306, %c0_307] : memref<8x8x128xf32, #tpu.memory_space<vmem>>, vector<1x8x128xf32>
      %650 = vector.shape_cast %649 : vector<1x8x128xf32> to vector<8x128xf32>
      %c0_308 = arith.constant 0 : index
      %c0_309 = arith.constant 0 : index
      %651 = vector.load %arg13[%c0_308, %c0_309] : memref<8x128xf32, #tpu.memory_space<vmem>>, vector<8x128xf32>
      tpu.vector_store %arg13[%c0_308, %c0_309], %650 {strides = array<i32>} : memref<8x128xf32, #tpu.memory_space<vmem>>, vector<8x128xf32>,
    } else {
    }
    %true_302 = arith.constant true
    %644 = arith.xori %641, %true_302 : i1
    %645 = arith.extui %644 : i1 to i32
    %c0_i32_303 = arith.constant 0 : i32
    %646 = arith.cmpi ne, %645, %c0_i32_303 : i32
    scf.if %646 {
      %cst_305 = arith.constant dense<0xFF800000> : vector<8xf32>
      %647 = vector.multi_reduction <maximumf>, %632, %cst_305 [1] : vector<8x128xf32> to vector<8xf32>
      %648 = vector.shape_cast %647 : vector<8xf32> to vector<8x1xf32>
      %649 = vector.broadcast %648 : vector<8x1xf32> to vector<8x128xf32>
      %650 = arith.cmpf oeq, %632, %649 : vector<8x128xf32>
      %c128_i32 = arith.constant 128 : i32
      %651 = vector.broadcast %c128_i32 : i32 to vector<8x128xi32>
      %652 = arith.select %650, %10, %651 : vector<8x128xi1>, vector<8x128xi32>
      %cst_306 = arith.constant dense<2147483647> : vector<8xi32>
      %653 = vector.multi_reduction <minsi>, %652, %cst_306 [1] : vector<8x128xi32> to vector<8xi32>
      %654 = vector.shape_cast %653 : vector<8xi32> to vector<8x1xi32>
      %655 = vector.broadcast %654 : vector<8x1xi32> to vector<8x128xi32>
      %656 = arith.cmpi eq, %10, %655 : vector<8x128xi32>
      %657 = arith.extui %656 : vector<8x128xi1> to vector<8x128xi32>
      %658 = arith.sitofp %657 : vector<8x128xi32> to vector<8x128xf32>
      %cst_307 = arith.constant dense<0.000000e+00> : vector<8x128xf32>
      %659 = tpu.matmul %658, %7, %cst_307 {dimension_numbers = #tpu.dot_dimension_numbers<[1], [0], [0], [1], [0, 0, 1, 1], [], []>} : vector<8x128xf32>, vector<128x128xf32>, vector<8x128xf32> -> vector<8x128xf32>
      %c0_308 = arith.constant 0 : index
      %c0_309 = arith.constant 0 : index
      %660 = vector.load %arg13[%c0_308, %c0_309] : memref<8x128xf32, #tpu.memory_space<vmem>>, vector<8x128xf32>
      tpu.vector_store %arg13[%c0_308, %c0_309], %659 {strides = array<i32>} : memref<8x128xf32, #tpu.memory_space<vmem>>, vector<8x128xf32>,
    } else {
    }
    %c7_i32_304 = arith.constant 7 : i32
    return
  }
  func.func @transform_0(%arg0: i32, %arg1: memref<8xi32, #tpu.memory_space<smem>>) -> (i32, i32, i32) {
    %c0_i32 = arith.constant 0 : i32
    %c0_i32_0 = arith.constant 0 : i32
    %c0_i32_1 = arith.constant 0 : i32
    %c0_i32_2 = arith.constant 0 : i32
    return %c0_i32, %c0_i32_0, %c0_i32_1 : i32, i32, i32
  }
  func.func @transform_1(%arg0: i32, %arg1: memref<8xi32, #tpu.memory_space<smem>>) -> (i32, i32) {
    %c0_i32 = arith.constant 0 : i32
    %c0_i32_0 = arith.constant 0 : i32
    %c0_i32_1 = arith.constant 0 : i32
    return %c0_i32, %c0_i32_0 : i32, i32
  }
  func.func @transform_2(%arg0: i32, %arg1: memref<8xi32, #tpu.memory_space<smem>>) -> (i32, i32, i32) {
    %c0_i32 = arith.constant 0 : i32
    %c0_i32_0 = arith.constant 0 : i32
    %c0_i32_1 = arith.constant 0 : i32
    %c0_i32_2 = arith.constant 0 : i32
    return %c0_i32, %c0_i32_0, %c0_i32_1 : i32, i32, i32
  }
  func.func @transform_3(%arg0: i32, %arg1: memref<8xi32, #tpu.memory_space<smem>>) -> (i32, i32) {
    %c0_i32 = arith.constant 0 : i32
    %c0_i32_0 = arith.constant 0 : i32
    %c0_i32_1 = arith.constant 0 : i32
    return %c0_i32, %c0_i32_0 : i32, i32
  }
  func.func @transform_4(%arg0: i32, %arg1: memref<8xi32, #tpu.memory_space<smem>>) -> (i32, i32) {
    %c0_i32 = arith.constant 0 : i32
    %c0_i32_0 = arith.constant 0 : i32
    %c0_i32_1 = arith.constant 0 : i32
    return %c0_i32, %c0_i32_0 : i32, i32
  }
  func.func @transform_5(%arg0: i32, %arg1: memref<8xi32, #tpu.memory_space<smem>>) -> (i32, i32) {
    %c0_i32 = arith.constant 0 : i32
    %c0_i32_0 = arith.constant 0 : i32
    %c0_i32_1 = arith.constant 0 : i32
    return %c0_i32, %c0_i32_0 : i32, i32
  }
  func.func @transform_6(%arg0: i32, %arg1: memref<8xi32, #tpu.memory_space<smem>>) -> (i32, i32) {
    %c0_i32 = arith.constant 0 : i32
    %c0_i32_0 = arith.constant 0 : i32
    %c0_i32_1 = arith.constant 0 : i32
    return %c0_i32, %c0_i32_0 : i32, i32
  }
  func.func @transform_7(%arg0: i32, %arg1: memref<8xi32, #tpu.memory_space<smem>>) -> (i32, i32) {
    %c0_i32 = arith.constant 0 : i32
    %c0_i32_0 = arith.constant 0 : i32
    %c0_i32_1 = arith.constant 0 : i32
    return %c0_i32, %c0_i32_0 : i32, i32
  }
  func.func @transform_8(%arg0: i32, %arg1: memref<8xi32, #tpu.memory_space<smem>>) -> (i32, i32, i32) {
    %c0_i32 = arith.constant 0 : i32
    %c0_i32_0 = arith.constant 0 : i32
    %c0_i32_1 = arith.constant 0 : i32
    %c0_i32_2 = arith.constant 0 : i32
    return %c0_i32, %c0_i32_0, %c0_i32_1 : i32, i32, i32
  }
}

</mosaic_0001>

<bundles_post_ra>
// kernel: _forward_impl.1
= control target key start
LH: loop header
LB: loop body
LE: loop exit
PB: predicated region body
PF: predicated region fallthrough
CT: control target
= control target key end

     0   :  { %s2094_s12 = smov [#allocation6]   ;;  %s2697_s0 = inlined_call_operand.vmem [shape: s32[8], index: 0, kind: input, shape index: {}]   ;;  %s2698_s1 = inlined_call_operand.vmem [shape: f32[8,8,128], index: 1, kind: input, shape index: {}]   ;;  %s2699_s2 = inlined_call_operand.vmem [shape: f32[32,128], index: 2, kind: input, shape index: {}]   ;;  %s2700_s3 = inlined_call_operand.vmem [shape: f32[8,8,128], index: 3, kind: input, shape index: {}]   ;;  %s2701_s4 = inlined_call_operand.vmem [shape: f32[32,128], index: 4, kind: input, shape index: {}]   ;;  %s2702_s5 = inlined_call_operand.vmem [shape: f32[1,128], index: 5, kind: input, shape index: {}]   ;;  %s2703_s6 = inlined_call_operand.vmem [shape: f32[128,128], index: 6, kind: input, shape index: {}]   ;;  %s2704_s7 = inlined_call_operand.vmem [shape: f32[32,128], index: 7, kind: input, shape index: {}]   ;;  %s2705_s8 = inlined_call_operand.vmem [shape: f32[1,128], index: 8, kind: input, shape index: {}]   ;;  %s2706_s9 = inlined_call_operand.hbm [shape: f32[8,8,128], index: 9, kind: output, shape index: {}]  }
   0x1   :  { %s15_s11 = sshll.u32 %s2697_s0, 4  ;;  %s16_s11 = int_to_ptr.vmem [resolvable:$true] %s15_s11 }
   0x2   :  { %18 = dma.vmem_to_smem %s16_s11, 16, %s2094_s12, [#allocation5] }
   0x3   :  { %2090 = dma.done.wait [#allocation5], 16 }
   0x4   :  { %2091 = vsyncadd [#allocation5], 4294967280 }
   0x5   :  { %21 = sfence }
   0x6   :  { %22 = vsyncpa [#allocation8], 0  ;;  %v43_v0 = vld [vmem:[%s2699_s2 + $0x18] sm:$0xff]  ;;  %v2168_v1 = vld [vmem:[%s2703_s6] sm:$0xff]  ;;  %v70_v2 = vlaneseq  ;;  %vm72_vm0 = vcmask 261120   ;;  %v2095_v6 = vmov 0.0  }
   0x7   :  { %v2173_v3 = vld [vmem:[%s2703_s6 + $0x8] sm:$0xff]  ;;  %v2178_v4 = vld [vmem:[%s2703_s6 + $0x10] sm:$0xff]  ;;  %v2183_v5 = vld [vmem:[%s2703_s6 + $0x18] sm:$0xff]  ;;  %93 = vmatpush.msra.mxu0 %v43_v0  ;;  %39 = vst [vmem:[#allocation7] sm:$0xff] %v2095_v6  ;;  %172 = vmatpush.msra.mxu1 %v43_v0  ;;  %s2096_s30 = smov 64   ;;  %s2097_s10 = smov 32  }
   0x8   :  { %v2188_v7 = vld [vmem:[%s2703_s6 + $0x20] sm:$0xff]  ;;  %v2193_v8 = vld [vmem:[%s2703_s6 + $0x28] sm:$0xff]  ;;  %v2198_v9 = vld [vmem:[%s2703_s6 + $0x30] sm:$0xff]  ;;  %v2200_v10 = vand.u32 127, %v70_v2  ;;  %73 = vst.msk [vmem:[#allocation2] sm:$0xff] %vm72_vm0, %v2095_v6  ;;  %251 = vmatpush.msra.mxu2 %v43_v0  ;;  %330 = vmatpush.msra.mxu3 %v43_v0  ;;  %s2098_s11 = smov 96  }
   0x9   :  { %v2206_v11 = vld [vmem:[%s2703_s6 + $0x38] sm:$0xff]  ;;  %v2211_v12 = vld [vmem:[%s2703_s6 + $0x40] sm:$0xff]  ;;  %v2216_v13 = vld [vmem:[%s2703_s6 + $0x48] sm:$0xff]  ;;  %74 = vst.msk [vmem:[#allocation3] sm:$0xff] %vm72_vm0, %v2095_v6  ;;  %s1857_s21 = sld [smem:[#allocation6 + $0x1]] }
   0xa   :  { %v2222_v14 = vld [vmem:[%s2703_s6 + $0x50] sm:$0xff]  ;;  %v2227_v15 = vld [vmem:[%s2703_s6 + $0x58] sm:$0xff]  ;;  %v2232_v16 = vld [vmem:[%s2703_s6 + $0x60] sm:$0xff] }
   0xb   :  { %v2237_v17 = vld [vmem:[%s2703_s6 + $0x68] sm:$0xff]  ;;  %v2242_v18 = vld [vmem:[%s2703_s6 + $0x70] sm:$0xff]  ;;  %v2247_v19 = vld [vmem:[%s2703_s6 + $0x78] sm:$0xff] }
   0xc   :  { %v42_v20 = vld [vmem:[%s2699_s2 + $0x10] sm:$0xff]  ;;  %v41_v21 = vld [vmem:[%s2699_s2 + $0x8] sm:$0xff]  ;;  %v40_v22 = vld [vmem:[%s2699_s2] sm:$0xff] }
   0xd   :  { %94 = vmatpush.msra.mxu0 %v42_v20  ;;  %173 = vmatpush.msra.mxu1 %v42_v20  ;;  %v77_v24 = vld [vmem:[%s2698_s1] sm:$0xff]  ;;  %v1833_v55 = vld [vmem:[%s2698_s1 + $0x8] sm:$0xff] }
   0xe   :  { %252 = vmatpush.msra.mxu2 %v42_v20  ;;  %331 = vmatpush.msra.mxu3 %v42_v20 }
   0xf   :  { %95 = vmatpush.msra.mxu0 %v41_v21  ;;  %v75_v23 = vld [vmem:[#allocation2] sm:$0xff]  ;;  %174 = vmatpush.msra.mxu1 %v41_v21  ;;  %p1858_p0 = scmp.le.s32.totalorder %s1857_s21, 0 }
  0x10   :  { %253 = vmatpush.msra.mxu2 %v41_v21  ;;  %332 = vmatpush.msra.mxu3 %v41_v21  ;;  %v76_v28 = vld [vmem:[#allocation3] sm:$0xff] }
  0x11   :  { %96 = vmatpush.msra.mxu0 %v40_v22  ;;  %175 = vmatpush.msra.mxu1 %v40_v22 }
  0x12   :  { %1831 = vmatmul.msk.f32.vlgmr.msra.gmra.mxu0 %vm72_vm0, %v75_v23  ;;  %254 = vmatpush.msra.mxu2 %v40_v22 }
  0x13   :  { %333 = vmatpush.msra.mxu3 %v40_v22  ;;  %409 = vmatpush.msrb.mxu0 %v43_v0 }
  0x14   :  { %488 = vmatpush.msrb.mxu1 %v43_v0  ;;  %567 = vmatpush.msrb.mxu2 %v43_v0 }
  0x15   :  { %410 = vmatpush.msrb.mxu0 %v42_v20  ;;  %646 = vmatpush.msrb.mxu3 %v43_v0 }
  0x16   :  { %489 = vmatpush.msrb.mxu1 %v42_v20  ;;  %568 = vmatpush.msrb.mxu2 %v42_v20 }
  0x17   :  { %411 = vmatpush.msrb.mxu0 %v41_v21  ;;  %647 = vmatpush.msrb.mxu3 %v42_v20 }
  0x18   :  { %490 = vmatpush.msrb.mxu1 %v41_v21  ;;  %569 = vmatpush.msrb.mxu2 %v41_v21 }
  0x19   :  { %412 = vmatpush.msrb.mxu0 %v40_v22  ;;  %648 = vmatpush.msrb.mxu3 %v41_v21 }
  0x1a   :  { %491 = vmatpush.msrb.mxu1 %v40_v22  ;;  %570 = vmatpush.msrb.mxu2 %v40_v22 }
  0x1b   :  { %649 = vmatpush.msrb.mxu3 %v40_v22 }
  0x8f   :  { %v98_v25 = vpop.f32.mrf.mxu0 }
  0x90   :  { %v101_v26 = vadd.f32 %v98_v25, %v77_v24 }
  0x92   :  { %1934 = vtanh.f32 %v101_v26  ;;  %v1832_v29 = vmul.f32 -1.442695, %v101_v26 }
  0x94   :  { %1936 = vpow2.f32 %v1832_v29 }
  0x98   :  { %v1935_v27 = vpop.eup %1934 }
  0x99   :  { %128 = vrot.lane.b32.xlu0 %v1935_v27, %s2096_s30 }
  0x9a   :  { %v1937_v30 = vpop.eup %1936 }
  0x9b   :  { %v105_v31 = vadd.f32 1.0, %v1937_v30 }
  0x9d   :  { %1938 = vrcp.f32 %v105_v31  ;;  %v117_v37 = vand.u32 2147483648, %v105_v31  ;;  %vm111_vm2 = vweird.f32 %v105_v31  ;;  %v115_v38 = vand.u32 2147483647, %v105_v31 }
  0x9f   :  { %v118_v40 = vor.u32 1.1754944e-38, %v117_v37  ;;  %vm116_vm4 = vcmp.eq.f32.partialorder %v115_v38, 8.507059e+37  ;;  %v1836_v38 = vld [vmem:[%s2698_s1 + $0x10] sm:$0xff] }
  0xa1   :  { %123 = vrot.lane.b32.xlu0 %v76_v28, %s2097_s10 }
  0xa3   :  { %v1939_v32 = vpop.eup %1938 }
  0xa4   :  { %v107_v33 = vmul.f32 %v1939_v32, %v105_v31  ;;  %vm112_vm1 = vweird.f32 %v1939_v32 }
  0xa5   :  { %vm113_vm3 = vmor %vm111_vm2, %vm112_vm1 }
  0xa6   :  { %v108_v34 = vsub.f32 1.0, %v107_v33 }
  0xa8   :  { %v109_v35 = vmul.f32 %v1939_v32, %v108_v34 }
  0xaa   :  { %v110_v36 = vadd.f32 %v1939_v32, %v109_v35 }
  0xac   :  { %v114_v39 = vsel %vm113_vm3, %v1939_v32, %v110_v36 }
  0xad   :  { %v119_v42 = vsel %vm116_vm4, %v118_v40, %v114_v39 }
 0x10b   :  { %v129_v41 = vpop.permute.xlu0 %128 }
 0x10c   :  { %v131_v43 = vmul.f32 %v129_v41, %v119_v42 }
 0x10e   :  { %133 = vrot.lane.b32.xlu1 %v131_v43, %s2097_s10 }
 0x113   :  { %v124_v44 = vpop.permute.xlu0 %123 }
 0x114   :  { %v126_v45 = vmul.f32 %v124_v44, %v119_v42 }
 0x180   :  { %v134_v46 = vpop.permute.xlu1 %133 }
 0x181   :  { %v136_v47 = vadd.f32 %v134_v46, %v126_v45 }
 0x183   :  { %1940 = vtanh.f32 %v136_v47 }
 0x189   :  { %v1941_v48 = vpop.eup %1940 }
 0x18a   :  { %139 = vrot.lane.b32.xlu1 %v1941_v48, %s2096_s30 }
 0x1fc   :  { %v140_v49 = vpop.permute.xlu1 %139 }
 0x1fd   :  { %v142_v50 = vmul.f32 %v140_v49, %v119_v42 }
 0x1ff   :  { %144 = vrot.lane.b32.xlu2 %v142_v50, %s2097_s10 }
 0x207   :  { %149 = vrot.lane.b32.xlu2 %v136_v47, %s2098_s11 }
 0x259   :  { %v145_v51 = vpop.permute.xlu2 %144 }
 0x25a   :  { %147 = vst.msk [vmem:[#allocation2] sm:$0xff] %vm72_vm0, %v145_v51 }
 0x261   :  { %v150_v52 = vpop.permute.xlu2 %149  ;;  %v153_v53 = vld [vmem:[#allocation2] sm:$0xff] }
 0x262   :  { %152 = vst.msk [vmem:[#allocation3] sm:$0xff] %vm72_vm0, %v150_v52  ;;  %1834 = vmatmul.msk.f32.vlgmr.msra.gmra.mxu1 %vm72_vm0, %v153_v53 }
 0x269   :  { %v154_v54 = vld [vmem:[#allocation3] sm:$0xff] }
 0x26a   :  { %202 = vrot.lane.b32.xlu1 %v154_v54, %s2097_s10 }
 0x2dc   :  { %v203_v27 = vpop.permute.xlu1 %202 }
 0x2df   :  { %v177_v56 = vpop.f32.mrf.mxu1 }
 0x2e0   :  { %v180_v57 = vadd.f32 %v1833_v55, %v177_v56 }
 0x2e2   :  { %1942 = vtanh.f32 %v180_v57  ;;  %v1835_v59 = vmul.f32 -1.442695, %v180_v57 }
 0x2e4   :  { %1944 = vpow2.f32 %v1835_v59 }
 0x2e8   :  { %v1943_v58 = vpop.eup %1942 }
 0x2e9   :  { %207 = vrot.lane.b32.xlu0 %v1943_v58, %s2096_s30 }
 0x2ea   :  { %v1945_v60 = vpop.eup %1944 }
 0x2eb   :  { %v184_v61 = vadd.f32 1.0, %v1945_v60 }
 0x2ed   :  { %1946 = vrcp.f32 %v184_v61  ;;  %v196_v20 = vand.u32 2147483648, %v184_v61  ;;  %vm190_vm6 = vweird.f32 %v184_v61  ;;  %v194_v21 = vand.u32 2147483647, %v184_v61 }
 0x2ef   :  { %v197_v23 = vor.u32 1.1754944e-38, %v196_v20  ;;  %vm195_vm8 = vcmp.eq.f32.partialorder %v194_v21, 8.507059e+37  ;;  %v1839_v21 = vld [vmem:[%s2698_s1 + $0x18] sm:$0xff] }
 0x2f3   :  { %v1947_v62 = vpop.eup %1946 }
 0x2f4   :  { %v186_v63 = vmul.f32 %v1947_v62, %v184_v61  ;;  %vm191_vm5 = vweird.f32 %v1947_v62 }
 0x2f5   :  { %vm192_vm7 = vmor %vm190_vm6, %vm191_vm5 }
 0x2f6   :  { %v187_v0 = vsub.f32 1.0, %v186_v63 }
 0x2f8   :  { %v188_v2 = vmul.f32 %v1947_v62, %v187_v0 }
 0x2fa   :  { %v189_v6 = vadd.f32 %v1947_v62, %v188_v2 }
 0x2fc   :  { %v193_v22 = vsel %vm192_vm7, %v1947_v62, %v189_v6 }
 0x2fd   :  { %v198_v25 = vsel %vm195_vm8, %v197_v23, %v193_v22 }
 0x2fe   :  { %v205_v28 = vmul.f32 %v203_v27, %v198_v25 }
 0x35b   :  { %v208_v24 = vpop.permute.xlu0 %207 }
 0x35c   :  { %v210_v26 = vmul.f32 %v208_v24, %v198_v25 }
 0x35e   :  { %212 = vrot.lane.b32.xlu2 %v210_v26, %s2097_s10 }
 0x3b8   :  { %v213_v29 = vpop.permute.xlu2 %212 }
 0x3b9   :  { %v215_v30 = vadd.f32 %v213_v29, %v205_v28 }
 0x3bb   :  { %1948 = vtanh.f32 %v215_v30  ;;  %228 = vrot.lane.b32.xlu2 %v215_v30, %s2098_s11 }
 0x3c1   :  { %v1949_v31 = vpop.eup %1948 }
 0x3c2   :  { %218 = vrot.lane.b32.xlu0 %v1949_v31, %s2096_s30 }
 0x415   :  { %v229_v32 = vpop.permute.xlu2 %228 }
 0x416   :  { %231 = vst.msk [vmem:[#allocation3] sm:$0xff] %vm72_vm0, %v229_v32 }
 0x41d   :  { %v233_v35 = vld [vmem:[#allocation3] sm:$0xff] }
 0x434   :  { %v219_v33 = vpop.permute.xlu0 %218 }
 0x435   :  { %v221_v34 = vmul.f32 %v219_v33, %v198_v25 }
 0x437   :  { %223 = vrot.lane.b32.xlu1 %v221_v34, %s2097_s10 }
 0x43f   :  { %281 = vrot.lane.b32.xlu1 %v233_v35, %s2097_s10 }
 0x4a9   :  { %v224_v36 = vpop.permute.xlu1 %223 }
 0x4aa   :  { %226 = vst.msk [vmem:[#allocation2] sm:$0xff] %vm72_vm0, %v224_v36 }
 0x4b1   :  { %v232_v37 = vld [vmem:[#allocation2] sm:$0xff]  ;;  %v282_v57 = vpop.permute.xlu1 %281 }
 0x4b2   :  { %1837 = vmatmul.msk.f32.vlgmr.msra.gmra.mxu2 %vm72_vm0, %v232_v37 }
 0x535   :  { %v256_v39 = vpop.f32.mrf.mxu2 }
 0x536   :  { %v259_v40 = vadd.f32 %v1836_v38, %v256_v39 }
 0x538   :  { %1950 = vtanh.f32 %v259_v40  ;;  %v1838_v42 = vmul.f32 -1.442695, %v259_v40 }
 0x53a   :  { %1952 = vpow2.f32 %v1838_v42 }
 0x53e   :  { %v1951_v41 = vpop.eup %1950 }
 0x53f   :  { %286 = vrot.lane.b32.xlu0 %v1951_v41, %s2096_s30 }
 0x540   :  { %v1953_v43 = vpop.eup %1952 }
 0x541   :  { %v263_v44 = vadd.f32 1.0, %v1953_v43 }
 0x543   :  { %1954 = vrcp.f32 %v263_v44  ;;  %v275_v50 = vand.u32 2147483648, %v263_v44  ;;  %vm269_vm10 = vweird.f32 %v263_v44  ;;  %v273_v51 = vand.u32 2147483647, %v263_v44 }
 0x545   :  { %v276_v53 = vor.u32 1.1754944e-38, %v275_v50  ;;  %vm274_vm12 = vcmp.eq.f32.partialorder %v273_v51, 8.507059e+37  ;;  %v1842_v51 = vld [vmem:[%s2698_s1 + $0x20] sm:$0xff] }
 0x549   :  { %v1955_v45 = vpop.eup %1954 }
 0x54a   :  { %v265_v46 = vmul.f32 %v1955_v45, %v263_v44  ;;  %vm270_vm9 = vweird.f32 %v1955_v45 }
 0x54b   :  { %vm271_vm11 = vmor %vm269_vm10, %vm270_vm9 }
 0x54c   :  { %v266_v47 = vsub.f32 1.0, %v265_v46 }
 0x54e   :  { %v267_v48 = vmul.f32 %v1955_v45, %v266_v47 }
 0x550   :  { %v268_v49 = vadd.f32 %v1955_v45, %v267_v48 }
 0x552   :  { %v272_v52 = vsel %vm271_vm11, %v1955_v45, %v268_v49 }
 0x553   :  { %v277_v55 = vsel %vm274_vm12, %v276_v53, %v272_v52 }
 0x554   :  { %v284_v58 = vmul.f32 %v282_v57, %v277_v55 }
 0x5b1   :  { %v287_v54 = vpop.permute.xlu0 %286 }
 0x5b2   :  { %v289_v56 = vmul.f32 %v287_v54, %v277_v55 }
 0x5b4   :  { %291 = vrot.lane.b32.xlu2 %v289_v56, %s2097_s10 }
 0x60e   :  { %v292_v59 = vpop.permute.xlu2 %291 }
 0x60f   :  { %v294_v60 = vadd.f32 %v292_v59, %v284_v58 }
 0x611   :  { %1956 = vtanh.f32 %v294_v60  ;;  %307 = vrot.lane.b32.xlu2 %v294_v60, %s2098_s11 }
 0x617   :  { %v1957_v61 = vpop.eup %1956 }
 0x618   :  { %297 = vrot.lane.b32.xlu0 %v1957_v61, %s2096_s30 }
 0x66b   :  { %v308_v62 = vpop.permute.xlu2 %307 }
 0x66c   :  { %310 = vst.msk [vmem:[#allocation3] sm:$0xff] %vm72_vm0, %v308_v62 }
 0x673   :  { %v312_v2 = vld [vmem:[#allocation3] sm:$0xff] }
 0x68a   :  { %v298_v63 = vpop.permute.xlu0 %297 }
 0x68b   :  { %v300_v0 = vmul.f32 %v298_v63, %v277_v55 }
 0x68d   :  { %302 = vrot.lane.b32.xlu1 %v300_v0, %s2097_s10 }
 0x695   :  { %360 = vrot.lane.b32.xlu1 %v312_v2, %s2097_s10 }
 0x6ff   :  { %v303_v6 = vpop.permute.xlu1 %302 }
 0x700   :  { %305 = vst.msk [vmem:[#allocation2] sm:$0xff] %vm72_vm0, %v303_v6 }
 0x707   :  { %v311_v20 = vld [vmem:[#allocation2] sm:$0xff]  ;;  %v361_v40 = vpop.permute.xlu1 %360 }
 0x708   :  { %1840 = vmatmul.msk.f32.vlgmr.msra.gmra.mxu3 %vm72_vm0, %v311_v20 }
 0x78b   :  { %v335_v22 = vpop.f32.mrf.mxu3 }
 0x78c   :  { %v338_v23 = vadd.f32 %v1839_v21, %v335_v22 }
 0x78e   :  { %1958 = vtanh.f32 %v338_v23  ;;  %v1841_v25 = vmul.f32 -1.442695, %v338_v23 }
 0x790   :  { %1960 = vpow2.f32 %v1841_v25 }
 0x794   :  { %v1959_v24 = vpop.eup %1958 }
 0x795   :  { %365 = vrot.lane.b32.xlu0 %v1959_v24, %s2096_s30 }
 0x796   :  { %v1961_v26 = vpop.eup %1960 }
 0x797   :  { %v342_v27 = vadd.f32 1.0, %v1961_v26 }
 0x799   :  { %1962 = vrcp.f32 %v342_v27  ;;  %v354_v33 = vand.u32 2147483648, %v342_v27  ;;  %vm348_vm14 = vweird.f32 %v342_v27  ;;  %v352_v34 = vand.u32 2147483647, %v342_v27 }
 0x79b   :  { %v355_v36 = vor.u32 1.1754944e-38, %v354_v33  ;;  %vm353_vm1 = vcmp.eq.f32.partialorder %v352_v34, 8.507059e+37  ;;  %v1845_v34 = vld [vmem:[%s2698_s1 + $0x28] sm:$0xff] }
 0x79f   :  { %v1963_v28 = vpop.eup %1962 }
 0x7a0   :  { %v344_v29 = vmul.f32 %v1963_v28, %v342_v27  ;;  %vm349_vm13 = vweird.f32 %v1963_v28 }
 0x7a1   :  { %vm350_vm15 = vmor %vm348_vm14, %vm349_vm13 }
 0x7a2   :  { %v345_v30 = vsub.f32 1.0, %v344_v29 }
 0x7a4   :  { %v346_v31 = vmul.f32 %v1963_v28, %v345_v30 }
 0x7a6   :  { %v347_v32 = vadd.f32 %v1963_v28, %v346_v31 }
 0x7a8   :  { %v351_v35 = vsel %vm350_vm15, %v1963_v28, %v347_v32 }
 0x7a9   :  { %v356_v38 = vsel %vm353_vm1, %v355_v36, %v351_v35 }
 0x7aa   :  { %v363_v41 = vmul.f32 %v361_v40, %v356_v38 }
 0x807   :  { %v366_v37 = vpop.permute.xlu0 %365 }
 0x808   :  { %v368_v39 = vmul.f32 %v366_v37, %v356_v38 }
 0x80a   :  { %370 = vrot.lane.b32.xlu2 %v368_v39, %s2097_s10 }
 0x864   :  { %v371_v42 = vpop.permute.xlu2 %370 }
 0x865   :  { %v373_v43 = vadd.f32 %v371_v42, %v363_v41 }
 0x867   :  { %1964 = vtanh.f32 %v373_v43  ;;  %386 = vrot.lane.b32.xlu2 %v373_v43, %s2098_s11 }
 0x86d   :  { %v1965_v44 = vpop.eup %1964 }
 0x86e   :  { %376 = vrot.lane.b32.xlu0 %v1965_v44, %s2096_s30 }
 0x8c1   :  { %v387_v45 = vpop.permute.xlu2 %386 }
 0x8c2   :  { %389 = vst.msk [vmem:[#allocation3] sm:$0xff] %vm72_vm0, %v387_v45 }
 0x8c9   :  { %v391_v48 = vld [vmem:[#allocation3] sm:$0xff] }
 0x8e0   :  { %v377_v46 = vpop.permute.xlu0 %376 }
 0x8e1   :  { %v379_v47 = vmul.f32 %v377_v46, %v356_v38 }
 0x8e3   :  { %381 = vrot.lane.b32.xlu1 %v379_v47, %s2097_s10 }
 0x8eb   :  { %439 = vrot.lane.b32.xlu1 %v391_v48, %s2097_s10 }
 0x955   :  { %v382_v49 = vpop.permute.xlu1 %381 }
 0x956   :  { %384 = vst.msk [vmem:[#allocation2] sm:$0xff] %vm72_vm0, %v382_v49 }
 0x95d   :  { %v390_v50 = vld [vmem:[#allocation2] sm:$0xff]  ;;  %v440_v23 = vpop.permute.xlu1 %439 }
 0x95e   :  { %1843 = vmatmul.msk.f32.vlgmr.msrb.gmra.mxu0 %vm72_vm0, %v390_v50 }
 0x9db   :  { %v414_v52 = vpop.f32.mrf.mxu0 }
 0x9dc   :  { %v417_v53 = vadd.f32 %v1842_v51, %v414_v52 }
 0x9de   :  { %1966 = vtanh.f32 %v417_v53  ;;  %v1844_v55 = vmul.f32 -1.442695, %v417_v53 }
 0x9e0   :  { %1968 = vpow2.f32 %v1844_v55 }
 0x9e4   :  { %v1967_v54 = vpop.eup %1966 }
 0x9e5   :  { %444 = vrot.lane.b32.xlu0 %v1967_v54, %s2096_s30 }
 0x9e6   :  { %v1969_v56 = vpop.eup %1968 }
 0x9e7   :  { %v421_v57 = vadd.f32 1.0, %v1969_v56 }
 0x9e9   :  { %1970 = vrcp.f32 %v421_v57  ;;  %v433_v63 = vand.u32 2147483648, %v421_v57  ;;  %vm427_vm3 = vweird.f32 %v421_v57  ;;  %v431_v0 = vand.u32 2147483647, %v421_v57 }
 0x9eb   :  { %v434_v6 = vor.u32 1.1754944e-38, %v433_v63  ;;  %vm432_vm5 = vcmp.eq.f32.partialorder %v431_v0, 8.507059e+37  ;;  %v1848_v0 = vld [vmem:[%s2698_s1 + $0x30] sm:$0xff] }
 0x9ef   :  { %v1971_v58 = vpop.eup %1970 }
 0x9f0   :  { %v423_v59 = vmul.f32 %v1971_v58, %v421_v57  ;;  %vm428_vm2 = vweird.f32 %v1971_v58 }
 0x9f1   :  { %vm429_vm4 = vmor %vm427_vm3, %vm428_vm2 }
 0x9f2   :  { %v424_v60 = vsub.f32 1.0, %v423_v59 }
 0x9f4   :  { %v425_v61 = vmul.f32 %v1971_v58, %v424_v60 }
 0x9f6   :  { %v426_v62 = vadd.f32 %v1971_v58, %v425_v61 }
 0x9f8   :  { %v430_v2 = vsel %vm429_vm4, %v1971_v58, %v426_v62 }
 0x9f9   :  { %v435_v21 = vsel %vm432_vm5, %v434_v6, %v430_v2 }
 0x9fa   :  { %v442_v24 = vmul.f32 %v440_v23, %v435_v21 }
 0xa57   :  { %v445_v20 = vpop.permute.xlu0 %444 }
 0xa58   :  { %v447_v22 = vmul.f32 %v445_v20, %v435_v21 }
 0xa5a   :  { %449 = vrot.lane.b32.xlu2 %v447_v22, %s2097_s10 }
 0xab4   :  { %v450_v25 = vpop.permute.xlu2 %449 }
 0xab5   :  { %v452_v26 = vadd.f32 %v450_v25, %v442_v24 }
 0xab7   :  { %1972 = vtanh.f32 %v452_v26  ;;  %465 = vrot.lane.b32.xlu2 %v452_v26, %s2098_s11 }
 0xabd   :  { %v1973_v27 = vpop.eup %1972 }
 0xabe   :  { %455 = vrot.lane.b32.xlu0 %v1973_v27, %s2096_s30 }
 0xb11   :  { %v466_v28 = vpop.permute.xlu2 %465 }
 0xb12   :  { %468 = vst.msk [vmem:[#allocation3] sm:$0xff] %vm72_vm0, %v466_v28 }
 0xb19   :  { %v470_v31 = vld [vmem:[#allocation3] sm:$0xff] }
 0xb30   :  { %v456_v29 = vpop.permute.xlu0 %455 }
 0xb31   :  { %v458_v30 = vmul.f32 %v456_v29, %v435_v21 }
 0xb33   :  { %460 = vrot.lane.b32.xlu1 %v458_v30, %s2097_s10 }
 0xb3b   :  { %518 = vrot.lane.b32.xlu1 %v470_v31, %s2097_s10 }
 0xba5   :  { %v461_v32 = vpop.permute.xlu1 %460 }
 0xba6   :  { %463 = vst.msk [vmem:[#allocation2] sm:$0xff] %vm72_vm0, %v461_v32 }
 0xbad   :  { %v469_v33 = vld [vmem:[#allocation2] sm:$0xff]  ;;  %v519_v53 = vpop.permute.xlu1 %518 }
 0xbae   :  { %1846 = vmatmul.msk.f32.vlgmr.msrb.gmra.mxu1 %vm72_vm0, %v469_v33 }
 0xc2b   :  { %v493_v35 = vpop.f32.mrf.mxu1 }
 0xc2c   :  { %v496_v36 = vadd.f32 %v1845_v34, %v493_v35 }
 0xc2e   :  { %1974 = vtanh.f32 %v496_v36  ;;  %v1847_v38 = vmul.f32 -1.442695, %v496_v36 }
 0xc30   :  { %1976 = vpow2.f32 %v1847_v38 }
 0xc34   :  { %v1975_v37 = vpop.eup %1974 }
 0xc35   :  { %523 = vrot.lane.b32.xlu0 %v1975_v37, %s2096_s30 }
 0xc36   :  { %v1977_v39 = vpop.eup %1976 }
 0xc37   :  { %v500_v40 = vadd.f32 1.0, %v1977_v39 }
 0xc39   :  { %1978 = vrcp.f32 %v500_v40  ;;  %v512_v46 = vand.u32 2147483648, %v500_v40  ;;  %vm506_vm7 = vweird.f32 %v500_v40  ;;  %v510_v47 = vand.u32 2147483647, %v500_v40 }
 0xc3b   :  { %v513_v49 = vor.u32 1.1754944e-38, %v512_v46  ;;  %vm511_vm9 = vcmp.eq.f32.partialorder %v510_v47, 8.507059e+37  ;;  %v1851_v47 = vld [vmem:[%s2698_s1 + $0x38] sm:$0xff] }
 0xc3f   :  { %v1979_v41 = vpop.eup %1978 }
 0xc40   :  { %v502_v42 = vmul.f32 %v1979_v41, %v500_v40  ;;  %vm507_vm6 = vweird.f32 %v1979_v41 }
 0xc41   :  { %vm508_vm8 = vmor %vm506_vm7, %vm507_vm6 }
 0xc42   :  { %v503_v43 = vsub.f32 1.0, %v502_v42 }
 0xc44   :  { %v504_v44 = vmul.f32 %v1979_v41, %v503_v43 }
 0xc46   :  { %v505_v45 = vadd.f32 %v1979_v41, %v504_v44 }
 0xc48   :  { %v509_v48 = vsel %vm508_vm8, %v1979_v41, %v505_v45 }
 0xc49   :  { %v514_v51 = vsel %vm511_vm9, %v513_v49, %v509_v48 }
 0xc4a   :  { %v521_v54 = vmul.f32 %v519_v53, %v514_v51 }
 0xca7   :  { %v524_v50 = vpop.permute.xlu0 %523 }
 0xca8   :  { %v526_v52 = vmul.f32 %v524_v50, %v514_v51 }
 0xcaa   :  { %528 = vrot.lane.b32.xlu2 %v526_v52, %s2097_s10 }
 0xd04   :  { %v529_v55 = vpop.permute.xlu2 %528 }
 0xd05   :  { %v531_v56 = vadd.f32 %v529_v55, %v521_v54 }
 0xd07   :  { %1980 = vtanh.f32 %v531_v56  ;;  %544 = vrot.lane.b32.xlu2 %v531_v56, %s2098_s11 }
 0xd0d   :  { %v1981_v57 = vpop.eup %1980 }
 0xd0e   :  { %534 = vrot.lane.b32.xlu0 %v1981_v57, %s2096_s30 }
 0xd61   :  { %v545_v58 = vpop.permute.xlu2 %544 }
 0xd62   :  { %547 = vst.msk [vmem:[#allocation3] sm:$0xff] %vm72_vm0, %v545_v58 }
 0xd69   :  { %v549_v61 = vld [vmem:[#allocation3] sm:$0xff] }
 0xd80   :  { %v535_v59 = vpop.permute.xlu0 %534 }
 0xd81   :  { %v537_v60 = vmul.f32 %v535_v59, %v514_v51 }
 0xd83   :  { %539 = vrot.lane.b32.xlu1 %v537_v60, %s2097_s10 }
 0xd8b   :  { %597 = vrot.lane.b32.xlu1 %v549_v61, %s2097_s10 }
 0xdf5   :  { %v540_v62 = vpop.permute.xlu1 %539 }
 0xdf6   :  { %542 = vst.msk [vmem:[#allocation2] sm:$0xff] %vm72_vm0, %v540_v62 }
 0xdfd   :  { %v548_v63 = vld [vmem:[#allocation2] sm:$0xff]  ;;  %v598_v36 = vpop.permute.xlu1 %597 }
 0xdfe   :  { %1849 = vmatmul.msk.f32.vlgmr.msrb.gmra.mxu2 %vm72_vm0, %v548_v63 }
 0xe81   :  { %v572_v2 = vpop.f32.mrf.mxu2 }
 0xe82   :  { %v575_v6 = vadd.f32 %v1848_v0, %v572_v2 }
 0xe84   :  { %1982 = vtanh.f32 %v575_v6  ;;  %v1850_v21 = vmul.f32 -1.442695, %v575_v6 }
 0xe86   :  { %1984 = vpow2.f32 %v1850_v21 }
 0xe8a   :  { %v1983_v20 = vpop.eup %1982 }
 0xe8b   :  { %602 = vrot.lane.b32.xlu0 %v1983_v20, %s2096_s30 }
 0xe8c   :  { %v1985_v22 = vpop.eup %1984 }
 0xe8d   :  { %v579_v23 = vadd.f32 1.0, %v1985_v22 }
 0xe8f   :  { %1986 = vrcp.f32 %v579_v23  ;;  %v591_v29 = vand.u32 2147483648, %v579_v23  ;;  %vm585_vm11 = vweird.f32 %v579_v23  ;;  %v589_v30 = vand.u32 2147483647, %v579_v23 }
 0xe91   :  { %v592_v32 = vor.u32 1.1754944e-38, %v591_v29  ;;  %vm590_vm13 = vcmp.eq.f32.partialorder %v589_v30, 8.507059e+37  ;;  %v2362_v29 = vld [vmem:[%s2701_s4 + $0x10] sm:$0xff]  ;;  %v2368_v30 = vld [vmem:[%s2701_s4 + $0x8] sm:$0xff] }
 0xe95   :  { %v1987_v24 = vpop.eup %1986 }
 0xe96   :  { %v581_v25 = vmul.f32 %v1987_v24, %v579_v23  ;;  %vm586_vm10 = vweird.f32 %v1987_v24 }
 0xe97   :  { %vm587_vm12 = vmor %vm585_vm11, %vm586_vm10 }
 0xe98   :  { %v582_v26 = vsub.f32 1.0, %v581_v25 }
 0xe9a   :  { %v583_v27 = vmul.f32 %v1987_v24, %v582_v26 }
 0xe9c   :  { %v584_v28 = vadd.f32 %v1987_v24, %v583_v27 }
 0xe9e   :  { %v588_v31 = vsel %vm587_vm12, %v1987_v24, %v584_v28  ;;  %v2357_v28 = vld [vmem:[%s2701_s4 + $0x18] sm:$0xff] }
 0xe9f   :  { %v593_v34 = vsel %vm590_vm13, %v592_v32, %v588_v31  ;;  %730 = vmatpush.msra.mxu0 %v2357_v28  ;;  %v2374_v31 = vld [vmem:[%s2701_s4] sm:$0xff] }
 0xea0   :  { %v600_v37 = vmul.f32 %v598_v36, %v593_v34  ;;  %v706_v32 = vld [vmem:[%s2700_s3] sm:$0xff] }
 0xea1   :  { %731 = vmatpush.msra.mxu0 %v2362_v29  ;;  %707 = vst [vmem:[#allocation4] sm:$0xff] %v706_v32 }
 0xea3   :  { %732 = vmatpush.msra.mxu0 %v2368_v30 }
 0xea5   :  { %733 = vmatpush.msra.mxu0 %v2374_v31 }
 0xefd   :  { %v603_v33 = vpop.permute.xlu0 %602 }
 0xefe   :  { %v605_v35 = vmul.f32 %v603_v33, %v593_v34 }
 0xf00   :  { %607 = vrot.lane.b32.xlu2 %v605_v35, %s2097_s10  ;;  %v2386_v35 = vld [vmem:[%s2702_s5] ss:$0 sm:$0xff] }
 0xf01   :  { %v714_v36 = vadd.f32 %v2386_v35, %v706_v32 }
 0xf5a   :  { %v608_v38 = vpop.permute.xlu2 %607 }
 0xf5b   :  { %v610_v39 = vadd.f32 %v608_v38, %v600_v37 }
 0xf5d   :  { %1988 = vtanh.f32 %v610_v39  ;;  %623 = vrot.lane.b32.xlu2 %v610_v39, %s2098_s11 }
 0xf63   :  { %v1989_v40 = vpop.eup %1988 }
 0xf64   :  { %613 = vrot.lane.b32.xlu0 %v1989_v40, %s2096_s30 }
 0xfb7   :  { %v624_v41 = vpop.permute.xlu2 %623 }
 0xfb8   :  { %626 = vst.msk [vmem:[#allocation3] sm:$0xff] %vm72_vm0, %v624_v41 }
 0xfbf   :  { %v628_v44 = vld [vmem:[#allocation3] sm:$0xff] }
 0xfd6   :  { %v614_v42 = vpop.permute.xlu0 %613 }
 0xfd7   :  { %v616_v43 = vmul.f32 %v614_v42, %v593_v34 }
 0xfd9   :  { %618 = vrot.lane.b32.xlu1 %v616_v43, %s2097_s10 }
 0xfe1   :  { %676 = vrot.lane.b32.xlu1 %v628_v44, %s2097_s10 }
0x104b   :  { %v619_v45 = vpop.permute.xlu1 %618 }
0x104c   :  { %621 = vst.msk [vmem:[#allocation2] sm:$0xff] %vm72_vm0, %v619_v45 }
0x1053   :  { %v627_v46 = vld [vmem:[#allocation2] sm:$0xff]  ;;  %v677_v6 = vpop.permute.xlu1 %676 }
0x1054   :  { %1852 = vmatmul.msk.f32.vlgmr.msrb.gmra.mxu3 %vm72_vm0, %v627_v46 }
0x10d7   :  { %v651_v48 = vpop.f32.mrf.mxu3 }
0x10d8   :  { %v654_v49 = vadd.f32 %v1851_v47, %v651_v48 }
0x10da   :  { %1990 = vtanh.f32 %v654_v49  ;;  %v1853_v51 = vmul.f32 -1.442695, %v654_v49 }
0x10dc   :  { %1992 = vpow2.f32 %v1853_v51 }
0x10e0   :  { %v1991_v50 = vpop.eup %1990 }
0x10e1   :  { %681 = vrot.lane.b32.xlu0 %v1991_v50, %s2096_s30 }
0x10e2   :  { %v1993_v52 = vpop.eup %1992 }
0x10e3   :  { %v658_v53 = vadd.f32 1.0, %v1993_v52 }
0x10e5   :  { %1994 = vrcp.f32 %v658_v53  ;;  %v670_v59 = vand.u32 2147483648, %v658_v53  ;;  %vm664_vm15 = vweird.f32 %v658_v53  ;;  %v668_v60 = vand.u32 2147483647, %v658_v53 }
0x10e7   :  { %v671_v62 = vor.u32 1.1754944e-38, %v670_v59  ;;  %vm669_vm2 = vcmp.eq.f32.partialorder %v668_v60, 8.507059e+37 }
0x10eb   :  { %v1995_v54 = vpop.eup %1994 }
0x10ec   :  { %v660_v55 = vmul.f32 %v1995_v54, %v658_v53  ;;  %vm665_vm14 = vweird.f32 %v1995_v54 }
0x10ed   :  { %vm666_vm1 = vmor %vm664_vm15, %vm665_vm14 }
0x10ee   :  { %v661_v56 = vsub.f32 1.0, %v660_v55 }
0x10f0   :  { %v662_v57 = vmul.f32 %v1995_v54, %v661_v56 }
0x10f2   :  { %v663_v58 = vadd.f32 %v1995_v54, %v662_v57 }
0x10f4   :  { %v667_v61 = vsel %vm666_vm1, %v1995_v54, %v663_v58 }
0x10f5   :  { %v672_v0 = vsel %vm669_vm2, %v671_v62, %v667_v61  ;;  %v2397_v61 = vld [vmem:[%s2704_s7 + $0x18] sm:$0xff]  ;;  %v2402_v62 = vld [vmem:[%s2704_s7 + $0x10] sm:$0xff] }
0x10f6   :  { %v679_v20 = vmul.f32 %v677_v6, %v672_v0  ;;  %807 = vmatpush.msra.mxu1 %v2397_v61 }
0x10f8   :  { %808 = vmatpush.msra.mxu1 %v2402_v62 }
0x1153   :  { %v682_v63 = vpop.permute.xlu0 %681 }
0x1154   :  { %v684_v2 = vmul.f32 %v682_v63, %v672_v0  ;;  %v2408_v63 = vld [vmem:[%s2704_s7 + $0x8] sm:$0xff] }
0x1155   :  { %809 = vmatpush.msra.mxu1 %v2408_v63 }
0x1156   :  { %686 = vrot.lane.b32.xlu2 %v684_v2, %s2097_s10 }
0x11b0   :  { %v687_v21 = vpop.permute.xlu2 %686 }
0x11b1   :  { %v689_v22 = vadd.f32 %v687_v21, %v679_v20  ;;  %v2424_v21 = vld [vmem:[%s2705_s8] ss:$0 sm:$0xff] }
0x11b3   :  { %1996 = vtanh.f32 %v689_v22  ;;  %702 = vrot.lane.b32.xlu2 %v689_v22, %s2098_s11 }
0x11b9   :  { %v1997_v23 = vpop.eup %1996 }
0x11ba   :  { %692 = vrot.lane.b32.xlu0 %v1997_v23, %s2096_s30 }
0x120d   :  { %v703_v24 = vpop.permute.xlu2 %702 }
0x120e   :  { %705 = vst.msk [vmem:[#allocation3] sm:$0xff] %vm72_vm0, %v703_v24 }
0x1215   :  { %v709_v27 = vld [vmem:[#allocation3] sm:$0xff] }
0x122c   :  { %v693_v25 = vpop.permute.xlu0 %692 }
0x122d   :  { %v695_v26 = vmul.f32 %v693_v25, %v672_v0  ;;  %v2414_v0 = vld [vmem:[%s2704_s7] sm:$0xff] }
0x122e   :  { %810 = vmatpush.msra.mxu1 %v2414_v0 }
0x122f   :  { %697 = vrot.lane.b32.xlu1 %v695_v26, %s2097_s10 }
0x1237   :  { %760 = vrot.lane.b32.xlu1 %v709_v27, %s2097_s10 }
0x12a1   :  { %v698_v33 = vpop.permute.xlu1 %697 }
0x12a2   :  { %700 = vst.msk [vmem:[#allocation2] sm:$0xff] %vm72_vm0, %v698_v33 }
0x12a9   :  { %v708_v34 = vld [vmem:[#allocation2] sm:$0xff]  ;;  %v761_v55 = vpop.permute.xlu1 %760 }
0x12aa   :  { %1854 = vmatmul.msk.f32.vlgmr.msra.gmra.mxu0 %vm72_vm0, %v708_v34 }
0x1327   :  { %v735_v37 = vpop.f32.mrf.mxu0 }
0x1328   :  { %v738_v38 = vadd.f32 %v735_v37, %v714_v36 }
0x132a   :  { %1998 = vtanh.f32 %v738_v38  ;;  %v1855_v40 = vmul.f32 -1.442695, %v738_v38 }
0x132c   :  { %2000 = vpow2.f32 %v1855_v40 }
0x1330   :  { %v1999_v39 = vpop.eup %1998 }
0x1331   :  { %765 = vrot.lane.b32.xlu0 %v1999_v39, %s2096_s30 }
0x1332   :  { %v2001_v41 = vpop.eup %2000 }
0x1333   :  { %v742_v42 = vadd.f32 1.0, %v2001_v41 }
0x1335   :  { %2002 = vrcp.f32 %v742_v42  ;;  %v754_v48 = vand.u32 2147483648, %v742_v42  ;;  %vm748_vm4 = vweird.f32 %v742_v42  ;;  %v752_v49 = vand.u32 2147483647, %v742_v42 }
0x1337   :  { %v755_v51 = vor.u32 1.1754944e-38, %v754_v48  ;;  %vm753_vm6 = vcmp.eq.f32.partialorder %v752_v49, 8.507059e+37 }
0x133b   :  { %v2003_v43 = vpop.eup %2002 }
0x133c   :  { %v744_v44 = vmul.f32 %v2003_v43, %v742_v42  ;;  %vm749_vm3 = vweird.f32 %v2003_v43 }
0x133d   :  { %vm750_vm5 = vmor %vm748_vm4, %vm749_vm3 }
0x133e   :  { %v745_v45 = vsub.f32 1.0, %v744_v44 }
0x1340   :  { %v746_v46 = vmul.f32 %v2003_v43, %v745_v45 }
0x1342   :  { %v747_v47 = vadd.f32 %v2003_v43, %v746_v46 }
0x1344   :  { %v751_v50 = vsel %vm750_vm5, %v2003_v43, %v747_v47 }
0x1345   :  { %v756_v53 = vsel %vm753_vm6, %v755_v51, %v751_v50 }
0x1346   :  { %v763_v56 = vmul.f32 %v761_v55, %v756_v53 }
0x13a3   :  { %v766_v52 = vpop.permute.xlu0 %765 }
0x13a4   :  { %v768_v54 = vmul.f32 %v766_v52, %v756_v53 }
0x13a6   :  { %770 = vrot.lane.b32.xlu2 %v768_v54, %s2097_s10 }
0x1400   :  { %v771_v57 = vpop.permute.xlu2 %770 }
0x1401   :  { %v773_v58 = vadd.f32 %v771_v57, %v763_v56 }
0x1403   :  { %2004 = vtanh.f32 %v773_v58  ;;  %786 = vrot.lane.b32.xlu2 %v773_v58, %s2098_s11 }
0x1409   :  { %v2005_v59 = vpop.eup %2004 }
0x140a   :  { %776 = vrot.lane.b32.xlu0 %v2005_v59, %s2096_s30 }
0x145d   :  { %v787_v60 = vpop.permute.xlu2 %786 }
0x145e   :  { %789 = vst.msk [vmem:[#allocation3] sm:$0xff] %vm72_vm0, %v787_v60 }
0x147c   :  { %v777_v2 = vpop.permute.xlu0 %776 }
0x147d   :  { %v779_v6 = vmul.f32 %v777_v2, %v756_v53 }
0x147f   :  { %781 = vrot.lane.b32.xlu1 %v779_v6, %s2097_s10 }
0x14f1   :  { %v782_v20 = vpop.permute.xlu1 %781 }
0x14f2   :  { %784 = vst.msk [vmem:[#allocation2] sm:$0xff] %vm72_vm0, %v782_v20  ;;  %1856 = vmatmul.msk.f32.vlgmr.msra.gmra.mxu1 %vm72_vm0, %v782_v20 }
0x156e   :  { %821 = sbr.rel (%p1858_p0) target bundleno = 5493 (0x1575), region = 37 }
0x156f   :  { %v812_v22 = vpop.f32.mrf.mxu1 }
0x1570   :  { %v813_v23 = vadd.f32 %v2424_v21, %v812_v22 }
0x1572   :  { %816 = vst [vmem:[#allocation7 + $0x8] sm:$0xff] %v813_v23 }
0x1573   :  { %v1859_v24 = vld [vmem:[%s2700_s3 + $0x8] sm:$0xff] }
0x1574   :  { %824 = vst [vmem:[#allocation4] sm:$0xff] %v1859_v24 }
0x1575 PF:  { %p1860_p1 = scmp.gt.s32.totalorder %s1857_s21, 0 }
0x1577   :  { %828 = sbr.rel (%p1860_p1) target bundleno = 5988 (0x1764), region = 41 }
0x157c   :  { %829 = vmax.xlane.f32.xlu0 %v813_v23  ;;  %850 = vmatpush.msra.mxu0 %v2247_v19  ;;  %v2099_v43 = vmov 1.0  }
0x157e   :  { %851 = vmatpush.msra.mxu0 %v2242_v18 }
0x1580   :  { %852 = vmatpush.msra.mxu0 %v2237_v17 }
0x1582   :  { %853 = vmatpush.msra.mxu0 %v2232_v16 }
0x1584   :  { %854 = vmatpush.msra.mxu0 %v2227_v15 }
0x1586   :  { %855 = vmatpush.msra.mxu0 %v2222_v14 }
0x1588   :  { %856 = vmatpush.msra.mxu0 %v2216_v13 }
0x158a   :  { %857 = vmatpush.msra.mxu0 %v2211_v12 }
0x158c   :  { %858 = vmatpush.msra.mxu0 %v2206_v11 }
0x158e   :  { %859 = vmatpush.msra.mxu0 %v2198_v9 }
0x1590   :  { %860 = vmatpush.msra.mxu0 %v2193_v8 }
0x1592   :  { %861 = vmatpush.msra.mxu0 %v2188_v7 }
0x1594   :  { %862 = vmatpush.msra.mxu0 %v2183_v5 }
0x1596   :  { %863 = vmatpush.msra.mxu0 %v2178_v4 }
0x1598   :  { %864 = vmatpush.msra.mxu0 %v2173_v3 }
0x159a   :  { %865 = vmatpush.msra.mxu0 %v2168_v1 }
0x15ef   :  { %v830_v25 = vpop.xlane.xlu0 %829 }
0x15f0   :  { %vm831_vm7 = vcmp.eq.f32.partialorder %v813_v23, %v830_v25 }
0x15f1   :  { %v832_v26 = vsel %vm831_vm7, %v2200_v10, 128 }
0x15f2   :  { %v834_v27 = vshra.s32 %v832_v26, 16  ;;  %v833_v33 = vand.u32 65535, %v832_v26 }
0x15f4   :  { %v836_v32 = vcvt.s32.f32 %v834_v27  ;;  %v835_v36 = vcvt.s32.f32 %v833_v33 }
0x15f6   :  { %837 = vmin.xlane.f32.xlu0 %v836_v32 }
0x1669   :  { %v838_v34 = vpop.xlane.xlu0 %837 }
0x166a   :  { %vm839_vm8 = vcmp.eq.f32.partialorder %v836_v32, %v838_v34  ;;  %v844_v38 = vcvt.f32.s32 %v838_v34 }
0x166b   :  { %v840_v37 = vsel %vm839_vm8, %v835_v36, inf }
0x166c   :  { %841 = vmin.xlane.f32.xlu1 %v840_v37  ;;  %v845_v40 = vshll.u32 %v844_v38, 16 }
0x16df   :  { %v842_v39 = vpop.xlane.xlu1 %841 }
0x16e0   :  { %v843_v41 = vcvt.f32.s32 %v842_v39 }
0x16e2   :  { %v846_v42 = vadd.s32 %v845_v40, %v843_v41 }
0x16e4   :  { %vm847_vm9 = vcmp.eq.s32.totalorder %v2200_v10, %v846_v42 }
0x16e5   :  { %1862 = vmatmul.msk.f32.vlgmr.msra.gmra.mxu0 %vm847_vm9, %v2099_v43 }
0x1762   :  { %v867_v44 = vpop.f32.mrf.mxu0 }
0x1763   :  { %870 = vst [vmem:[#allocation4] sm:$0xff] %v867_v44 }
0x1764 PF:  { %890 = vmatpush.msra.mxu0 %v2357_v28  ;;  %964 = vmatpush.msra.mxu1 %v2397_v61  ;;  %v871_v45 = vld [vmem:[#allocation2] sm:$0xff]  ;;  %v872_v51 = vld [vmem:[#allocation3] sm:$0xff]  ;;  %s1866_s8 = sld [smem:[#allocation6 + $0x2]] }
0x1766   :  { %891 = vmatpush.msra.mxu0 %v2362_v29  ;;  %965 = vmatpush.msra.mxu1 %v2402_v62 }
0x1768   :  { %892 = vmatpush.msra.mxu0 %v2368_v30  ;;  %966 = vmatpush.msra.mxu1 %v2408_v63 }
0x176a   :  { %893 = vmatpush.msra.mxu0 %v2374_v31  ;;  %967 = vmatpush.msra.mxu1 %v2414_v0  ;;  %v873_v46 = vld [vmem:[#allocation4] sm:$0xff]  ;;  %p1867_p2 = scmp.le.s32.totalorder %s1866_s8, 0 }
0x176b   :  { %1863 = vmatmul.msk.f32.vlgmr.msra.gmra.mxu0 %vm72_vm0, %v871_v45  ;;  %v874_v47 = vadd.f32 %v2386_v35, %v873_v46 }
0x17e8   :  { %v895_v48 = vpop.f32.mrf.mxu0 }
0x17e9   :  { %v898_v49 = vadd.f32 %v895_v48, %v874_v47 }
0x17eb   :  { %2006 = vtanh.f32 %v898_v49  ;;  %v1864_v52 = vmul.f32 -1.442695, %v898_v49 }
0x17ed   :  { %2008 = vpow2.f32 %v1864_v52 }
0x17f1   :  { %v2007_v50 = vpop.eup %2006 }
0x17f2   :  { %925 = vrot.lane.b32.xlu0 %v2007_v50, %s2096_s30 }
0x17f3   :  { %v2009_v53 = vpop.eup %2008 }
0x17f4   :  { %v902_v54 = vadd.f32 1.0, %v2009_v53 }
0x17f6   :  { %2010 = vrcp.f32 %v902_v54  ;;  %v914_v60 = vand.u32 2147483648, %v902_v54  ;;  %vm908_vm11 = vweird.f32 %v902_v54  ;;  %v912_v2 = vand.u32 2147483647, %v902_v54 }
0x17f8   :  { %v915_v20 = vor.u32 1.1754944e-38, %v914_v60  ;;  %vm913_vm13 = vcmp.eq.f32.partialorder %v912_v2, 8.507059e+37 }
0x17fa   :  { %920 = vrot.lane.b32.xlu0 %v872_v51, %s2097_s10 }
0x17fc   :  { %v2011_v55 = vpop.eup %2010 }
0x17fd   :  { %v904_v56 = vmul.f32 %v2011_v55, %v902_v54  ;;  %vm909_vm10 = vweird.f32 %v2011_v55 }
0x17fe   :  { %vm910_vm12 = vmor %vm908_vm11, %vm909_vm10 }
0x17ff   :  { %v905_v57 = vsub.f32 1.0, %v904_v56 }
0x1801   :  { %v906_v58 = vmul.f32 %v2011_v55, %v905_v57 }
0x1803   :  { %v907_v59 = vadd.f32 %v2011_v55, %v906_v58 }
0x1805   :  { %v911_v6 = vsel %vm910_vm12, %v2011_v55, %v907_v59 }
0x1806   :  { %v916_v23 = vsel %vm913_vm13, %v915_v20, %v911_v6 }
0x1864   :  { %v926_v22 = vpop.permute.xlu0 %925 }
0x1865   :  { %v928_v24 = vmul.f32 %v926_v22, %v916_v23 }
0x1867   :  { %930 = vrot.lane.b32.xlu1 %v928_v24, %s2097_s10 }
0x186c   :  { %v921_v25 = vpop.permute.xlu0 %920 }
0x186d   :  { %v923_v26 = vmul.f32 %v921_v25, %v916_v23 }
0x18d9   :  { %v931_v27 = vpop.permute.xlu1 %930 }
0x18da   :  { %v933_v32 = vadd.f32 %v931_v27, %v923_v26 }
0x18dc   :  { %2012 = vtanh.f32 %v933_v32 }
0x18e2   :  { %v2013_v33 = vpop.eup %2012 }
0x18e3   :  { %936 = vrot.lane.b32.xlu1 %v2013_v33, %s2096_s30 }
0x1955   :  { %v937_v34 = vpop.permute.xlu1 %936 }
0x1956   :  { %v939_v36 = vmul.f32 %v937_v34, %v916_v23 }
0x1958   :  { %941 = vrot.lane.b32.xlu2 %v939_v36, %s2097_s10 }
0x1960   :  { %946 = vrot.lane.b32.xlu2 %v933_v32, %s2098_s11 }
0x19b2   :  { %v942_v37 = vpop.permute.xlu2 %941 }
0x19b3   :  { %944 = vst.msk [vmem:[#allocation2] sm:$0xff] %vm72_vm0, %v942_v37  ;;  %1865 = vmatmul.msk.f32.vlgmr.msra.gmra.mxu1 %vm72_vm0, %v942_v37 }
0x19ba   :  { %v947_v38 = vpop.permute.xlu2 %946 }
0x19bb   :  { %949 = vst.msk [vmem:[#allocation3] sm:$0xff] %vm72_vm0, %v947_v38 }
0x1a2f   :  { %978 = sbr.rel (%p1867_p2) target bundleno = 6710 (0x1a36), region = 45 }
0x1a30   :  { %v969_v39 = vpop.f32.mrf.mxu1 }
0x1a31   :  { %v970_v40 = vadd.f32 %v2424_v21, %v969_v39 }
0x1a33   :  { %973 = vst [vmem:[#allocation7 + $0x10] sm:$0xff] %v970_v40 }
0x1a34   :  { %v1868_v41 = vld [vmem:[%s2700_s3 + $0x10] sm:$0xff] }
0x1a35   :  { %981 = vst [vmem:[#allocation4] sm:$0xff] %v1868_v41 }
0x1a36 PF:  { %p1869_p3 = scmp.gt.s32.totalorder %s1866_s8, 0 }
0x1a38   :  { %985 = sbr.rel (%p1869_p3) target bundleno = 7205 (0x1c25), region = 49 }
0x1a3d   :  { %986 = vmax.xlane.f32.xlu0 %v970_v40  ;;  %1007 = vmatpush.msra.mxu0 %v2247_v19  ;;  %v2100_v55 = vmov 1.0  }
0x1a3f   :  { %1008 = vmatpush.msra.mxu0 %v2242_v18 }
0x1a41   :  { %1009 = vmatpush.msra.mxu0 %v2237_v17 }
0x1a43   :  { %1010 = vmatpush.msra.mxu0 %v2232_v16 }
0x1a45   :  { %1011 = vmatpush.msra.mxu0 %v2227_v15 }
0x1a47   :  { %1012 = vmatpush.msra.mxu0 %v2222_v14 }
0x1a49   :  { %1013 = vmatpush.msra.mxu0 %v2216_v13 }
0x1a4b   :  { %1014 = vmatpush.msra.mxu0 %v2211_v12 }
0x1a4d   :  { %1015 = vmatpush.msra.mxu0 %v2206_v11 }
0x1a4f   :  { %1016 = vmatpush.msra.mxu0 %v2198_v9 }
0x1a51   :  { %1017 = vmatpush.msra.mxu0 %v2193_v8 }
0x1a53   :  { %1018 = vmatpush.msra.mxu0 %v2188_v7 }
0x1a55   :  { %1019 = vmatpush.msra.mxu0 %v2183_v5 }
0x1a57   :  { %1020 = vmatpush.msra.mxu0 %v2178_v4 }
0x1a59   :  { %1021 = vmatpush.msra.mxu0 %v2173_v3 }
0x1a5b   :  { %1022 = vmatpush.msra.mxu0 %v2168_v1 }
0x1ab0   :  { %v987_v42 = vpop.xlane.xlu0 %986 }
0x1ab1   :  { %vm988_vm14 = vcmp.eq.f32.partialorder %v970_v40, %v987_v42 }
0x1ab2   :  { %v989_v43 = vsel %vm988_vm14, %v2200_v10, 128 }
0x1ab3   :  { %v991_v44 = vshra.s32 %v989_v43, 16  ;;  %v990_v46 = vand.u32 65535, %v989_v43 }
0x1ab5   :  { %v993_v45 = vcvt.s32.f32 %v991_v44  ;;  %v992_v48 = vcvt.s32.f32 %v990_v46 }
0x1ab7   :  { %994 = vmin.xlane.f32.xlu0 %v993_v45 }
0x1b2a   :  { %v995_v47 = vpop.xlane.xlu0 %994 }
0x1b2b   :  { %vm996_vm15 = vcmp.eq.f32.partialorder %v993_v45, %v995_v47  ;;  %v1001_v50 = vcvt.f32.s32 %v995_v47 }
0x1b2c   :  { %v997_v49 = vsel %vm996_vm15, %v992_v48, inf }
0x1b2d   :  { %998 = vmin.xlane.f32.xlu1 %v997_v49  ;;  %v1002_v52 = vshll.u32 %v1001_v50, 16 }
0x1ba0   :  { %v999_v51 = vpop.xlane.xlu1 %998 }
0x1ba1   :  { %v1000_v53 = vcvt.f32.s32 %v999_v51 }
0x1ba3   :  { %v1003_v54 = vadd.s32 %v1002_v52, %v1000_v53 }
0x1ba5   :  { %vm1004_vm1 = vcmp.eq.s32.totalorder %v2200_v10, %v1003_v54 }
0x1ba6   :  { %1871 = vmatmul.msk.f32.vlgmr.msra.gmra.mxu0 %vm1004_vm1, %v2100_v55 }
0x1c23   :  { %v1024_v56 = vpop.f32.mrf.mxu0 }
0x1c24   :  { %1027 = vst [vmem:[#allocation4] sm:$0xff] %v1024_v56 }
0x1c25 PF:  { %1047 = vmatpush.msra.mxu0 %v2357_v28  ;;  %1121 = vmatpush.msra.mxu1 %v2397_v61  ;;  %v1028_v57 = vld [vmem:[#allocation2] sm:$0xff]  ;;  %v1029_v20 = vld [vmem:[#allocation3] sm:$0xff]  ;;  %s1875_s26 = sld [smem:[#allocation6 + $0x3]] }
0x1c27   :  { %1048 = vmatpush.msra.mxu0 %v2362_v29  ;;  %1122 = vmatpush.msra.mxu1 %v2402_v62 }
0x1c29   :  { %1049 = vmatpush.msra.mxu0 %v2368_v30  ;;  %1123 = vmatpush.msra.mxu1 %v2408_v63 }
0x1c2b   :  { %1050 = vmatpush.msra.mxu0 %v2374_v31  ;;  %1124 = vmatpush.msra.mxu1 %v2414_v0  ;;  %v1030_v58 = vld [vmem:[#allocation4] sm:$0xff]  ;;  %p1876_p4 = scmp.le.s32.totalorder %s1875_s26, 0 }
0x1c2c   :  { %1872 = vmatmul.msk.f32.vlgmr.msra.gmra.mxu0 %vm72_vm0, %v1028_v57  ;;  %v1031_v59 = vadd.f32 %v2386_v35, %v1030_v58 }
0x1ca9   :  { %v1052_v60 = vpop.f32.mrf.mxu0 }
0x1caa   :  { %v1055_v2 = vadd.f32 %v1052_v60, %v1031_v59 }
0x1cac   :  { %2014 = vtanh.f32 %v1055_v2  ;;  %v1873_v22 = vmul.f32 -1.442695, %v1055_v2 }
0x1cae   :  { %2016 = vpow2.f32 %v1873_v22 }
0x1cb2   :  { %v2015_v6 = vpop.eup %2014 }
0x1cb3   :  { %1082 = vrot.lane.b32.xlu0 %v2015_v6, %s2096_s30 }
0x1cb4   :  { %v2017_v23 = vpop.eup %2016 }
0x1cb5   :  { %v1059_v24 = vadd.f32 1.0, %v2017_v23 }
0x1cb7   :  { %2018 = vrcp.f32 %v1059_v24  ;;  %v1071_v34 = vand.u32 2147483648, %v1059_v24  ;;  %vm1065_vm3 = vweird.f32 %v1059_v24  ;;  %v1069_v36 = vand.u32 2147483647, %v1059_v24 }
0x1cb9   :  { %v1072_v38 = vor.u32 1.1754944e-38, %v1071_v34  ;;  %vm1070_vm5 = vcmp.eq.f32.partialorder %v1069_v36, 8.507059e+37 }
0x1cbb   :  { %1077 = vrot.lane.b32.xlu0 %v1029_v20, %s2097_s10 }
0x1cbd   :  { %v2019_v25 = vpop.eup %2018 }
0x1cbe   :  { %v1061_v26 = vmul.f32 %v2019_v25, %v1059_v24  ;;  %vm1066_vm2 = vweird.f32 %v2019_v25 }
0x1cbf   :  { %vm1067_vm4 = vmor %vm1065_vm3, %vm1066_vm2 }
0x1cc0   :  { %v1062_v27 = vsub.f32 1.0, %v1061_v26 }
0x1cc2   :  { %v1063_v32 = vmul.f32 %v2019_v25, %v1062_v27 }
0x1cc4   :  { %v1064_v33 = vadd.f32 %v2019_v25, %v1063_v32 }
0x1cc6   :  { %v1068_v37 = vsel %vm1067_vm4, %v2019_v25, %v1064_v33 }
0x1cc7   :  { %v1073_v40 = vsel %vm1070_vm5, %v1072_v38, %v1068_v37 }
0x1d25   :  { %v1083_v39 = vpop.permute.xlu0 %1082 }
0x1d26   :  { %v1085_v41 = vmul.f32 %v1083_v39, %v1073_v40 }
0x1d28   :  { %1087 = vrot.lane.b32.xlu1 %v1085_v41, %s2097_s10 }
0x1d2d   :  { %v1078_v42 = vpop.permute.xlu0 %1077 }
0x1d2e   :  { %v1080_v43 = vmul.f32 %v1078_v42, %v1073_v40 }
0x1d9a   :  { %v1088_v44 = vpop.permute.xlu1 %1087 }
0x1d9b   :  { %v1090_v45 = vadd.f32 %v1088_v44, %v1080_v43 }
0x1d9d   :  { %2020 = vtanh.f32 %v1090_v45 }
0x1da3   :  { %v2021_v46 = vpop.eup %2020 }
0x1da4   :  { %1093 = vrot.lane.b32.xlu1 %v2021_v46, %s2096_s30 }
0x1e16   :  { %v1094_v47 = vpop.permute.xlu1 %1093 }
0x1e17   :  { %v1096_v48 = vmul.f32 %v1094_v47, %v1073_v40 }
0x1e19   :  { %1098 = vrot.lane.b32.xlu2 %v1096_v48, %s2097_s10 }
0x1e21   :  { %1103 = vrot.lane.b32.xlu2 %v1090_v45, %s2098_s11 }
0x1e73   :  { %v1099_v49 = vpop.permute.xlu2 %1098 }
0x1e74   :  { %1101 = vst.msk [vmem:[#allocation2] sm:$0xff] %vm72_vm0, %v1099_v49  ;;  %1874 = vmatmul.msk.f32.vlgmr.msra.gmra.mxu1 %vm72_vm0, %v1099_v49 }
0x1e7b   :  { %v1104_v50 = vpop.permute.xlu2 %1103 }
0x1e7c   :  { %1106 = vst.msk [vmem:[#allocation3] sm:$0xff] %vm72_vm0, %v1104_v50 }
0x1ef0   :  { %1135 = sbr.rel (%p1876_p4) target bundleno = 7927 (0x1ef7), region = 53 }
0x1ef1   :  { %v1126_v51 = vpop.f32.mrf.mxu1 }
0x1ef2   :  { %v1127_v52 = vadd.f32 %v2424_v21, %v1126_v51 }
0x1ef4   :  { %1130 = vst [vmem:[#allocation7 + $0x18] sm:$0xff] %v1127_v52 }
0x1ef5   :  { %v1877_v53 = vld [vmem:[%s2700_s3 + $0x18] sm:$0xff] }
0x1ef6   :  { %1138 = vst [vmem:[#allocation4] sm:$0xff] %v1877_v53 }
0x1ef7 PF:  { %p1878_p5 = scmp.gt.s32.totalorder %s1875_s26, 0 }
0x1ef9   :  { %1142 = sbr.rel (%p1878_p5) target bundleno = 8422 (0x20e6), region = 57 }
0x1efe   :  { %1143 = vmax.xlane.f32.xlu0 %v1127_v52  ;;  %1164 = vmatpush.msra.mxu0 %v2247_v19  ;;  %v2101_v25 = vmov 1.0  }
0x1f00   :  { %1165 = vmatpush.msra.mxu0 %v2242_v18 }
0x1f02   :  { %1166 = vmatpush.msra.mxu0 %v2237_v17 }
0x1f04   :  { %1167 = vmatpush.msra.mxu0 %v2232_v16 }
0x1f06   :  { %1168 = vmatpush.msra.mxu0 %v2227_v15 }
0x1f08   :  { %1169 = vmatpush.msra.mxu0 %v2222_v14 }
0x1f0a   :  { %1170 = vmatpush.msra.mxu0 %v2216_v13 }
0x1f0c   :  { %1171 = vmatpush.msra.mxu0 %v2211_v12 }
0x1f0e   :  { %1172 = vmatpush.msra.mxu0 %v2206_v11 }
0x1f10   :  { %1173 = vmatpush.msra.mxu0 %v2198_v9 }
0x1f12   :  { %1174 = vmatpush.msra.mxu0 %v2193_v8 }
0x1f14   :  { %1175 = vmatpush.msra.mxu0 %v2188_v7 }
0x1f16   :  { %1176 = vmatpush.msra.mxu0 %v2183_v5 }
0x1f18   :  { %1177 = vmatpush.msra.mxu0 %v2178_v4 }
0x1f1a   :  { %1178 = vmatpush.msra.mxu0 %v2173_v3 }
0x1f1c   :  { %1179 = vmatpush.msra.mxu0 %v2168_v1 }
0x1f71   :  { %v1144_v54 = vpop.xlane.xlu0 %1143 }
0x1f72   :  { %vm1145_vm6 = vcmp.eq.f32.partialorder %v1127_v52, %v1144_v54 }
0x1f73   :  { %v1146_v55 = vsel %vm1145_vm6, %v2200_v10, 128 }
0x1f74   :  { %v1148_v56 = vshra.s32 %v1146_v55, 16  ;;  %v1147_v58 = vand.u32 65535, %v1146_v55 }
0x1f76   :  { %v1150_v57 = vcvt.s32.f32 %v1148_v56  ;;  %v1149_v60 = vcvt.s32.f32 %v1147_v58 }
0x1f78   :  { %1151 = vmin.xlane.f32.xlu0 %v1150_v57 }
0x1feb   :  { %v1152_v59 = vpop.xlane.xlu0 %1151 }
0x1fec   :  { %vm1153_vm7 = vcmp.eq.f32.partialorder %v1150_v57, %v1152_v59  ;;  %v1158_v6 = vcvt.f32.s32 %v1152_v59 }
0x1fed   :  { %v1154_v2 = vsel %vm1153_vm7, %v1149_v60, inf }
0x1fee   :  { %1155 = vmin.xlane.f32.xlu1 %v1154_v2  ;;  %v1159_v22 = vshll.u32 %v1158_v6, 16 }
0x2061   :  { %v1156_v20 = vpop.xlane.xlu1 %1155 }
0x2062   :  { %v1157_v23 = vcvt.f32.s32 %v1156_v20 }
0x2064   :  { %v1160_v24 = vadd.s32 %v1159_v22, %v1157_v23 }
0x2066   :  { %vm1161_vm8 = vcmp.eq.s32.totalorder %v2200_v10, %v1160_v24 }
0x2067   :  { %1880 = vmatmul.msk.f32.vlgmr.msra.gmra.mxu0 %vm1161_vm8, %v2101_v25 }
0x20e4   :  { %v1181_v26 = vpop.f32.mrf.mxu0 }
0x20e5   :  { %1184 = vst [vmem:[#allocation4] sm:$0xff] %v1181_v26 }
0x20e6 PF:  { %1204 = vmatpush.msra.mxu0 %v2357_v28  ;;  %1278 = vmatpush.msra.mxu1 %v2397_v61  ;;  %v1185_v27 = vld [vmem:[#allocation2] sm:$0xff]  ;;  %v1186_v38 = vld [vmem:[#allocation3] sm:$0xff]  ;;  %s1884_s29 = sld [smem:[#allocation6 + $0x4]] }
0x20e8   :  { %1205 = vmatpush.msra.mxu0 %v2362_v29  ;;  %1279 = vmatpush.msra.mxu1 %v2402_v62 }
0x20ea   :  { %1206 = vmatpush.msra.mxu0 %v2368_v30  ;;  %1280 = vmatpush.msra.mxu1 %v2408_v63 }
0x20ec   :  { %1207 = vmatpush.msra.mxu0 %v2374_v31  ;;  %1281 = vmatpush.msra.mxu1 %v2414_v0  ;;  %v1187_v32 = vld [vmem:[#allocation4] sm:$0xff]  ;;  %p1885_p6 = scmp.le.s32.totalorder %s1884_s29, 0 }
0x20ed   :  { %1881 = vmatmul.msk.f32.vlgmr.msra.gmra.mxu0 %vm72_vm0, %v1185_v27  ;;  %v1188_v33 = vadd.f32 %v2386_v35, %v1187_v32 }
0x216a   :  { %v1209_v34 = vpop.f32.mrf.mxu0 }
0x216b   :  { %v1212_v36 = vadd.f32 %v1209_v34, %v1188_v33 }
0x216d   :  { %2022 = vtanh.f32 %v1212_v36  ;;  %v1882_v39 = vmul.f32 -1.442695, %v1212_v36 }
0x216f   :  { %2024 = vpow2.f32 %v1882_v39 }
0x2173   :  { %v2023_v37 = vpop.eup %2022 }
0x2174   :  { %1239 = vrot.lane.b32.xlu0 %v2023_v37, %s2096_s30 }
0x2175   :  { %v2025_v40 = vpop.eup %2024 }
0x2176   :  { %v1216_v41 = vadd.f32 1.0, %v2025_v40 }
0x2178   :  { %2026 = vrcp.f32 %v1216_v41  ;;  %v1228_v47 = vand.u32 2147483648, %v1216_v41  ;;  %vm1222_vm10 = vweird.f32 %v1216_v41  ;;  %v1226_v48 = vand.u32 2147483647, %v1216_v41 }
0x217a   :  { %v1229_v50 = vor.u32 1.1754944e-38, %v1228_v47  ;;  %vm1227_vm12 = vcmp.eq.f32.partialorder %v1226_v48, 8.507059e+37 }
0x217c   :  { %1234 = vrot.lane.b32.xlu0 %v1186_v38, %s2097_s10 }
0x217e   :  { %v2027_v42 = vpop.eup %2026 }
0x217f   :  { %v1218_v43 = vmul.f32 %v2027_v42, %v1216_v41  ;;  %vm1223_vm9 = vweird.f32 %v2027_v42 }
0x2180   :  { %vm1224_vm11 = vmor %vm1222_vm10, %vm1223_vm9 }
0x2181   :  { %v1219_v44 = vsub.f32 1.0, %v1218_v43 }
0x2183   :  { %v1220_v45 = vmul.f32 %v2027_v42, %v1219_v44 }
0x2185   :  { %v1221_v46 = vadd.f32 %v2027_v42, %v1220_v45 }
0x2187   :  { %v1225_v49 = vsel %vm1224_vm11, %v2027_v42, %v1221_v46 }
0x2188   :  { %v1230_v52 = vsel %vm1227_vm12, %v1229_v50, %v1225_v49 }
0x21e6   :  { %v1240_v51 = vpop.permute.xlu0 %1239 }
0x21e7   :  { %v1242_v53 = vmul.f32 %v1240_v51, %v1230_v52 }
0x21e9   :  { %1244 = vrot.lane.b32.xlu1 %v1242_v53, %s2097_s10 }
0x21ee   :  { %v1235_v54 = vpop.permute.xlu0 %1234 }
0x21ef   :  { %v1237_v55 = vmul.f32 %v1235_v54, %v1230_v52 }
0x225b   :  { %v1245_v56 = vpop.permute.xlu1 %1244 }
0x225c   :  { %v1247_v57 = vadd.f32 %v1245_v56, %v1237_v55 }
0x225e   :  { %2028 = vtanh.f32 %v1247_v57 }
0x2264   :  { %v2029_v58 = vpop.eup %2028 }
0x2265   :  { %1250 = vrot.lane.b32.xlu1 %v2029_v58, %s2096_s30 }
0x22d7   :  { %v1251_v59 = vpop.permute.xlu1 %1250 }
0x22d8   :  { %v1253_v60 = vmul.f32 %v1251_v59, %v1230_v52 }
0x22da   :  { %1255 = vrot.lane.b32.xlu2 %v1253_v60, %s2097_s10 }
0x22e2   :  { %1260 = vrot.lane.b32.xlu2 %v1247_v57, %s2098_s11 }
0x2334   :  { %v1256_v2 = vpop.permute.xlu2 %1255 }
0x2335   :  { %1258 = vst.msk [vmem:[#allocation2] sm:$0xff] %vm72_vm0, %v1256_v2  ;;  %1883 = vmatmul.msk.f32.vlgmr.msra.gmra.mxu1 %vm72_vm0, %v1256_v2 }
0x233c   :  { %v1261_v6 = vpop.permute.xlu2 %1260 }
0x233d   :  { %1263 = vst.msk [vmem:[#allocation3] sm:$0xff] %vm72_vm0, %v1261_v6 }
0x23b1   :  { %1292 = sbr.rel (%p1885_p6) target bundleno = 9144 (0x23b8), region = 61 }
0x23b2   :  { %v1283_v20 = vpop.f32.mrf.mxu1 }
0x23b3   :  { %v1284_v22 = vadd.f32 %v2424_v21, %v1283_v20 }
0x23b5   :  { %1287 = vst [vmem:[#allocation7 + $0x20] sm:$0xff] %v1284_v22 }
0x23b6   :  { %v1886_v23 = vld [vmem:[%s2700_s3 + $0x20] sm:$0xff] }
0x23b7   :  { %1295 = vst [vmem:[#allocation4] sm:$0xff] %v1886_v23 }
0x23b8 PF:  { %p1887_p7 = scmp.gt.s32.totalorder %s1884_s29, 0 }
0x23ba   :  { %1299 = sbr.rel (%p1887_p7) target bundleno = 9639 (0x25a7), region = 65 }
0x23bf   :  { %1300 = vmax.xlane.f32.xlu0 %v1284_v22  ;;  %1321 = vmatpush.msra.mxu0 %v2247_v19  ;;  %v2102_v42 = vmov 1.0  }
0x23c1   :  { %1322 = vmatpush.msra.mxu0 %v2242_v18 }
0x23c3   :  { %1323 = vmatpush.msra.mxu0 %v2237_v17 }
0x23c5   :  { %1324 = vmatpush.msra.mxu0 %v2232_v16 }
0x23c7   :  { %1325 = vmatpush.msra.mxu0 %v2227_v15 }
0x23c9   :  { %1326 = vmatpush.msra.mxu0 %v2222_v14 }
0x23cb   :  { %1327 = vmatpush.msra.mxu0 %v2216_v13 }
0x23cd   :  { %1328 = vmatpush.msra.mxu0 %v2211_v12 }
0x23cf   :  { %1329 = vmatpush.msra.mxu0 %v2206_v11 }
0x23d1   :  { %1330 = vmatpush.msra.mxu0 %v2198_v9 }
0x23d3   :  { %1331 = vmatpush.msra.mxu0 %v2193_v8 }
0x23d5   :  { %1332 = vmatpush.msra.mxu0 %v2188_v7 }
0x23d7   :  { %1333 = vmatpush.msra.mxu0 %v2183_v5 }
0x23d9   :  { %1334 = vmatpush.msra.mxu0 %v2178_v4 }
0x23db   :  { %1335 = vmatpush.msra.mxu0 %v2173_v3 }
0x23dd   :  { %1336 = vmatpush.msra.mxu0 %v2168_v1 }
0x2432   :  { %v1301_v24 = vpop.xlane.xlu0 %1300 }
0x2433   :  { %vm1302_vm13 = vcmp.eq.f32.partialorder %v1284_v22, %v1301_v24 }
0x2434   :  { %v1303_v25 = vsel %vm1302_vm13, %v2200_v10, 128 }
0x2435   :  { %v1305_v26 = vshra.s32 %v1303_v25, 16  ;;  %v1304_v32 = vand.u32 65535, %v1303_v25 }
0x2437   :  { %v1307_v27 = vcvt.s32.f32 %v1305_v26  ;;  %v1306_v34 = vcvt.s32.f32 %v1304_v32 }
0x2439   :  { %1308 = vmin.xlane.f32.xlu0 %v1307_v27 }
0x24ac   :  { %v1309_v33 = vpop.xlane.xlu0 %1308 }
0x24ad   :  { %vm1310_vm14 = vcmp.eq.f32.partialorder %v1307_v27, %v1309_v33  ;;  %v1315_v37 = vcvt.f32.s32 %v1309_v33 }
0x24ae   :  { %v1311_v36 = vsel %vm1310_vm14, %v1306_v34, inf }
0x24af   :  { %1312 = vmin.xlane.f32.xlu1 %v1311_v36  ;;  %v1316_v39 = vshll.u32 %v1315_v37, 16 }
0x2522   :  { %v1313_v38 = vpop.xlane.xlu1 %1312 }
0x2523   :  { %v1314_v40 = vcvt.f32.s32 %v1313_v38 }
0x2525   :  { %v1317_v41 = vadd.s32 %v1316_v39, %v1314_v40 }
0x2527   :  { %vm1318_vm15 = vcmp.eq.s32.totalorder %v2200_v10, %v1317_v41 }
0x2528   :  { %1889 = vmatmul.msk.f32.vlgmr.msra.gmra.mxu0 %vm1318_vm15, %v2102_v42 }
0x25a5   :  { %v1338_v43 = vpop.f32.mrf.mxu0 }
0x25a6   :  { %1341 = vst [vmem:[#allocation4] sm:$0xff] %v1338_v43 }
0x25a7 PF:  { %1361 = vmatpush.msra.mxu0 %v2357_v28  ;;  %1435 = vmatpush.msra.mxu1 %v2397_v61  ;;  %v1342_v44 = vld [vmem:[#allocation2] sm:$0xff]  ;;  %v1343_v50 = vld [vmem:[#allocation3] sm:$0xff]  ;;  %s1893_s12 = sld [smem:[#allocation6 + $0x5]] }
0x25a9   :  { %1362 = vmatpush.msra.mxu0 %v2362_v29  ;;  %1436 = vmatpush.msra.mxu1 %v2402_v62 }
0x25ab   :  { %1363 = vmatpush.msra.mxu0 %v2368_v30  ;;  %1437 = vmatpush.msra.mxu1 %v2408_v63 }
0x25ad   :  { %1364 = vmatpush.msra.mxu0 %v2374_v31  ;;  %1438 = vmatpush.msra.mxu1 %v2414_v0  ;;  %v1344_v45 = vld [vmem:[#allocation4] sm:$0xff]  ;;  %p1894_p8 = scmp.le.s32.totalorder %s1893_s12, 0 }
0x25ae   :  { %1890 = vmatmul.msk.f32.vlgmr.msra.gmra.mxu0 %vm72_vm0, %v1342_v44  ;;  %v1345_v46 = vadd.f32 %v2386_v35, %v1344_v45 }
0x262b   :  { %v1366_v47 = vpop.f32.mrf.mxu0 }
0x262c   :  { %v1369_v48 = vadd.f32 %v1366_v47, %v1345_v46 }
0x262e   :  { %2030 = vtanh.f32 %v1369_v48  ;;  %v1891_v51 = vmul.f32 -1.442695, %v1369_v48 }
0x2630   :  { %2032 = vpow2.f32 %v1891_v51 }
0x2634   :  { %v2031_v49 = vpop.eup %2030 }
0x2635   :  { %1396 = vrot.lane.b32.xlu0 %v2031_v49, %s2096_s30 }
0x2636   :  { %v2033_v52 = vpop.eup %2032 }
0x2637   :  { %v1373_v53 = vadd.f32 1.0, %v2033_v52 }
0x2639   :  { %2034 = vrcp.f32 %v1373_v53  ;;  %v1385_v59 = vand.u32 2147483648, %v1373_v53  ;;  %vm1379_vm2 = vweird.f32 %v1373_v53  ;;  %v1383_v60 = vand.u32 2147483647, %v1373_v53 }
0x263b   :  { %v1386_v6 = vor.u32 1.1754944e-38, %v1385_v59  ;;  %vm1384_vm4 = vcmp.eq.f32.partialorder %v1383_v60, 8.507059e+37 }
0x263d   :  { %1391 = vrot.lane.b32.xlu0 %v1343_v50, %s2097_s10 }
0x263f   :  { %v2035_v54 = vpop.eup %2034 }
0x2640   :  { %v1375_v55 = vmul.f32 %v2035_v54, %v1373_v53  ;;  %vm1380_vm1 = vweird.f32 %v2035_v54 }
0x2641   :  { %vm1381_vm3 = vmor %vm1379_vm2, %vm1380_vm1 }
0x2642   :  { %v1376_v56 = vsub.f32 1.0, %v1375_v55 }
0x2644   :  { %v1377_v57 = vmul.f32 %v2035_v54, %v1376_v56 }
0x2646   :  { %v1378_v58 = vadd.f32 %v2035_v54, %v1377_v57 }
0x2648   :  { %v1382_v2 = vsel %vm1381_vm3, %v2035_v54, %v1378_v58 }
0x2649   :  { %v1387_v22 = vsel %vm1384_vm4, %v1386_v6, %v1382_v2 }
0x26a7   :  { %v1397_v20 = vpop.permute.xlu0 %1396 }
0x26a8   :  { %v1399_v23 = vmul.f32 %v1397_v20, %v1387_v22 }
0x26aa   :  { %1401 = vrot.lane.b32.xlu1 %v1399_v23, %s2097_s10 }
0x26af   :  { %v1392_v24 = vpop.permute.xlu0 %1391 }
0x26b0   :  { %v1394_v25 = vmul.f32 %v1392_v24, %v1387_v22 }
0x271c   :  { %v1402_v26 = vpop.permute.xlu1 %1401 }
0x271d   :  { %v1404_v27 = vadd.f32 %v1402_v26, %v1394_v25 }
0x271f   :  { %2036 = vtanh.f32 %v1404_v27 }
0x2725   :  { %v2037_v32 = vpop.eup %2036 }
0x2726   :  { %1407 = vrot.lane.b32.xlu1 %v2037_v32, %s2096_s30 }
0x2798   :  { %v1408_v33 = vpop.permute.xlu1 %1407 }
0x2799   :  { %v1410_v34 = vmul.f32 %v1408_v33, %v1387_v22 }
0x279b   :  { %1412 = vrot.lane.b32.xlu2 %v1410_v34, %s2097_s10 }
0x27a3   :  { %1417 = vrot.lane.b32.xlu2 %v1404_v27, %s2098_s11 }
0x27f5   :  { %v1413_v36 = vpop.permute.xlu2 %1412 }
0x27f6   :  { %1415 = vst.msk [vmem:[#allocation2] sm:$0xff] %vm72_vm0, %v1413_v36  ;;  %1892 = vmatmul.msk.f32.vlgmr.msra.gmra.mxu1 %vm72_vm0, %v1413_v36 }
0x27fd   :  { %v1418_v37 = vpop.permute.xlu2 %1417 }
0x27fe   :  { %1420 = vst.msk [vmem:[#allocation3] sm:$0xff] %vm72_vm0, %v1418_v37 }
0x2872   :  { %1449 = sbr.rel (%p1894_p8) target bundleno = 10361 (0x2879), region = 69 }
0x2873   :  { %v1440_v38 = vpop.f32.mrf.mxu1 }
0x2874   :  { %v1441_v39 = vadd.f32 %v2424_v21, %v1440_v38 }
0x2876   :  { %1444 = vst [vmem:[#allocation7 + $0x28] sm:$0xff] %v1441_v39 }
0x2877   :  { %v1895_v40 = vld [vmem:[%s2700_s3 + $0x28] sm:$0xff] }
0x2878   :  { %1452 = vst [vmem:[#allocation4] sm:$0xff] %v1895_v40 }
0x2879 PF:  { %p1896_p9 = scmp.gt.s32.totalorder %s1893_s12, 0 }
0x287b   :  { %1456 = sbr.rel (%p1896_p9) target bundleno = 10856 (0x2a68), region = 73 }
0x2880   :  { %1457 = vmax.xlane.f32.xlu0 %v1441_v39  ;;  %1478 = vmatpush.msra.mxu0 %v2247_v19  ;;  %v2103_v54 = vmov 1.0  }
0x2882   :  { %1479 = vmatpush.msra.mxu0 %v2242_v18 }
0x2884   :  { %1480 = vmatpush.msra.mxu0 %v2237_v17 }
0x2886   :  { %1481 = vmatpush.msra.mxu0 %v2232_v16 }
0x2888   :  { %1482 = vmatpush.msra.mxu0 %v2227_v15 }
0x288a   :  { %1483 = vmatpush.msra.mxu0 %v2222_v14 }
0x288c   :  { %1484 = vmatpush.msra.mxu0 %v2216_v13 }
0x288e   :  { %1485 = vmatpush.msra.mxu0 %v2211_v12 }
0x2890   :  { %1486 = vmatpush.msra.mxu0 %v2206_v11 }
0x2892   :  { %1487 = vmatpush.msra.mxu0 %v2198_v9 }
0x2894   :  { %1488 = vmatpush.msra.mxu0 %v2193_v8 }
0x2896   :  { %1489 = vmatpush.msra.mxu0 %v2188_v7 }
0x2898   :  { %1490 = vmatpush.msra.mxu0 %v2183_v5 }
0x289a   :  { %1491 = vmatpush.msra.mxu0 %v2178_v4 }
0x289c   :  { %1492 = vmatpush.msra.mxu0 %v2173_v3 }
0x289e   :  { %1493 = vmatpush.msra.mxu0 %v2168_v1 }
0x28f3   :  { %v1458_v41 = vpop.xlane.xlu0 %1457 }
0x28f4   :  { %vm1459_vm5 = vcmp.eq.f32.partialorder %v1441_v39, %v1458_v41 }
0x28f5   :  { %v1460_v42 = vsel %vm1459_vm5, %v2200_v10, 128 }
0x28f6   :  { %v1462_v43 = vshra.s32 %v1460_v42, 16  ;;  %v1461_v45 = vand.u32 65535, %v1460_v42 }
0x28f8   :  { %v1464_v44 = vcvt.s32.f32 %v1462_v43  ;;  %v1463_v47 = vcvt.s32.f32 %v1461_v45 }
0x28fa   :  { %1465 = vmin.xlane.f32.xlu0 %v1464_v44 }
0x296d   :  { %v1466_v46 = vpop.xlane.xlu0 %1465 }
0x296e   :  { %vm1467_vm6 = vcmp.eq.f32.partialorder %v1464_v44, %v1466_v46  ;;  %v1472_v49 = vcvt.f32.s32 %v1466_v46 }
0x296f   :  { %v1468_v48 = vsel %vm1467_vm6, %v1463_v47, inf }
0x2970   :  { %1469 = vmin.xlane.f32.xlu1 %v1468_v48  ;;  %v1473_v51 = vshll.u32 %v1472_v49, 16 }
0x29e3   :  { %v1470_v50 = vpop.xlane.xlu1 %1469 }
0x29e4   :  { %v1471_v52 = vcvt.f32.s32 %v1470_v50 }
0x29e6   :  { %v1474_v53 = vadd.s32 %v1473_v51, %v1471_v52 }
0x29e8   :  { %vm1475_vm7 = vcmp.eq.s32.totalorder %v2200_v10, %v1474_v53 }
0x29e9   :  { %1898 = vmatmul.msk.f32.vlgmr.msra.gmra.mxu0 %vm1475_vm7, %v2103_v54 }
0x2a66   :  { %v1495_v55 = vpop.f32.mrf.mxu0 }
0x2a67   :  { %1498 = vst [vmem:[#allocation4] sm:$0xff] %v1495_v55 }
0x2a68 PF:  { %1518 = vmatpush.msra.mxu0 %v2357_v28  ;;  %1592 = vmatpush.msra.mxu1 %v2397_v61  ;;  %v1499_v56 = vld [vmem:[#allocation2] sm:$0xff]  ;;  %v1500_v6 = vld [vmem:[#allocation3] sm:$0xff]  ;;  %s1902_s15 = sld [smem:[#allocation6 + $0x6]] }
0x2a6a   :  { %1519 = vmatpush.msra.mxu0 %v2362_v29  ;;  %1593 = vmatpush.msra.mxu1 %v2402_v62 }
0x2a6c   :  { %1520 = vmatpush.msra.mxu0 %v2368_v30  ;;  %1594 = vmatpush.msra.mxu1 %v2408_v63 }
0x2a6e   :  { %1521 = vmatpush.msra.mxu0 %v2374_v31  ;;  %1595 = vmatpush.msra.mxu1 %v2414_v0  ;;  %v1501_v57 = vld [vmem:[#allocation4] sm:$0xff]  ;;  %p1903_p10 = scmp.le.s32.totalorder %s1902_s15, 0 }
0x2a6f   :  { %1899 = vmatmul.msk.f32.vlgmr.msra.gmra.mxu0 %vm72_vm0, %v1499_v56  ;;  %v1502_v58 = vadd.f32 %v2386_v35, %v1501_v57 }
0x2aec   :  { %v1523_v59 = vpop.f32.mrf.mxu0 }
0x2aed   :  { %v1526_v60 = vadd.f32 %v1523_v59, %v1502_v58 }
0x2aef   :  { %2038 = vtanh.f32 %v1526_v60  ;;  %v1900_v20 = vmul.f32 -1.442695, %v1526_v60 }
0x2af1   :  { %2040 = vpow2.f32 %v1900_v20 }
0x2af5   :  { %v2039_v2 = vpop.eup %2038 }
0x2af6   :  { %1553 = vrot.lane.b32.xlu0 %v2039_v2, %s2096_s30 }
0x2af7   :  { %v2041_v22 = vpop.eup %2040 }
0x2af8   :  { %v1530_v23 = vadd.f32 1.0, %v2041_v22 }
0x2afa   :  { %2042 = vrcp.f32 %v1530_v23  ;;  %v1542_v33 = vand.u32 2147483648, %v1530_v23  ;;  %vm1536_vm9 = vweird.f32 %v1530_v23  ;;  %v1540_v34 = vand.u32 2147483647, %v1530_v23 }
0x2afc   :  { %v1543_v37 = vor.u32 1.1754944e-38, %v1542_v33  ;;  %vm1541_vm11 = vcmp.eq.f32.partialorder %v1540_v34, 8.507059e+37 }
0x2afe   :  { %1548 = vrot.lane.b32.xlu0 %v1500_v6, %s2097_s10 }
0x2b00   :  { %v2043_v24 = vpop.eup %2042 }
0x2b01   :  { %v1532_v25 = vmul.f32 %v2043_v24, %v1530_v23  ;;  %vm1537_vm8 = vweird.f32 %v2043_v24 }
0x2b02   :  { %vm1538_vm10 = vmor %vm1536_vm9, %vm1537_vm8 }
0x2b03   :  { %v1533_v26 = vsub.f32 1.0, %v1532_v25 }
0x2b05   :  { %v1534_v27 = vmul.f32 %v2043_v24, %v1533_v26 }
0x2b07   :  { %v1535_v32 = vadd.f32 %v2043_v24, %v1534_v27 }
0x2b09   :  { %v1539_v36 = vsel %vm1538_vm10, %v2043_v24, %v1535_v32 }
0x2b0a   :  { %v1544_v39 = vsel %vm1541_vm11, %v1543_v37, %v1539_v36 }
0x2b68   :  { %v1554_v38 = vpop.permute.xlu0 %1553 }
0x2b69   :  { %v1556_v40 = vmul.f32 %v1554_v38, %v1544_v39 }
0x2b6b   :  { %1558 = vrot.lane.b32.xlu1 %v1556_v40, %s2097_s10 }
0x2b70   :  { %v1549_v41 = vpop.permute.xlu0 %1548 }
0x2b71   :  { %v1551_v42 = vmul.f32 %v1549_v41, %v1544_v39 }
0x2bdd   :  { %v1559_v43 = vpop.permute.xlu1 %1558 }
0x2bde   :  { %v1561_v44 = vadd.f32 %v1559_v43, %v1551_v42 }
0x2be0   :  { %2044 = vtanh.f32 %v1561_v44 }
0x2be6   :  { %v2045_v45 = vpop.eup %2044 }
0x2be7   :  { %1564 = vrot.lane.b32.xlu1 %v2045_v45, %s2096_s30 }
0x2c59   :  { %v1565_v46 = vpop.permute.xlu1 %1564 }
0x2c5a   :  { %v1567_v47 = vmul.f32 %v1565_v46, %v1544_v39 }
0x2c5c   :  { %1569 = vrot.lane.b32.xlu2 %v1567_v47, %s2097_s10 }
0x2c64   :  { %1574 = vrot.lane.b32.xlu2 %v1561_v44, %s2098_s11 }
0x2cb6   :  { %v1570_v48 = vpop.permute.xlu2 %1569 }
0x2cb7   :  { %1572 = vst.msk [vmem:[#allocation2] sm:$0xff] %vm72_vm0, %v1570_v48  ;;  %1901 = vmatmul.msk.f32.vlgmr.msra.gmra.mxu1 %vm72_vm0, %v1570_v48 }
0x2cbe   :  { %v1575_v49 = vpop.permute.xlu2 %1574 }
0x2cbf   :  { %1577 = vst.msk [vmem:[#allocation3] sm:$0xff] %vm72_vm0, %v1575_v49 }
0x2d33   :  { %1606 = sbr.rel (%p1903_p10) target bundleno = 11578 (0x2d3a), region = 77 }
0x2d34   :  { %v1597_v50 = vpop.f32.mrf.mxu1 }
0x2d35   :  { %v1598_v51 = vadd.f32 %v2424_v21, %v1597_v50 }
0x2d37   :  { %1601 = vst [vmem:[#allocation7 + $0x30] sm:$0xff] %v1598_v51 }
0x2d38   :  { %v1904_v52 = vld [vmem:[%s2700_s3 + $0x30] sm:$0xff] }
0x2d39   :  { %1609 = vst [vmem:[#allocation4] sm:$0xff] %v1904_v52 }
0x2d3a PF:  { %p1905_p11 = scmp.gt.s32.totalorder %s1902_s15, 0 }
0x2d3c   :  { %1613 = sbr.rel (%p1905_p11) target bundleno = 12073 (0x2f29), region = 81 }
0x2d41   :  { %1614 = vmax.xlane.f32.xlu0 %v1598_v51  ;;  %1635 = vmatpush.msra.mxu0 %v2247_v19  ;;  %v2104_v24 = vmov 1.0  }
0x2d43   :  { %1636 = vmatpush.msra.mxu0 %v2242_v18 }
0x2d45   :  { %1637 = vmatpush.msra.mxu0 %v2237_v17 }
0x2d47   :  { %1638 = vmatpush.msra.mxu0 %v2232_v16 }
0x2d49   :  { %1639 = vmatpush.msra.mxu0 %v2227_v15 }
0x2d4b   :  { %1640 = vmatpush.msra.mxu0 %v2222_v14 }
0x2d4d   :  { %1641 = vmatpush.msra.mxu0 %v2216_v13 }
0x2d4f   :  { %1642 = vmatpush.msra.mxu0 %v2211_v12 }
0x2d51   :  { %1643 = vmatpush.msra.mxu0 %v2206_v11 }
0x2d53   :  { %1644 = vmatpush.msra.mxu0 %v2198_v9 }
0x2d55   :  { %1645 = vmatpush.msra.mxu0 %v2193_v8 }
0x2d57   :  { %1646 = vmatpush.msra.mxu0 %v2188_v7 }
0x2d59   :  { %1647 = vmatpush.msra.mxu0 %v2183_v5 }
0x2d5b   :  { %1648 = vmatpush.msra.mxu0 %v2178_v4 }
0x2d5d   :  { %1649 = vmatpush.msra.mxu0 %v2173_v3 }
0x2d5f   :  { %1650 = vmatpush.msra.mxu0 %v2168_v1 }
0x2db4   :  { %v1615_v53 = vpop.xlane.xlu0 %1614 }
0x2db5   :  { %vm1616_vm12 = vcmp.eq.f32.partialorder %v1598_v51, %v1615_v53 }
0x2db6   :  { %v1617_v54 = vsel %vm1616_vm12, %v2200_v10, 128 }
0x2db7   :  { %v1619_v55 = vshra.s32 %v1617_v54, 16  ;;  %v1618_v57 = vand.u32 65535, %v1617_v54 }
0x2db9   :  { %v1621_v56 = vcvt.s32.f32 %v1619_v55  ;;  %v1620_v59 = vcvt.s32.f32 %v1618_v57 }
0x2dbb   :  { %1622 = vmin.xlane.f32.xlu0 %v1621_v56 }
0x2e2e   :  { %v1623_v58 = vpop.xlane.xlu0 %1622 }
0x2e2f   :  { %vm1624_vm13 = vcmp.eq.f32.partialorder %v1621_v56, %v1623_v58  ;;  %v1629_v2 = vcvt.f32.s32 %v1623_v58 }
0x2e30   :  { %v1625_v60 = vsel %vm1624_vm13, %v1620_v59, inf }
0x2e31   :  { %1626 = vmin.xlane.f32.xlu1 %v1625_v60  ;;  %v1630_v20 = vshll.u32 %v1629_v2, 16 }
0x2ea4   :  { %v1627_v6 = vpop.xlane.xlu1 %1626 }
0x2ea5   :  { %v1628_v22 = vcvt.f32.s32 %v1627_v6 }
0x2ea7   :  { %v1631_v23 = vadd.s32 %v1630_v20, %v1628_v22 }
0x2ea9   :  { %vm1632_vm14 = vcmp.eq.s32.totalorder %v2200_v10, %v1631_v23 }
0x2eaa   :  { %1907 = vmatmul.msk.f32.vlgmr.msra.gmra.mxu0 %vm1632_vm14, %v2104_v24 }
0x2f27   :  { %v1652_v25 = vpop.f32.mrf.mxu0 }
0x2f28   :  { %1655 = vst [vmem:[#allocation4] sm:$0xff] %v1652_v25 }
0x2f29 PF:  { %1675 = vmatpush.msra.mxu0 %v2357_v28  ;;  %1749 = vmatpush.msra.mxu1 %v2397_v61  ;;  %v1656_v26 = vld [vmem:[#allocation2] sm:$0xff]  ;;  %s1911_s16 = sld [smem:[#allocation6 + $0x7]] }
0x2f2b   :  { %1676 = vmatpush.msra.mxu0 %v2362_v29  ;;  %1750 = vmatpush.msra.mxu1 %v2402_v62  ;;  %v1657_v62 = vld [vmem:[#allocation3] sm:$0xff] }
0x2f2d   :  { %1677 = vmatpush.msra.mxu0 %v2368_v30  ;;  %1751 = vmatpush.msra.mxu1 %v2408_v63 }
0x2f2f   :  { %1678 = vmatpush.msra.mxu0 %v2374_v31  ;;  %1752 = vmatpush.msra.mxu1 %v2414_v0  ;;  %v1658_v27 = vld [vmem:[#allocation4] sm:$0xff]  ;;  %p1912_p12 = scmp.le.s32.totalorder %s1911_s16, 0 }
0x2f30   :  { %1908 = vmatmul.msk.f32.vlgmr.msra.gmra.mxu0 %vm72_vm0, %v1656_v26  ;;  %v1659_v28 = vadd.f32 %v2386_v35, %v1658_v27 }
0x2fad   :  { %v1680_v32 = vpop.f32.mrf.mxu0 }
0x2fae   :  { %v1683_v61 = vadd.f32 %v1680_v32, %v1659_v28 }
0x2fb0   :  { %2046 = vtanh.f32 %v1683_v61  ;;  %v1909_v30 = vmul.f32 -1.442695, %v1683_v61 }
0x2fb2   :  { %2048 = vpow2.f32 %v1909_v30 }
0x2fb6   :  { %v2047_v29 = vpop.eup %2046 }
0x2fb7   :  { %1710 = vrot.lane.b32.xlu0 %v2047_v29, %s2096_s30 }
0x2fb8   :  { %v2049_v63 = vpop.eup %2048 }
0x2fb9   :  { %v1687_v31 = vadd.f32 1.0, %v2049_v63 }
0x2fbb   :  { %2050 = vrcp.f32 %v1687_v31  ;;  %v1699_v35 = vand.u32 2147483648, %v1687_v31  ;;  %vm1693_vm1 = vweird.f32 %v1687_v31  ;;  %v1697_v38 = vand.u32 2147483647, %v1687_v31 }
0x2fbd   :  { %v1700_v40 = vor.u32 1.1754944e-38, %v1699_v35  ;;  %vm1698_vm3 = vcmp.eq.f32.partialorder %v1697_v38, 8.507059e+37 }
0x2fbf   :  { %1705 = vrot.lane.b32.xlu0 %v1657_v62, %s2097_s10 }
0x2fc1   :  { %v2051_v0 = vpop.eup %2050 }
0x2fc2   :  { %v1689_v33 = vmul.f32 %v2051_v0, %v1687_v31  ;;  %vm1694_vm15 = vweird.f32 %v2051_v0 }
0x2fc3   :  { %vm1695_vm2 = vmor %vm1693_vm1, %vm1694_vm15 }
0x2fc4   :  { %v1690_v34 = vsub.f32 1.0, %v1689_v33 }
0x2fc6   :  { %v1691_v36 = vmul.f32 %v2051_v0, %v1690_v34 }
0x2fc8   :  { %v1692_v37 = vadd.f32 %v2051_v0, %v1691_v36 }
0x2fca   :  { %v1696_v39 = vsel %vm1695_vm2, %v2051_v0, %v1692_v37 }
0x2fcb   :  { %v1701_v42 = vsel %vm1698_vm3, %v1700_v40, %v1696_v39 }
0x3029   :  { %v1711_v41 = vpop.permute.xlu0 %1710 }
0x302a   :  { %v1713_v43 = vmul.f32 %v1711_v41, %v1701_v42 }
0x302c   :  { %1715 = vrot.lane.b32.xlu1 %v1713_v43, %s2097_s10 }
0x3031   :  { %v1706_v44 = vpop.permute.xlu0 %1705 }
0x3032   :  { %v1708_v45 = vmul.f32 %v1706_v44, %v1701_v42 }
0x309e   :  { %v1716_v46 = vpop.permute.xlu1 %1715 }
0x309f   :  { %v1718_v47 = vadd.f32 %v1716_v46, %v1708_v45 }
0x30a1   :  { %2052 = vtanh.f32 %v1718_v47 }
0x30a7   :  { %v2053_v48 = vpop.eup %2052 }
0x30a8   :  { %1721 = vrot.lane.b32.xlu1 %v2053_v48, %s2096_s30 }
0x311a   :  { %v1722_v49 = vpop.permute.xlu1 %1721 }
0x311b   :  { %v1724_v50 = vmul.f32 %v1722_v49, %v1701_v42 }
0x311d   :  { %1726 = vrot.lane.b32.xlu2 %v1724_v50, %s2097_s10 }
0x3125   :  { %1731 = vrot.lane.b32.xlu2 %v1718_v47, %s2098_s11 }
0x3177   :  { %v1727_v51 = vpop.permute.xlu2 %1726 }
0x3178   :  { %1729 = vst.msk [vmem:[#allocation2] sm:$0xff] %vm72_vm0, %v1727_v51  ;;  %1910 = vmatmul.msk.f32.vlgmr.msra.gmra.mxu1 %vm72_vm0, %v1727_v51 }
0x317f   :  { %v1732_v52 = vpop.permute.xlu2 %1731 }
0x3180   :  { %1734 = vst.msk [vmem:[#allocation3] sm:$0xff] %vm72_vm0, %v1732_v52 }
0x31f4   :  { %1763 = sbr.rel (%p1912_p12) target bundleno = 12795 (0x31fb), region = 85 }
0x31f5   :  { %v1754_v53 = vpop.f32.mrf.mxu1 }
0x31f6   :  { %v1755_v54 = vadd.f32 %v2424_v21, %v1754_v53 }
0x31f8   :  { %1758 = vst [vmem:[#allocation7 + $0x38] sm:$0xff] %v1755_v54 }
0x31f9   :  { %v1913_v55 = vld [vmem:[%s2700_s3 + $0x38] sm:$0xff] }
0x31fa   :  { %1766 = vst [vmem:[#allocation4] sm:$0xff] %v1913_v55 }
0x31fb PF:  { %p1914_p13 = scmp.gt.s32.totalorder %s1911_s16, 0 }
0x31fd   :  { %1770 = sbr.rel (%p1914_p13) target bundleno = 13290 (0x33ea), region = 89 }
0x3202   :  { %1771 = vmax.xlane.f32.xlu0 %v1755_v54  ;;  %1792 = vmatpush.msra.mxu0 %v2247_v19 }
0x3204   :  { %1793 = vmatpush.msra.mxu0 %v2242_v18 }
0x3206   :  { %1794 = vmatpush.msra.mxu0 %v2237_v17 }
0x3208   :  { %1795 = vmatpush.msra.mxu0 %v2232_v16 }
0x320a   :  { %1796 = vmatpush.msra.mxu0 %v2227_v15 }
0x320c   :  { %1797 = vmatpush.msra.mxu0 %v2222_v14 }
0x320e   :  { %1798 = vmatpush.msra.mxu0 %v2216_v13 }
0x3210   :  { %1799 = vmatpush.msra.mxu0 %v2211_v12 }
0x3212   :  { %1800 = vmatpush.msra.mxu0 %v2206_v11 }
0x3214   :  { %1801 = vmatpush.msra.mxu0 %v2198_v9 }
0x3216   :  { %1802 = vmatpush.msra.mxu0 %v2193_v8 }
0x3218   :  { %1803 = vmatpush.msra.mxu0 %v2188_v7 }
0x321a   :  { %1804 = vmatpush.msra.mxu0 %v2183_v5 }
0x321c   :  { %1805 = vmatpush.msra.mxu0 %v2178_v4 }
0x321e   :  { %1806 = vmatpush.msra.mxu0 %v2173_v3 }
0x3220   :  { %1807 = vmatpush.msra.mxu0 %v2168_v1  ;;  %v2105_v1 = vmov 1.0  }
0x3275   :  { %v1772_v14 = vpop.xlane.xlu0 %1771 }
0x3276   :  { %vm1773_vm0 = vcmp.eq.f32.partialorder %v1755_v54, %v1772_v14 }
0x3277   :  { %v1774_v12 = vsel %vm1773_vm0, %v2200_v10, 128 }
0x3278   :  { %v1776_v13 = vshra.s32 %v1774_v12, 16  ;;  %v1775_v9 = vand.u32 65535, %v1774_v12 }
0x327a   :  { %v1778_v11 = vcvt.s32.f32 %v1776_v13  ;;  %v1777_v8 = vcvt.s32.f32 %v1775_v9 }
0x327c   :  { %1779 = vmin.xlane.f32.xlu0 %v1778_v11 }
0x32ef   :  { %v1780_v15 = vpop.xlane.xlu0 %1779 }
0x32f0   :  { %vm1781_vm4 = vcmp.eq.f32.partialorder %v1778_v11, %v1780_v15  ;;  %v1786_v5 = vcvt.f32.s32 %v1780_v15 }
0x32f1   :  { %v1782_v7 = vsel %vm1781_vm4, %v1777_v8, inf }
0x32f2   :  { %1783 = vmin.xlane.f32.xlu1 %v1782_v7  ;;  %v1787_v4 = vshll.u32 %v1786_v5, 16 }
0x3365   :  { %v1784_v16 = vpop.xlane.xlu1 %1783 }
0x3366   :  { %v1785_v17 = vcvt.f32.s32 %v1784_v16 }
0x3368   :  { %v1788_v3 = vadd.s32 %v1787_v4, %v1785_v17 }
0x336a   :  { %vm1789_vm5 = vcmp.eq.s32.totalorder %v2200_v10, %v1788_v3 }
0x336b   :  { %1916 = vmatmul.msk.f32.vlgmr.msra.gmra.mxu0 %vm1789_vm5, %v2105_v1 }
0x33e8   :  { %v1809_v18 = vpop.f32.mrf.mxu0 }
0x33e9   :  { %1812 = vst [vmem:[#allocation4] sm:$0xff] %v1809_v18 }
0x33ea PF:  { %s1819_s11 = sshll.u32 %s2706_s9, 4  ;;  %s2106_s0 = smov [#allocation7]   ;;  %s1820_s11 = int_to_ptr.hbm [resolvable:$true] %s1819_s11 }
0x33eb   :  { %s1817_s18 = sshll.u32 %s2106_s0, 4  ;;  %s2107_s19 = smov 128   ;;  %s1818_s18 = int_to_ptr.vmem [resolvable:$true] %s1817_s18 }
0x33ec   :  { %s2108_s20 = smov 8  }
0x33ed   :  { %1825 = dma.vmem_to_hbm [thread:$0]  %s1818_s18, 1024, %s1820_s11, [#allocation8], %s2107_s19, %s2107_s19, %s2108_s20  }
0x33ee   :  { %2092 = dma.done.wait [#allocation8], 1024  }
0x33ef   :  { %2093 = vsyncadd [#allocation8], 4294966272 }
0x33f0   :  { %1830 = vsyncpa [#allocation8], 1 }

</bundles_post_ra>
